<compile_context>
chip_gen: v5e
topology: v5e:2x2
jax: 0.10.0
libtpu: 0.0.40
codegen_flags: <defaults>
</compile_context>

<pallas_src>
import jax
import jax.numpy as jnp
from jax import lax
from jax.experimental import pallas as pl
from jax.experimental.pallas import tpu as pltpu

EPS = 1e-5  # LayerNorm / GroupNorm epsilon (PyTorch default)

PARAM_NAMES = (
    "f1_lnw", "f1_lnb", "f1_w1", "f1_b1", "f1_w2", "f1_b2",
    "a_lnw", "a_lnb", "a_wqkv", "a_wo",
    "c_lnw", "c_lnb", "c_wglu", "c_bglu", "c_dw", "c_gnw", "c_gnb",
    "c_pw2", "c_pb2",
    "f2_lnw", "f2_lnb", "f2_w1", "f2_b1", "f2_w2", "f2_b2",
    "o_lnw", "o_lnb",
)
N_AUX = 4  # cos, sin, R (rotate_half matrix), A (GroupNorm broadcast matrix)


# ----------------------------------------------------------------------------
# Shared math (traced inside the Pallas kernel and used as the host reference).
# ----------------------------------------------------------------------------
def _layer_norm(x, w, b):
    mu = jnp.mean(x, axis=-1, keepdims=True)
    var = jnp.mean(jnp.square(x - mu), axis=-1, keepdims=True)
    return (x - mu) * lax.rsqrt(var + EPS) * w + b


def _mm(a, b):
    # bf16 MXU inputs, f32 accumulation.
    return jnp.dot(a.astype(jnp.bfloat16), b.astype(jnp.bfloat16),
                   preferred_element_type=jnp.float32)


def _mm_t(a, b):
    # a @ b.T without materializing the transpose.
    return lax.dot_general(a.astype(jnp.bfloat16), b.astype(jnp.bfloat16),
                           (((1,), (1,)), ((), ())),
                           preferred_element_type=jnp.float32)


def _silu(x):
    return x * jax.nn.sigmoid(x)


def conformer_block_math(x, cos, sin, R, A, P, dims, *, get, recip):
    """One ConformerBlock applied to a single batch element x: (S, E) f32."""
    S, E, H, D = dims

    def ff(xin, pre):
        z = _layer_norm(xin, get(P[pre + "_lnw"]), get(P[pre + "_lnb"]))
        h = _silu(_mm(z, get(P[pre + "_w1"])) + get(P[pre + "_b1"]))
        return xin + (_mm(h, get(P[pre + "_w2"])) + get(P[pre + "_b2"]))

    # x = x + FeedForwardBlock(x)   (block carries its own internal residual)
    x = x + ff(x, "f1")

    # ------------------------------ AttentionBlock ---------------------------
    z = _layer_norm(x, get(P["a_lnw"]), get(P["a_lnb"]))
    qkv = _mm(z, get(P["a_wqkv"]))                  # (S, 3E); Q pre-scaled by 1/sqrt(D)
    q, k, v = qkv[:, :E], qkv[:, E:2 * E], qkv[:, 2 * E:]
    # RoPE on interleaved pairs; rotate_half(x) == x @ R (block-diag over heads).
    qr = q * cos + _mm(q, R) * sin
    kr = k * cos + _mm(k, R) * sin
    wo = get(P["a_wo"])                             # (E, E)
    attn = jnp.zeros((S, E), jnp.float32)
    for h in range(H):
        sl = slice(h * D, (h + 1) * D)
        s = _mm_t(qr[:, sl], kr[:, sl])             # (S, S)
        s = s - jnp.max(s, axis=-1, keepdims=True)
        p = jnp.exp(s)
        p = p * recip(jnp.sum(p, axis=-1, keepdims=True))
        ctx = _mm(p, v[:, sl])                      # (S, D)
        attn = attn + _mm(ctx, wo[sl, :])           # this head's slice of the out-proj
    x = x + (x + attn)                              # x + AttentionBlock(x)

    # ----------------------------- ConvolutionBlock --------------------------
    z = _layer_norm(x, get(P["c_lnw"]), get(P["c_lnb"]))
    g = _mm(z, get(P["c_wglu"])) + get(P["c_bglu"])       # pointwise conv (k=1) -> 2E
    y = g[:, :E] * jax.nn.sigmoid(g[:, E:])               # GLU over channels
    zrow = jnp.zeros((1, E), jnp.float32)
    prev = jnp.concatenate([zrow, y[:S - 1, :]], axis=0)  # t-1 (zero padded)
    nxt = jnp.concatenate([y[1:, :], zrow], axis=0)       # t+1 (zero padded)
    dw = get(P["c_dw"])                                   # (3, E) depthwise taps
    yc = _silu(prev * dw[0:1, :] + y * dw[1:2, :] + nxt * dw[2:3, :])
    # GroupNorm: per-(sample, group) stats over (time, group channels); the
    # broadcast back to channels is one (2,E)x(E,E) matmul with constant A.
    cs = jnp.concatenate([jnp.sum(yc, axis=0, keepdims=True),
                          jnp.sum(yc * yc, axis=0, keepdims=True)], axis=0)
    st = _mm(cs, A)                                        # (2, E): mean / mean-sq
    mc, m2c = st[0:1, :], st[1:2, :]
    vc = m2c - mc * mc
    yn = (yc - mc) * lax.rsqrt(vc + EPS) * get(P["c_gnw"]) + get(P["c_gnb"])
    conv = _mm(yn, get(P["c_pw2"])) + get(P["c_pb2"])      # pointwise conv (k=1)
    x = x + (x + conv)                                     # x + ConvolutionBlock(x)

    # x = x + FeedForwardBlock(x), then the final LayerNorm
    x = x + ff(x, "f2")
    x = _layer_norm(x, get(P["o_lnw"]), get(P["o_lnb"]))
    return x


# ----------------------------------------------------------------------------
# Pallas kernel: grid over batch, one (S, E) tile per step, weights resident.
# ----------------------------------------------------------------------------
def make_block_kernel(dims):
    def kernel(*refs):
        x_ref = refs[0]
        cos_ref, sin_ref, R_ref, A_ref = refs[1:1 + N_AUX]
        p_refs = dict(zip(PARAM_NAMES, refs[1 + N_AUX:1 + N_AUX + len(PARAM_NAMES)]))
        o_ref = refs[-1]
        o_ref[...] = conformer_block_math(
            x_ref[...], cos_ref[...], sin_ref[...], R_ref[...], A_ref[...],
            p_refs, dims,
            get=lambda r: r[...],                       # point-of-use loads
            recip=lambda t: pl.reciprocal(t, approx=True),
        )
    return kernel


def conformer_block_pallas(x, aux, P, dims):
    B, S, E = x.shape
    inputs = [x, *aux] + [P[n] for n in PARAM_NAMES]

    def resident(a):
        nd = a.ndim
        return pl.BlockSpec(a.shape, lambda b, _nd=nd: (0,) * _nd)

    in_specs = ([pl.BlockSpec((None, S, E), lambda b: (b, 0, 0))]
                + [resident(a) for a in inputs[1:]])
    out_specs = pl.BlockSpec((None, S, E), lambda b: (b, 0, 0))

    cost = pl.CostEstimate(
        flops=int(2 * B * S * (25 * E * E + 2 * S * E)),
        transcendentals=int(B * S * (dims[2] * S + 12 * E)),
        bytes_accessed=int(sum(a.size * a.dtype.itemsize for a in inputs)
                           + x.size * 4),
    )

    return pl.pallas_call(
        make_block_kernel(dims),
        grid=(B,),
        out_shape=jax.ShapeDtypeStruct((B, S, E), jnp.float32),
        in_specs=in_specs,
        out_specs=out_specs,
        compiler_params=pltpu.CompilerParams(
            dimension_semantics=("parallel",),   # megacore-shardable batch axis
            vmem_limit_bytes=32 * 1024 * 1024,
        ),
        cost_estimate=cost,
    )(*inputs)


def conformer_block_ref(x, aux, P, dims):
    cos, sin, R, A = aux
    ys = [conformer_block_math(x[b], cos, sin, R, A, P, dims,
                               get=lambda a: a, recip=lambda t: 1.0 / t)
          for b in range(x.shape[0])]
    return jnp.stack(ys, axis=0)


# ----------------------------------------------------------------------------
# Deterministic constants / parameters (glue).
# ----------------------------------------------------------------------------
def build_aux(S, E, H, D, G):
    t = jnp.arange(S, dtype=jnp.float32)
    theta = 1.0 / (10000.0 ** (jnp.arange(0, D, 2, dtype=jnp.float32) / D))
    enc = jnp.repeat(t[:, None] * theta[None, :], 2, axis=-1)   # (S, D) interleaved
    cos = jnp.tile(jnp.cos(enc), (1, H))                        # (S, E), same per head
    sin = jnp.tile(jnp.sin(enc), (1, H))
    # rotate_half(x) == x @ R  (interleaved pair swap with sign), block-diag over heads
    idx = jnp.arange(E // 2)
    R = jnp.zeros((E, E), jnp.float32)
    R = R.at[2 * idx + 1, 2 * idx].set(-1.0)
    R = R.at[2 * idx, 2 * idx + 1].set(1.0)
    # GroupNorm broadcast matrix: A[e, e'] = 1/(S*CG) if same group else 0
    CG = E // G
    gid = jnp.arange(E) // CG
    A = (gid[:, None] == gid[None, :]).astype(jnp.float32) / float(S * CG)
    return (cos, sin, R, A)


def init_layer_params(key, E, H, D):
    keys = iter(jax.random.split(key, 32))

    def nrm(shape, scale):
        return jax.random.normal(next(keys), shape, jnp.float32) * scale

    ones = lambda s: jnp.ones(s, jnp.float32)
    zeros = lambda s: jnp.zeros(s, jnp.float32)
    bf = lambda a: a.astype(jnp.bfloat16)     # MXU weights stored in bf16
    s_e = 1.0 / (E ** 0.5)
    s_4e = 1.0 / ((4 * E) ** 0.5)

    wqkv = nrm((E, 3 * E), s_e)
    wqkv = wqkv.at[:, :E].multiply(1.0 / (D ** 0.5))   # fold softmax scale into Q

    return dict(
        # FeedForwardBlock 1
        f1_lnw=ones((1, E)), f1_lnb=zeros((1, E)),
        f1_w1=bf(nrm((E, 4 * E), s_e)), f1_b1=nrm((1, 4 * E), 0.02),
        f1_w2=bf(nrm((4 * E, E), s_4e)), f1_b2=nrm((1, E), 0.02),
        # AttentionBlock (fused QKV, fused output projection, no bias)
        a_lnw=ones((1, E)), a_lnb=zeros((1, E)),
        a_wqkv=bf(wqkv), a_wo=bf(nrm((E, E), s_e)),
        # ConvolutionBlock
        c_lnw=ones((1, E)), c_lnb=zeros((1, E)),
        c_wglu=bf(nrm((E, 2 * E), s_e)), c_bglu=nrm((1, 2 * E), 0.02),
        c_dw=nrm((3, E), 0.3),
        c_gnw=ones((1, E)), c_gnb=zeros((1, E)),
        c_pw2=bf(nrm((E, E), s_e)), c_pb2=nrm((1, E), 0.02),
        # FeedForwardBlock 2
        f2_lnw=ones((1, E)), f2_lnb=zeros((1, E)),
        f2_w1=bf(nrm((E, 4 * E), s_e)), f2_b1=nrm((1, 4 * E), 0.02),
        f2_w2=bf(nrm((4 * E, E), s_4e)), f2_b2=nrm((1, E), 0.02),
        # final LayerNorm
        o_lnw=ones((1, E)), o_lnb=zeros((1, E)),
    )


if __name__ == "__main__":
    # Small config: embedding=128 (lane-dense, multiple of 32 for GroupNorm),
    # 4 heads, 2 layers, batch=2, seq=8.
    B, S, E, H, G, L = 2, 8, 128, 4, 32, 2
    D = E // H
    dims = (S, E, H, D)

    key = jax.random.PRNGKey(0)
    kx, kp = jax.random.split(key)
    x = jax.random.normal(kx, (B, S, E), jnp.float32)
    aux = build_aux(S, E, H, D, G)
    layer_params = [init_layer_params(k, E, H, D) for k in jax.random.split(kp, L)]

    # Pallas forward: one kernel launch per ConformerBlock.
    y = x
    for P in layer_params:
        y = conformer_block_pallas(y, aux, P, dims)
    y = jax.block_until_ready(y)

    # Host reference (same math / same bf16 matmul precision, plain XLA).
    yr = x
    for P in layer_params:
        yr = conformer_block_ref(yr, aux, P, dims)
    yr = jax.block_until_ready(yr)

    assert y.shape == (B, S, E)
    assert bool(jnp.all(jnp.isfinite(y)))
    max_diff = float(jnp.max(jnp.abs(y - yr)))
    assert max_diff < 5e-2, f"mismatch vs reference: {max_diff}"
    print("KERNEL_OK")
</pallas_src>

<mosaic_0001>
module attributes {stable_mosaic.version = 11 : i64} {
  func.func @kernel(%arg0: i32, %arg1: memref<1x8x128xf32, #tpu.memory_space<vmem>>, %arg2: memref<8x128xf32, #tpu.memory_space<vmem>>, %arg3: memref<8x128xf32, #tpu.memory_space<vmem>>, %arg4: memref<128x128xf32, #tpu.memory_space<vmem>>, %arg5: memref<128x128xf32, #tpu.memory_space<vmem>>, %arg6: memref<1x128xf32, #tpu.memory_space<vmem>>, %arg7: memref<1x128xf32, #tpu.memory_space<vmem>>, %arg8: memref<128x512xbf16, #tpu.memory_space<vmem>>, %arg9: memref<1x512xf32, #tpu.memory_space<vmem>>, %arg10: memref<512x128xbf16, #tpu.memory_space<vmem>>, %arg11: memref<1x128xf32, #tpu.memory_space<vmem>>, %arg12: memref<1x128xf32, #tpu.memory_space<vmem>>, %arg13: memref<1x128xf32, #tpu.memory_space<vmem>>, %arg14: memref<128x384xbf16, #tpu.memory_space<vmem>>, %arg15: memref<128x128xbf16, #tpu.memory_space<vmem>>, %arg16: memref<1x128xf32, #tpu.memory_space<vmem>>, %arg17: memref<1x128xf32, #tpu.memory_space<vmem>>, %arg18: memref<128x256xbf16, #tpu.memory_space<vmem>>, %arg19: memref<1x256xf32, #tpu.memory_space<vmem>>, %arg20: memref<3x128xf32, #tpu.memory_space<vmem>>, %arg21: memref<1x128xf32, #tpu.memory_space<vmem>>, %arg22: memref<1x128xf32, #tpu.memory_space<vmem>>, %arg23: memref<128x128xbf16, #tpu.memory_space<vmem>>, %arg24: memref<1x128xf32, #tpu.memory_space<vmem>>, %arg25: memref<1x128xf32, #tpu.memory_space<vmem>>, %arg26: memref<1x128xf32, #tpu.memory_space<vmem>>, %arg27: memref<128x512xbf16, #tpu.memory_space<vmem>>, %arg28: memref<1x512xf32, #tpu.memory_space<vmem>>, %arg29: memref<512x128xbf16, #tpu.memory_space<vmem>>, %arg30: memref<1x128xf32, #tpu.memory_space<vmem>>, %arg31: memref<1x128xf32, #tpu.memory_space<vmem>>, %arg32: memref<1x128xf32, #tpu.memory_space<vmem>>, %arg33: memref<1x8x128xf32, #tpu.memory_space<vmem>>) attributes {dimension_semantics = [#tpu.dimension_semantics<parallel>], iteration_bounds = array<i64: 2>, scalar_prefetch = 0 : i64, scratch_operands = 0 : i64, tpu.core_type = #tpu.core_type<tc>, window_params = [{transform_indices = @transform_0, window_bounds = array<i64: 1, 8, 128>}, {pipeline_mode = #tpu.pipeline_mode<synchronous>, transform_indices = @transform_1, window_bounds = array<i64: 8, 128>}, {pipeline_mode = #tpu.pipeline_mode<synchronous>, transform_indices = @transform_2, window_bounds = array<i64: 8, 128>}, {pipeline_mode = #tpu.pipeline_mode<synchronous>, transform_indices = @transform_3, window_bounds = array<i64: 128, 128>}, {pipeline_mode = #tpu.pipeline_mode<synchronous>, transform_indices = @transform_4, window_bounds = array<i64: 128, 128>}, {pipeline_mode = #tpu.pipeline_mode<synchronous>, transform_indices = @transform_5, window_bounds = array<i64: 1, 128>}, {pipeline_mode = #tpu.pipeline_mode<synchronous>, transform_indices = @transform_6, window_bounds = array<i64: 1, 128>}, {pipeline_mode = #tpu.pipeline_mode<synchronous>, transform_indices = @transform_7, window_bounds = array<i64: 128, 512>}, {pipeline_mode = #tpu.pipeline_mode<synchronous>, transform_indices = @transform_8, window_bounds = array<i64: 1, 512>}, {pipeline_mode = #tpu.pipeline_mode<synchronous>, transform_indices = @transform_9, window_bounds = array<i64: 512, 128>}, {pipeline_mode = #tpu.pipeline_mode<synchronous>, transform_indices = @transform_10, window_bounds = array<i64: 1, 128>}, {pipeline_mode = #tpu.pipeline_mode<synchronous>, transform_indices = @transform_11, window_bounds = array<i64: 1, 128>}, {pipeline_mode = #tpu.pipeline_mode<synchronous>, transform_indices = @transform_12, window_bounds = array<i64: 1, 128>}, {pipeline_mode = #tpu.pipeline_mode<synchronous>, transform_indices = @transform_13, window_bounds = array<i64: 128, 384>}, {pipeline_mode = #tpu.pipeline_mode<synchronous>, transform_indices = @transform_14, window_bounds = array<i64: 128, 128>}, {pipeline_mode = #tpu.pipeline_mode<synchronous>, transform_indices = @transform_15, window_bounds = array<i64: 1, 128>}, {pipeline_mode = #tpu.pipeline_mode<synchronous>, transform_indices = @transform_16, window_bounds = array<i64: 1, 128>}, {pipeline_mode = #tpu.pipeline_mode<synchronous>, transform_indices = @transform_17, window_bounds = array<i64: 128, 256>}, {pipeline_mode = #tpu.pipeline_mode<synchronous>, transform_indices = @transform_18, window_bounds = array<i64: 1, 256>}, {pipeline_mode = #tpu.pipeline_mode<synchronous>, transform_indices = @transform_19, window_bounds = array<i64: 3, 128>}, {pipeline_mode = #tpu.pipeline_mode<synchronous>, transform_indices = @transform_20, window_bounds = array<i64: 1, 128>}, {pipeline_mode = #tpu.pipeline_mode<synchronous>, transform_indices = @transform_21, window_bounds = array<i64: 1, 128>}, {pipeline_mode = #tpu.pipeline_mode<synchronous>, transform_indices = @transform_22, window_bounds = array<i64: 128, 128>}, {pipeline_mode = #tpu.pipeline_mode<synchronous>, transform_indices = @transform_23, window_bounds = array<i64: 1, 128>}, {pipeline_mode = #tpu.pipeline_mode<synchronous>, transform_indices = @transform_24, window_bounds = array<i64: 1, 128>}, {pipeline_mode = #tpu.pipeline_mode<synchronous>, transform_indices = @transform_25, window_bounds = array<i64: 1, 128>}, {pipeline_mode = #tpu.pipeline_mode<synchronous>, transform_indices = @transform_26, window_bounds = array<i64: 128, 512>}, {pipeline_mode = #tpu.pipeline_mode<synchronous>, transform_indices = @transform_27, window_bounds = array<i64: 1, 512>}, {pipeline_mode = #tpu.pipeline_mode<synchronous>, transform_indices = @transform_28, window_bounds = array<i64: 512, 128>}, {pipeline_mode = #tpu.pipeline_mode<synchronous>, transform_indices = @transform_29, window_bounds = array<i64: 1, 128>}, {pipeline_mode = #tpu.pipeline_mode<synchronous>, transform_indices = @transform_30, window_bounds = array<i64: 1, 128>}, {pipeline_mode = #tpu.pipeline_mode<synchronous>, transform_indices = @transform_31, window_bounds = array<i64: 1, 128>}, {transform_indices = @transform_32, window_bounds = array<i64: 1, 8, 128>}]} {
    %c0 = arith.constant 0 : index
    %c0_0 = arith.constant 0 : index
    %c0_1 = arith.constant 0 : index
    %0 = vector.load %arg1[%c0, %c0_0, %c0_1] : memref<1x8x128xf32, #tpu.memory_space<vmem>>, vector<1x8x128xf32>
    %1 = vector.shape_cast %0 : vector<1x8x128xf32> to vector<8x128xf32>
    %c0_2 = arith.constant 0 : index
    %c0_3 = arith.constant 0 : index
    %2 = vector.load %arg2[%c0_2, %c0_3] : memref<8x128xf32, #tpu.memory_space<vmem>>, vector<8x128xf32>
    %c0_4 = arith.constant 0 : index
    %c0_5 = arith.constant 0 : index
    %3 = vector.load %arg3[%c0_4, %c0_5] : memref<8x128xf32, #tpu.memory_space<vmem>>, vector<8x128xf32>
    %c0_6 = arith.constant 0 : index
    %c0_7 = arith.constant 0 : index
    %4 = vector.load %arg4[%c0_6, %c0_7] : memref<128x128xf32, #tpu.memory_space<vmem>>, vector<128x128xf32>
    %c0_8 = arith.constant 0 : index
    %c0_9 = arith.constant 0 : index
    %5 = vector.load %arg5[%c0_8, %c0_9] : memref<128x128xf32, #tpu.memory_space<vmem>>, vector<128x128xf32>
    %c0_10 = arith.constant 0 : index
    %c0_11 = arith.constant 0 : index
    %6 = vector.load %arg6[%c0_10, %c0_11] : memref<1x128xf32, #tpu.memory_space<vmem>>, vector<1x128xf32>
    %c0_12 = arith.constant 0 : index
    %c0_13 = arith.constant 0 : index
    %7 = vector.load %arg7[%c0_12, %c0_13] : memref<1x128xf32, #tpu.memory_space<vmem>>, vector<1x128xf32>
    %cst = arith.constant dense<0.000000e+00> : vector<8xf32>
    %8 = vector.multi_reduction <add>, %1, %cst [1] : vector<8x128xf32> to vector<8xf32>
    %9 = vector.shape_cast %8 : vector<8xf32> to vector<8x1xf32>
    %cst_14 = arith.constant 1.280000e+02 : f32
    %10 = vector.broadcast %cst_14 : f32 to vector<8x1xf32>
    %11 = arith.divf %9, %10 : vector<8x1xf32>
    %12 = vector.broadcast %11 : vector<8x1xf32> to vector<8x128xf32>
    %13 = arith.subf %1, %12 : vector<8x128xf32>
    %14 = arith.mulf %13, %13 : vector<8x128xf32>
    %cst_15 = arith.constant dense<0.000000e+00> : vector<8xf32>
    %15 = vector.multi_reduction <add>, %14, %cst_15 [1] : vector<8x128xf32> to vector<8xf32>
    %16 = vector.shape_cast %15 : vector<8xf32> to vector<8x1xf32>
    %cst_16 = arith.constant 1.280000e+02 : f32
    %17 = vector.broadcast %cst_16 : f32 to vector<8x1xf32>
    %18 = arith.divf %16, %17 : vector<8x1xf32>
    %19 = vector.broadcast %11 : vector<8x1xf32> to vector<8x128xf32>
    %20 = arith.subf %1, %19 : vector<8x128xf32>
    %cst_17 = arith.constant 9.99999974E-6 : f32
    %21 = vector.broadcast %cst_17 : f32 to vector<8x1xf32>
    %22 = arith.addf %18, %21 : vector<8x1xf32>
    %23 = math.rsqrt %22 : vector<8x1xf32>
    %24 = vector.broadcast %23 : vector<8x1xf32> to vector<8x128xf32>
    %25 = arith.mulf %20, %24 : vector<8x128xf32>
    %26 = vector.broadcast %6 : vector<1x128xf32> to vector<8x128xf32>
    %27 = arith.mulf %25, %26 : vector<8x128xf32>
    %28 = vector.broadcast %7 : vector<1x128xf32> to vector<8x128xf32>
    %29 = arith.addf %27, %28 : vector<8x128xf32>
    %c0_18 = arith.constant 0 : index
    %c0_19 = arith.constant 0 : index
    %30 = vector.load %arg8[%c0_18, %c0_19] : memref<128x512xbf16, #tpu.memory_space<vmem>>, vector<128x512xbf16>
    %31 = arith.truncf %29 : vector<8x128xf32> to vector<8x128xbf16>
    %cst_20 = arith.constant dense<0.000000e+00> : vector<8x512xf32>
    %32 = tpu.matmul %31, %30, %cst_20 {dimension_numbers = #tpu.dot_dimension_numbers<[1], [0], [0], [1], [0, 0, 1, 1], [], []>} : vector<8x128xbf16>, vector<128x512xbf16>, vector<8x512xf32> -> vector<8x512xf32>
    %c0_21 = arith.constant 0 : index
    %c0_22 = arith.constant 0 : index
    %33 = vector.load %arg9[%c0_21, %c0_22] : memref<1x512xf32, #tpu.memory_space<vmem>>, vector<1x512xf32>
    %34 = vector.broadcast %33 : vector<1x512xf32> to vector<8x512xf32>
    %35 = arith.addf %32, %34 : vector<8x512xf32>
    %36 = arith.negf %35 : vector<8x512xf32>
    %37 = math.exp %36 : vector<8x512xf32>
    %cst_23 = arith.constant 1.000000e+00 : f32
    %38 = vector.broadcast %cst_23 : f32 to vector<8x512xf32>
    %39 = arith.addf %38, %37 : vector<8x512xf32>
    %40 = arith.divf %38, %39 : vector<8x512xf32>
    %41 = arith.mulf %35, %40 : vector<8x512xf32>
    %c0_24 = arith.constant 0 : index
    %c0_25 = arith.constant 0 : index
    %42 = vector.load %arg10[%c0_24, %c0_25] : memref<512x128xbf16, #tpu.memory_space<vmem>>, vector<512x128xbf16>
    %43 = arith.truncf %41 : vector<8x512xf32> to vector<8x512xbf16>
    %cst_26 = arith.constant dense<0.000000e+00> : vector<8x128xf32>
    %44 = tpu.matmul %43, %42, %cst_26 {dimension_numbers = #tpu.dot_dimension_numbers<[1], [0], [0], [1], [0, 0, 1, 1], [], []>} : vector<8x512xbf16>, vector<512x128xbf16>, vector<8x128xf32> -> vector<8x128xf32>
    %c0_27 = arith.constant 0 : index
    %c0_28 = arith.constant 0 : index
    %45 = vector.load %arg11[%c0_27, %c0_28] : memref<1x128xf32, #tpu.memory_space<vmem>>, vector<1x128xf32>
    %46 = vector.broadcast %45 : vector<1x128xf32> to vector<8x128xf32>
    %47 = arith.addf %44, %46 : vector<8x128xf32>
    %48 = arith.addf %1, %47 : vector<8x128xf32>
    %49 = arith.addf %1, %48 : vector<8x128xf32>
    %c0_29 = arith.constant 0 : index
    %c0_30 = arith.constant 0 : index
    %50 = vector.load %arg12[%c0_29, %c0_30] : memref<1x128xf32, #tpu.memory_space<vmem>>, vector<1x128xf32>
    %c0_31 = arith.constant 0 : index
    %c0_32 = arith.constant 0 : index
    %51 = vector.load %arg13[%c0_31, %c0_32] : memref<1x128xf32, #tpu.memory_space<vmem>>, vector<1x128xf32>
    %cst_33 = arith.constant dense<0.000000e+00> : vector<8xf32>
    %52 = vector.multi_reduction <add>, %49, %cst_33 [1] : vector<8x128xf32> to vector<8xf32>
    %53 = vector.shape_cast %52 : vector<8xf32> to vector<8x1xf32>
    %cst_34 = arith.constant 1.280000e+02 : f32
    %54 = vector.broadcast %cst_34 : f32 to vector<8x1xf32>
    %55 = arith.divf %53, %54 : vector<8x1xf32>
    %56 = vector.broadcast %55 : vector<8x1xf32> to vector<8x128xf32>
    %57 = arith.subf %49, %56 : vector<8x128xf32>
    %58 = arith.mulf %57, %57 : vector<8x128xf32>
    %cst_35 = arith.constant dense<0.000000e+00> : vector<8xf32>
    %59 = vector.multi_reduction <add>, %58, %cst_35 [1] : vector<8x128xf32> to vector<8xf32>
    %60 = vector.shape_cast %59 : vector<8xf32> to vector<8x1xf32>
    %cst_36 = arith.constant 1.280000e+02 : f32
    %61 = vector.broadcast %cst_36 : f32 to vector<8x1xf32>
    %62 = arith.divf %60, %61 : vector<8x1xf32>
    %63 = vector.broadcast %55 : vector<8x1xf32> to vector<8x128xf32>
    %64 = arith.subf %49, %63 : vector<8x128xf32>
    %cst_37 = arith.constant 9.99999974E-6 : f32
    %65 = vector.broadcast %cst_37 : f32 to vector<8x1xf32>
    %66 = arith.addf %62, %65 : vector<8x1xf32>
    %67 = math.rsqrt %66 : vector<8x1xf32>
    %68 = vector.broadcast %67 : vector<8x1xf32> to vector<8x128xf32>
    %69 = arith.mulf %64, %68 : vector<8x128xf32>
    %70 = vector.broadcast %50 : vector<1x128xf32> to vector<8x128xf32>
    %71 = arith.mulf %69, %70 : vector<8x128xf32>
    %72 = vector.broadcast %51 : vector<1x128xf32> to vector<8x128xf32>
    %73 = arith.addf %71, %72 : vector<8x128xf32>
    %c0_38 = arith.constant 0 : index
    %c0_39 = arith.constant 0 : index
    %74 = vector.load %arg14[%c0_38, %c0_39] : memref<128x384xbf16, #tpu.memory_space<vmem>>, vector<128x384xbf16>
    %75 = arith.truncf %73 : vector<8x128xf32> to vector<8x128xbf16>
    %cst_40 = arith.constant dense<0.000000e+00> : vector<8x384xf32>
    %76 = tpu.matmul %75, %74, %cst_40 {dimension_numbers = #tpu.dot_dimension_numbers<[1], [0], [0], [1], [0, 0, 1, 1], [], []>} : vector<8x128xbf16>, vector<128x384xbf16>, vector<8x384xf32> -> vector<8x384xf32>
    %77 = vector.extract_strided_slice %76 {offsets = [0, 0], sizes = [8, 128], strides = [1, 1]} : vector<8x384xf32> to vector<8x128xf32>
    %78 = vector.extract_strided_slice %76 {offsets = [0, 128], sizes = [8, 128], strides = [1, 1]} : vector<8x384xf32> to vector<8x128xf32>
    %79 = vector.extract_strided_slice %76 {offsets = [0, 256], sizes = [8, 128], strides = [1, 1]} : vector<8x384xf32> to vector<8x128xf32>
    %80 = arith.mulf %77, %2 : vector<8x128xf32>
    %81 = arith.truncf %77 : vector<8x128xf32> to vector<8x128xbf16>
    %82 = arith.truncf %4 : vector<128x128xf32> to vector<128x128xbf16>
    %cst_41 = arith.constant dense<0.000000e+00> : vector<8x128xf32>
    %83 = tpu.matmul %81, %82, %cst_41 {dimension_numbers = #tpu.dot_dimension_numbers<[1], [0], [0], [1], [0, 0, 1, 1], [], []>} : vector<8x128xbf16>, vector<128x128xbf16>, vector<8x128xf32> -> vector<8x128xf32>
    %84 = arith.mulf %83, %3 : vector<8x128xf32>
    %85 = arith.addf %80, %84 : vector<8x128xf32>
    %86 = arith.mulf %78, %2 : vector<8x128xf32>
    %87 = arith.truncf %78 : vector<8x128xf32> to vector<8x128xbf16>
    %88 = arith.truncf %4 : vector<128x128xf32> to vector<128x128xbf16>
    %cst_42 = arith.constant dense<0.000000e+00> : vector<8x128xf32>
    %89 = tpu.matmul %87, %88, %cst_42 {dimension_numbers = #tpu.dot_dimension_numbers<[1], [0], [0], [1], [0, 0, 1, 1], [], []>} : vector<8x128xbf16>, vector<128x128xbf16>, vector<8x128xf32> -> vector<8x128xf32>
    %90 = arith.mulf %89, %3 : vector<8x128xf32>
    %91 = arith.addf %86, %90 : vector<8x128xf32>
    %c0_43 = arith.constant 0 : index
    %c0_44 = arith.constant 0 : index
    %92 = vector.load %arg15[%c0_43, %c0_44] : memref<128x128xbf16, #tpu.memory_space<vmem>>, vector<128x128xbf16>
    %cst_45 = arith.constant 0.000000e+00 : f32
    %93 = vector.broadcast %cst_45 : f32 to vector<8x128xf32>
    %94 = vector.extract_strided_slice %85 {offsets = [0, 0], sizes = [8, 32], strides = [1, 1]} : vector<8x128xf32> to vector<8x32xf32>
    %95 = vector.extract_strided_slice %91 {offsets = [0, 0], sizes = [8, 32], strides = [1, 1]} : vector<8x128xf32> to vector<8x32xf32>
    %96 = arith.truncf %94 : vector<8x32xf32> to vector<8x32xbf16>
    %97 = arith.truncf %95 : vector<8x32xf32> to vector<8x32xbf16>
    %cst_46 = arith.constant dense<0.000000e+00> : vector<8x8xf32>
    %98 = tpu.matmul %96, %97, %cst_46 {dimension_numbers = #tpu.dot_dimension_numbers<[1], [1], [0], [0], [0, 0, 1, 0], [], []>} : vector<8x32xbf16>, vector<8x32xbf16>, vector<8x8xf32> -> vector<8x8xf32>
    %cst_47 = arith.constant dense<0xFF800000> : vector<8xf32>
    %99 = vector.multi_reduction <maximumf>, %98, %cst_47 [1] : vector<8x8xf32> to vector<8xf32>
    %100 = vector.shape_cast %99 : vector<8xf32> to vector<8x1xf32>
    %101 = vector.broadcast %100 : vector<8x1xf32> to vector<8x8xf32>
    %102 = arith.subf %98, %101 : vector<8x8xf32>
    %103 = math.exp %102 : vector<8x8xf32>
    %cst_48 = arith.constant dense<0.000000e+00> : vector<8xf32>
    %104 = vector.multi_reduction <add>, %103, %cst_48 [1] : vector<8x8xf32> to vector<8xf32>
    %105 = vector.shape_cast %104 : vector<8xf32> to vector<8x1xf32>
    %106 = tpu.reciprocal %105 {approx = true} : vector<8x1xf32> -> vector<8x1xf32>
    %107 = vector.broadcast %106 : vector<8x1xf32> to vector<8x8xf32>
    %108 = arith.mulf %103, %107 : vector<8x8xf32>
    %109 = vector.extract_strided_slice %79 {offsets = [0, 0], sizes = [8, 32], strides = [1, 1]} : vector<8x128xf32> to vector<8x32xf32>
    %110 = arith.truncf %108 : vector<8x8xf32> to vector<8x8xbf16>
    %111 = arith.truncf %109 : vector<8x32xf32> to vector<8x32xbf16>
    %cst_49 = arith.constant dense<0.000000e+00> : vector<8x32xf32>
    %112 = tpu.matmul %110, %111, %cst_49 {dimension_numbers = #tpu.dot_dimension_numbers<[1], [0], [0], [1], [0, 0, 1, 1], [], []>} : vector<8x8xbf16>, vector<8x32xbf16>, vector<8x32xf32> -> vector<8x32xf32>
    %113 = vector.extract_strided_slice %92 {offsets = [0, 0], sizes = [32, 128], strides = [1, 1]} : vector<128x128xbf16> to vector<32x128xbf16>
    %114 = arith.truncf %112 : vector<8x32xf32> to vector<8x32xbf16>
    %cst_50 = arith.constant dense<0.000000e+00> : vector<8x128xf32>
    %115 = tpu.matmul %114, %113, %cst_50 {dimension_numbers = #tpu.dot_dimension_numbers<[1], [0], [0], [1], [0, 0, 1, 1], [], []>} : vector<8x32xbf16>, vector<32x128xbf16>, vector<8x128xf32> -> vector<8x128xf32>
    %116 = arith.addf %93, %115 : vector<8x128xf32>
    %117 = vector.extract_strided_slice %85 {offsets = [0, 32], sizes = [8, 32], strides = [1, 1]} : vector<8x128xf32> to vector<8x32xf32>
    %118 = vector.extract_strided_slice %91 {offsets = [0, 32], sizes = [8, 32], strides = [1, 1]} : vector<8x128xf32> to vector<8x32xf32>
    %119 = arith.truncf %117 : vector<8x32xf32> to vector<8x32xbf16>
    %120 = arith.truncf %118 : vector<8x32xf32> to vector<8x32xbf16>
    %cst_51 = arith.constant dense<0.000000e+00> : vector<8x8xf32>
    %121 = tpu.matmul %119, %120, %cst_51 {dimension_numbers = #tpu.dot_dimension_numbers<[1], [1], [0], [0], [0, 0, 1, 0], [], []>} : vector<8x32xbf16>, vector<8x32xbf16>, vector<8x8xf32> -> vector<8x8xf32>
    %cst_52 = arith.constant dense<0xFF800000> : vector<8xf32>
    %122 = vector.multi_reduction <maximumf>, %121, %cst_52 [1] : vector<8x8xf32> to vector<8xf32>
    %123 = vector.shape_cast %122 : vector<8xf32> to vector<8x1xf32>
    %124 = vector.broadcast %123 : vector<8x1xf32> to vector<8x8xf32>
    %125 = arith.subf %121, %124 : vector<8x8xf32>
    %126 = math.exp %125 : vector<8x8xf32>
    %cst_53 = arith.constant dense<0.000000e+00> : vector<8xf32>
    %127 = vector.multi_reduction <add>, %126, %cst_53 [1] : vector<8x8xf32> to vector<8xf32>
    %128 = vector.shape_cast %127 : vector<8xf32> to vector<8x1xf32>
    %129 = tpu.reciprocal %128 {approx = true} : vector<8x1xf32> -> vector<8x1xf32>
    %130 = vector.broadcast %129 : vector<8x1xf32> to vector<8x8xf32>
    %131 = arith.mulf %126, %130 : vector<8x8xf32>
    %132 = vector.extract_strided_slice %79 {offsets = [0, 32], sizes = [8, 32], strides = [1, 1]} : vector<8x128xf32> to vector<8x32xf32>
    %133 = arith.truncf %131 : vector<8x8xf32> to vector<8x8xbf16>
    %134 = arith.truncf %132 : vector<8x32xf32> to vector<8x32xbf16>
    %cst_54 = arith.constant dense<0.000000e+00> : vector<8x32xf32>
    %135 = tpu.matmul %133, %134, %cst_54 {dimension_numbers = #tpu.dot_dimension_numbers<[1], [0], [0], [1], [0, 0, 1, 1], [], []>} : vector<8x8xbf16>, vector<8x32xbf16>, vector<8x32xf32> -> vector<8x32xf32>
    %136 = vector.extract_strided_slice %92 {offsets = [32, 0], sizes = [32, 128], strides = [1, 1]} : vector<128x128xbf16> to vector<32x128xbf16>
    %137 = arith.truncf %135 : vector<8x32xf32> to vector<8x32xbf16>
    %cst_55 = arith.constant dense<0.000000e+00> : vector<8x128xf32>
    %138 = tpu.matmul %137, %136, %cst_55 {dimension_numbers = #tpu.dot_dimension_numbers<[1], [0], [0], [1], [0, 0, 1, 1], [], []>} : vector<8x32xbf16>, vector<32x128xbf16>, vector<8x128xf32> -> vector<8x128xf32>
    %139 = arith.addf %116, %138 : vector<8x128xf32>
    %140 = vector.extract_strided_slice %85 {offsets = [0, 64], sizes = [8, 32], strides = [1, 1]} : vector<8x128xf32> to vector<8x32xf32>
    %141 = vector.extract_strided_slice %91 {offsets = [0, 64], sizes = [8, 32], strides = [1, 1]} : vector<8x128xf32> to vector<8x32xf32>
    %142 = arith.truncf %140 : vector<8x32xf32> to vector<8x32xbf16>
    %143 = arith.truncf %141 : vector<8x32xf32> to vector<8x32xbf16>
    %cst_56 = arith.constant dense<0.000000e+00> : vector<8x8xf32>
    %144 = tpu.matmul %142, %143, %cst_56 {dimension_numbers = #tpu.dot_dimension_numbers<[1], [1], [0], [0], [0, 0, 1, 0], [], []>} : vector<8x32xbf16>, vector<8x32xbf16>, vector<8x8xf32> -> vector<8x8xf32>
    %cst_57 = arith.constant dense<0xFF800000> : vector<8xf32>
    %145 = vector.multi_reduction <maximumf>, %144, %cst_57 [1] : vector<8x8xf32> to vector<8xf32>
    %146 = vector.shape_cast %145 : vector<8xf32> to vector<8x1xf32>
    %147 = vector.broadcast %146 : vector<8x1xf32> to vector<8x8xf32>
    %148 = arith.subf %144, %147 : vector<8x8xf32>
    %149 = math.exp %148 : vector<8x8xf32>
    %cst_58 = arith.constant dense<0.000000e+00> : vector<8xf32>
    %150 = vector.multi_reduction <add>, %149, %cst_58 [1] : vector<8x8xf32> to vector<8xf32>
    %151 = vector.shape_cast %150 : vector<8xf32> to vector<8x1xf32>
    %152 = tpu.reciprocal %151 {approx = true} : vector<8x1xf32> -> vector<8x1xf32>
    %153 = vector.broadcast %152 : vector<8x1xf32> to vector<8x8xf32>
    %154 = arith.mulf %149, %153 : vector<8x8xf32>
    %155 = vector.extract_strided_slice %79 {offsets = [0, 64], sizes = [8, 32], strides = [1, 1]} : vector<8x128xf32> to vector<8x32xf32>
    %156 = arith.truncf %154 : vector<8x8xf32> to vector<8x8xbf16>
    %157 = arith.truncf %155 : vector<8x32xf32> to vector<8x32xbf16>
    %cst_59 = arith.constant dense<0.000000e+00> : vector<8x32xf32>
    %158 = tpu.matmul %156, %157, %cst_59 {dimension_numbers = #tpu.dot_dimension_numbers<[1], [0], [0], [1], [0, 0, 1, 1], [], []>} : vector<8x8xbf16>, vector<8x32xbf16>, vector<8x32xf32> -> vector<8x32xf32>
    %159 = vector.extract_strided_slice %92 {offsets = [64, 0], sizes = [32, 128], strides = [1, 1]} : vector<128x128xbf16> to vector<32x128xbf16>
    %160 = arith.truncf %158 : vector<8x32xf32> to vector<8x32xbf16>
    %cst_60 = arith.constant dense<0.000000e+00> : vector<8x128xf32>
    %161 = tpu.matmul %160, %159, %cst_60 {dimension_numbers = #tpu.dot_dimension_numbers<[1], [0], [0], [1], [0, 0, 1, 1], [], []>} : vector<8x32xbf16>, vector<32x128xbf16>, vector<8x128xf32> -> vector<8x128xf32>
    %162 = arith.addf %139, %161 : vector<8x128xf32>
    %163 = vector.extract_strided_slice %85 {offsets = [0, 96], sizes = [8, 32], strides = [1, 1]} : vector<8x128xf32> to vector<8x32xf32>
    %164 = vector.extract_strided_slice %91 {offsets = [0, 96], sizes = [8, 32], strides = [1, 1]} : vector<8x128xf32> to vector<8x32xf32>
    %165 = arith.truncf %163 : vector<8x32xf32> to vector<8x32xbf16>
    %166 = arith.truncf %164 : vector<8x32xf32> to vector<8x32xbf16>
    %cst_61 = arith.constant dense<0.000000e+00> : vector<8x8xf32>
    %167 = tpu.matmul %165, %166, %cst_61 {dimension_numbers = #tpu.dot_dimension_numbers<[1], [1], [0], [0], [0, 0, 1, 0], [], []>} : vector<8x32xbf16>, vector<8x32xbf16>, vector<8x8xf32> -> vector<8x8xf32>
    %cst_62 = arith.constant dense<0xFF800000> : vector<8xf32>
    %168 = vector.multi_reduction <maximumf>, %167, %cst_62 [1] : vector<8x8xf32> to vector<8xf32>
    %169 = vector.shape_cast %168 : vector<8xf32> to vector<8x1xf32>
    %170 = vector.broadcast %169 : vector<8x1xf32> to vector<8x8xf32>
    %171 = arith.subf %167, %170 : vector<8x8xf32>
    %172 = math.exp %171 : vector<8x8xf32>
    %cst_63 = arith.constant dense<0.000000e+00> : vector<8xf32>
    %173 = vector.multi_reduction <add>, %172, %cst_63 [1] : vector<8x8xf32> to vector<8xf32>
    %174 = vector.shape_cast %173 : vector<8xf32> to vector<8x1xf32>
    %175 = tpu.reciprocal %174 {approx = true} : vector<8x1xf32> -> vector<8x1xf32>
    %176 = vector.broadcast %175 : vector<8x1xf32> to vector<8x8xf32>
    %177 = arith.mulf %172, %176 : vector<8x8xf32>
    %178 = vector.extract_strided_slice %79 {offsets = [0, 96], sizes = [8, 32], strides = [1, 1]} : vector<8x128xf32> to vector<8x32xf32>
    %179 = arith.truncf %177 : vector<8x8xf32> to vector<8x8xbf16>
    %180 = arith.truncf %178 : vector<8x32xf32> to vector<8x32xbf16>
    %cst_64 = arith.constant dense<0.000000e+00> : vector<8x32xf32>
    %181 = tpu.matmul %179, %180, %cst_64 {dimension_numbers = #tpu.dot_dimension_numbers<[1], [0], [0], [1], [0, 0, 1, 1], [], []>} : vector<8x8xbf16>, vector<8x32xbf16>, vector<8x32xf32> -> vector<8x32xf32>
    %182 = vector.extract_strided_slice %92 {offsets = [96, 0], sizes = [32, 128], strides = [1, 1]} : vector<128x128xbf16> to vector<32x128xbf16>
    %183 = arith.truncf %181 : vector<8x32xf32> to vector<8x32xbf16>
    %cst_65 = arith.constant dense<0.000000e+00> : vector<8x128xf32>
    %184 = tpu.matmul %183, %182, %cst_65 {dimension_numbers = #tpu.dot_dimension_numbers<[1], [0], [0], [1], [0, 0, 1, 1], [], []>} : vector<8x32xbf16>, vector<32x128xbf16>, vector<8x128xf32> -> vector<8x128xf32>
    %185 = arith.addf %162, %184 : vector<8x128xf32>
    %186 = arith.addf %49, %185 : vector<8x128xf32>
    %187 = arith.addf %49, %186 : vector<8x128xf32>
    %c0_66 = arith.constant 0 : index
    %c0_67 = arith.constant 0 : index
    %188 = vector.load %arg16[%c0_66, %c0_67] : memref<1x128xf32, #tpu.memory_space<vmem>>, vector<1x128xf32>
    %c0_68 = arith.constant 0 : index
    %c0_69 = arith.constant 0 : index
    %189 = vector.load %arg17[%c0_68, %c0_69] : memref<1x128xf32, #tpu.memory_space<vmem>>, vector<1x128xf32>
    %cst_70 = arith.constant dense<0.000000e+00> : vector<8xf32>
    %190 = vector.multi_reduction <add>, %187, %cst_70 [1] : vector<8x128xf32> to vector<8xf32>
    %191 = vector.shape_cast %190 : vector<8xf32> to vector<8x1xf32>
    %cst_71 = arith.constant 1.280000e+02 : f32
    %192 = vector.broadcast %cst_71 : f32 to vector<8x1xf32>
    %193 = arith.divf %191, %192 : vector<8x1xf32>
    %194 = vector.broadcast %193 : vector<8x1xf32> to vector<8x128xf32>
    %195 = arith.subf %187, %194 : vector<8x128xf32>
    %196 = arith.mulf %195, %195 : vector<8x128xf32>
    %cst_72 = arith.constant dense<0.000000e+00> : vector<8xf32>
    %197 = vector.multi_reduction <add>, %196, %cst_72 [1] : vector<8x128xf32> to vector<8xf32>
    %198 = vector.shape_cast %197 : vector<8xf32> to vector<8x1xf32>
    %cst_73 = arith.constant 1.280000e+02 : f32
    %199 = vector.broadcast %cst_73 : f32 to vector<8x1xf32>
    %200 = arith.divf %198, %199 : vector<8x1xf32>
    %201 = vector.broadcast %193 : vector<8x1xf32> to vector<8x128xf32>
    %202 = arith.subf %187, %201 : vector<8x128xf32>
    %cst_74 = arith.constant 9.99999974E-6 : f32
    %203 = vector.broadcast %cst_74 : f32 to vector<8x1xf32>
    %204 = arith.addf %200, %203 : vector<8x1xf32>
    %205 = math.rsqrt %204 : vector<8x1xf32>
    %206 = vector.broadcast %205 : vector<8x1xf32> to vector<8x128xf32>
    %207 = arith.mulf %202, %206 : vector<8x128xf32>
    %208 = vector.broadcast %188 : vector<1x128xf32> to vector<8x128xf32>
    %209 = arith.mulf %207, %208 : vector<8x128xf32>
    %210 = vector.broadcast %189 : vector<1x128xf32> to vector<8x128xf32>
    %211 = arith.addf %209, %210 : vector<8x128xf32>
    %c0_75 = arith.constant 0 : index
    %c0_76 = arith.constant 0 : index
    %212 = vector.load %arg18[%c0_75, %c0_76] : memref<128x256xbf16, #tpu.memory_space<vmem>>, vector<128x256xbf16>
    %213 = arith.truncf %211 : vector<8x128xf32> to vector<8x128xbf16>
    %cst_77 = arith.constant dense<0.000000e+00> : vector<8x256xf32>
    %214 = tpu.matmul %213, %212, %cst_77 {dimension_numbers = #tpu.dot_dimension_numbers<[1], [0], [0], [1], [0, 0, 1, 1], [], []>} : vector<8x128xbf16>, vector<128x256xbf16>, vector<8x256xf32> -> vector<8x256xf32>
    %c0_78 = arith.constant 0 : index
    %c0_79 = arith.constant 0 : index
    %215 = vector.load %arg19[%c0_78, %c0_79] : memref<1x256xf32, #tpu.memory_space<vmem>>, vector<1x256xf32>
    %216 = vector.broadcast %215 : vector<1x256xf32> to vector<8x256xf32>
    %217 = arith.addf %214, %216 : vector<8x256xf32>
    %218 = vector.extract_strided_slice %217 {offsets = [0, 0], sizes = [8, 128], strides = [1, 1]} : vector<8x256xf32> to vector<8x128xf32>
    %219 = vector.extract_strided_slice %217 {offsets = [0, 128], sizes = [8, 128], strides = [1, 1]} : vector<8x256xf32> to vector<8x128xf32>
    %220 = arith.negf %219 : vector<8x128xf32>
    %221 = math.exp %220 : vector<8x128xf32>
    %cst_80 = arith.constant 1.000000e+00 : f32
    %222 = vector.broadcast %cst_80 : f32 to vector<8x128xf32>
    %223 = arith.addf %222, %221 : vector<8x128xf32>
    %224 = arith.divf %222, %223 : vector<8x128xf32>
    %225 = arith.mulf %218, %224 : vector<8x128xf32>
    %cst_81 = arith.constant 0.000000e+00 : f32
    %226 = vector.broadcast %cst_81 : f32 to vector<1x128xf32>
    %227 = vector.extract_strided_slice %225 {offsets = [0, 0], sizes = [7, 128], strides = [1, 1]} : vector<8x128xf32> to vector<7x128xf32>
    %228 = tpu.concatenate %226, %227 in 0 : vector<1x128xf32>, vector<7x128xf32> -> vector<8x128xf32>
    %229 = vector.extract_strided_slice %225 {offsets = [1, 0], sizes = [7, 128], strides = [1, 1]} : vector<8x128xf32> to vector<7x128xf32>
    %230 = tpu.concatenate %229, %226 in 0 : vector<7x128xf32>, vector<1x128xf32> -> vector<8x128xf32>
    %c0_82 = arith.constant 0 : index
    %c0_83 = arith.constant 0 : index
    %231 = vector.load %arg20[%c0_82, %c0_83] : memref<3x128xf32, #tpu.memory_space<vmem>>, vector<3x128xf32>
    %232 = vector.extract_strided_slice %231 {offsets = [0, 0], sizes = [1, 128], strides = [1, 1]} : vector<3x128xf32> to vector<1x128xf32>
    %233 = vector.broadcast %232 : vector<1x128xf32> to vector<8x128xf32>
    %234 = arith.mulf %228, %233 : vector<8x128xf32>
    %235 = vector.extract_strided_slice %231 {offsets = [1, 0], sizes = [1, 128], strides = [1, 1]} : vector<3x128xf32> to vector<1x128xf32>
    %236 = vector.broadcast %235 : vector<1x128xf32> to vector<8x128xf32>
    %237 = arith.mulf %225, %236 : vector<8x128xf32>
    %238 = arith.addf %234, %237 : vector<8x128xf32>
    %239 = vector.extract_strided_slice %231 {offsets = [2, 0], sizes = [1, 128], strides = [1, 1]} : vector<3x128xf32> to vector<1x128xf32>
    %240 = vector.broadcast %239 : vector<1x128xf32> to vector<8x128xf32>
    %241 = arith.mulf %230, %240 : vector<8x128xf32>
    %242 = arith.addf %238, %241 : vector<8x128xf32>
    %243 = arith.negf %242 : vector<8x128xf32>
    %244 = math.exp %243 : vector<8x128xf32>
    %cst_84 = arith.constant 1.000000e+00 : f32
    %245 = vector.broadcast %cst_84 : f32 to vector<8x128xf32>
    %246 = arith.addf %245, %244 : vector<8x128xf32>
    %247 = arith.divf %245, %246 : vector<8x128xf32>
    %248 = arith.mulf %242, %247 : vector<8x128xf32>
    %cst_85 = arith.constant dense<0.000000e+00> : vector<128xf32>
    %249 = vector.multi_reduction <add>, %248, %cst_85 [0] : vector<8x128xf32> to vector<128xf32>
    %250 = vector.shape_cast %249 : vector<128xf32> to vector<1x128xf32>
    %251 = arith.mulf %248, %248 : vector<8x128xf32>
    %cst_86 = arith.constant dense<0.000000e+00> : vector<128xf32>
    %252 = vector.multi_reduction <add>, %251, %cst_86 [0] : vector<8x128xf32> to vector<128xf32>
    %253 = vector.shape_cast %252 : vector<128xf32> to vector<1x128xf32>
    %254 = tpu.concatenate %250, %253 in 0 : vector<1x128xf32>, vector<1x128xf32> -> vector<2x128xf32>
    %255 = arith.truncf %254 : vector<2x128xf32> to vector<2x128xbf16>
    %256 = arith.truncf %5 : vector<128x128xf32> to vector<128x128xbf16>
    %cst_87 = arith.constant dense<0.000000e+00> : vector<2x128xf32>
    %257 = tpu.matmul %255, %256, %cst_87 {dimension_numbers = #tpu.dot_dimension_numbers<[1], [0], [0], [1], [0, 0, 1, 1], [], []>} : vector<2x128xbf16>, vector<128x128xbf16>, vector<2x128xf32> -> vector<2x128xf32>
    %258 = vector.extract_strided_slice %257 {offsets = [0, 0], sizes = [1, 128], strides = [1, 1]} : vector<2x128xf32> to vector<1x128xf32>
    %259 = vector.extract_strided_slice %257 {offsets = [1, 0], sizes = [1, 128], strides = [1, 1]} : vector<2x128xf32> to vector<1x128xf32>
    %260 = arith.mulf %258, %258 : vector<1x128xf32>
    %261 = arith.subf %259, %260 : vector<1x128xf32>
    %262 = vector.broadcast %258 : vector<1x128xf32> to vector<8x128xf32>
    %263 = arith.subf %248, %262 : vector<8x128xf32>
    %cst_88 = arith.constant 9.99999974E-6 : f32
    %264 = vector.broadcast %cst_88 : f32 to vector<1x128xf32>
    %265 = arith.addf %261, %264 : vector<1x128xf32>
    %266 = math.rsqrt %265 : vector<1x128xf32>
    %267 = vector.broadcast %266 : vector<1x128xf32> to vector<8x128xf32>
    %268 = arith.mulf %263, %267 : vector<8x128xf32>
    %c0_89 = arith.constant 0 : index
    %c0_90 = arith.constant 0 : index
    %269 = vector.load %arg21[%c0_89, %c0_90] : memref<1x128xf32, #tpu.memory_space<vmem>>, vector<1x128xf32>
    %270 = vector.broadcast %269 : vector<1x128xf32> to vector<8x128xf32>
    %271 = arith.mulf %268, %270 : vector<8x128xf32>
    %c0_91 = arith.constant 0 : index
    %c0_92 = arith.constant 0 : index
    %272 = vector.load %arg22[%c0_91, %c0_92] : memref<1x128xf32, #tpu.memory_space<vmem>>, vector<1x128xf32>
    %273 = vector.broadcast %272 : vector<1x128xf32> to vector<8x128xf32>
    %274 = arith.addf %271, %273 : vector<8x128xf32>
    %c0_93 = arith.constant 0 : index
    %c0_94 = arith.constant 0 : index
    %275 = vector.load %arg23[%c0_93, %c0_94] : memref<128x128xbf16, #tpu.memory_space<vmem>>, vector<128x128xbf16>
    %276 = arith.truncf %274 : vector<8x128xf32> to vector<8x128xbf16>
    %cst_95 = arith.constant dense<0.000000e+00> : vector<8x128xf32>
    %277 = tpu.matmul %276, %275, %cst_95 {dimension_numbers = #tpu.dot_dimension_numbers<[1], [0], [0], [1], [0, 0, 1, 1], [], []>} : vector<8x128xbf16>, vector<128x128xbf16>, vector<8x128xf32> -> vector<8x128xf32>
    %c0_96 = arith.constant 0 : index
    %c0_97 = arith.constant 0 : index
    %278 = vector.load %arg24[%c0_96, %c0_97] : memref<1x128xf32, #tpu.memory_space<vmem>>, vector<1x128xf32>
    %279 = vector.broadcast %278 : vector<1x128xf32> to vector<8x128xf32>
    %280 = arith.addf %277, %279 : vector<8x128xf32>
    %281 = arith.addf %187, %280 : vector<8x128xf32>
    %282 = arith.addf %187, %281 : vector<8x128xf32>
    %c0_98 = arith.constant 0 : index
    %c0_99 = arith.constant 0 : index
    %283 = vector.load %arg25[%c0_98, %c0_99] : memref<1x128xf32, #tpu.memory_space<vmem>>, vector<1x128xf32>
    %c0_100 = arith.constant 0 : index
    %c0_101 = arith.constant 0 : index
    %284 = vector.load %arg26[%c0_100, %c0_101] : memref<1x128xf32, #tpu.memory_space<vmem>>, vector<1x128xf32>
    %cst_102 = arith.constant dense<0.000000e+00> : vector<8xf32>
    %285 = vector.multi_reduction <add>, %282, %cst_102 [1] : vector<8x128xf32> to vector<8xf32>
    %286 = vector.shape_cast %285 : vector<8xf32> to vector<8x1xf32>
    %cst_103 = arith.constant 1.280000e+02 : f32
    %287 = vector.broadcast %cst_103 : f32 to vector<8x1xf32>
    %288 = arith.divf %286, %287 : vector<8x1xf32>
    %289 = vector.broadcast %288 : vector<8x1xf32> to vector<8x128xf32>
    %290 = arith.subf %282, %289 : vector<8x128xf32>
    %291 = arith.mulf %290, %290 : vector<8x128xf32>
    %cst_104 = arith.constant dense<0.000000e+00> : vector<8xf32>
    %292 = vector.multi_reduction <add>, %291, %cst_104 [1] : vector<8x128xf32> to vector<8xf32>
    %293 = vector.shape_cast %292 : vector<8xf32> to vector<8x1xf32>
    %cst_105 = arith.constant 1.280000e+02 : f32
    %294 = vector.broadcast %cst_105 : f32 to vector<8x1xf32>
    %295 = arith.divf %293, %294 : vector<8x1xf32>
    %296 = vector.broadcast %288 : vector<8x1xf32> to vector<8x128xf32>
    %297 = arith.subf %282, %296 : vector<8x128xf32>
    %cst_106 = arith.constant 9.99999974E-6 : f32
    %298 = vector.broadcast %cst_106 : f32 to vector<8x1xf32>
    %299 = arith.addf %295, %298 : vector<8x1xf32>
    %300 = math.rsqrt %299 : vector<8x1xf32>
    %301 = vector.broadcast %300 : vector<8x1xf32> to vector<8x128xf32>
    %302 = arith.mulf %297, %301 : vector<8x128xf32>
    %303 = vector.broadcast %283 : vector<1x128xf32> to vector<8x128xf32>
    %304 = arith.mulf %302, %303 : vector<8x128xf32>
    %305 = vector.broadcast %284 : vector<1x128xf32> to vector<8x128xf32>
    %306 = arith.addf %304, %305 : vector<8x128xf32>
    %c0_107 = arith.constant 0 : index
    %c0_108 = arith.constant 0 : index
    %307 = vector.load %arg27[%c0_107, %c0_108] : memref<128x512xbf16, #tpu.memory_space<vmem>>, vector<128x512xbf16>
    %308 = arith.truncf %306 : vector<8x128xf32> to vector<8x128xbf16>
    %cst_109 = arith.constant dense<0.000000e+00> : vector<8x512xf32>
    %309 = tpu.matmul %308, %307, %cst_109 {dimension_numbers = #tpu.dot_dimension_numbers<[1], [0], [0], [1], [0, 0, 1, 1], [], []>} : vector<8x128xbf16>, vector<128x512xbf16>, vector<8x512xf32> -> vector<8x512xf32>
    %c0_110 = arith.constant 0 : index
    %c0_111 = arith.constant 0 : index
    %310 = vector.load %arg28[%c0_110, %c0_111] : memref<1x512xf32, #tpu.memory_space<vmem>>, vector<1x512xf32>
    %311 = vector.broadcast %310 : vector<1x512xf32> to vector<8x512xf32>
    %312 = arith.addf %309, %311 : vector<8x512xf32>
    %313 = arith.negf %312 : vector<8x512xf32>
    %314 = math.exp %313 : vector<8x512xf32>
    %cst_112 = arith.constant 1.000000e+00 : f32
    %315 = vector.broadcast %cst_112 : f32 to vector<8x512xf32>
    %316 = arith.addf %315, %314 : vector<8x512xf32>
    %317 = arith.divf %315, %316 : vector<8x512xf32>
    %318 = arith.mulf %312, %317 : vector<8x512xf32>
    %c0_113 = arith.constant 0 : index
    %c0_114 = arith.constant 0 : index
    %319 = vector.load %arg29[%c0_113, %c0_114] : memref<512x128xbf16, #tpu.memory_space<vmem>>, vector<512x128xbf16>
    %320 = arith.truncf %318 : vector<8x512xf32> to vector<8x512xbf16>
    %cst_115 = arith.constant dense<0.000000e+00> : vector<8x128xf32>
    %321 = tpu.matmul %320, %319, %cst_115 {dimension_numbers = #tpu.dot_dimension_numbers<[1], [0], [0], [1], [0, 0, 1, 1], [], []>} : vector<8x512xbf16>, vector<512x128xbf16>, vector<8x128xf32> -> vector<8x128xf32>
    %c0_116 = arith.constant 0 : index
    %c0_117 = arith.constant 0 : index
    %322 = vector.load %arg30[%c0_116, %c0_117] : memref<1x128xf32, #tpu.memory_space<vmem>>, vector<1x128xf32>
    %323 = vector.broadcast %322 : vector<1x128xf32> to vector<8x128xf32>
    %324 = arith.addf %321, %323 : vector<8x128xf32>
    %325 = arith.addf %282, %324 : vector<8x128xf32>
    %326 = arith.addf %282, %325 : vector<8x128xf32>
    %c0_118 = arith.constant 0 : index
    %c0_119 = arith.constant 0 : index
    %327 = vector.load %arg31[%c0_118, %c0_119] : memref<1x128xf32, #tpu.memory_space<vmem>>, vector<1x128xf32>
    %c0_120 = arith.constant 0 : index
    %c0_121 = arith.constant 0 : index
    %328 = vector.load %arg32[%c0_120, %c0_121] : memref<1x128xf32, #tpu.memory_space<vmem>>, vector<1x128xf32>
    %cst_122 = arith.constant dense<0.000000e+00> : vector<8xf32>
    %329 = vector.multi_reduction <add>, %326, %cst_122 [1] : vector<8x128xf32> to vector<8xf32>
    %330 = vector.shape_cast %329 : vector<8xf32> to vector<8x1xf32>
    %cst_123 = arith.constant 1.280000e+02 : f32
    %331 = vector.broadcast %cst_123 : f32 to vector<8x1xf32>
    %332 = arith.divf %330, %331 : vector<8x1xf32>
    %333 = vector.broadcast %332 : vector<8x1xf32> to vector<8x128xf32>
    %334 = arith.subf %326, %333 : vector<8x128xf32>
    %335 = arith.mulf %334, %334 : vector<8x128xf32>
    %cst_124 = arith.constant dense<0.000000e+00> : vector<8xf32>
    %336 = vector.multi_reduction <add>, %335, %cst_124 [1] : vector<8x128xf32> to vector<8xf32>
    %337 = vector.shape_cast %336 : vector<8xf32> to vector<8x1xf32>
    %cst_125 = arith.constant 1.280000e+02 : f32
    %338 = vector.broadcast %cst_125 : f32 to vector<8x1xf32>
    %339 = arith.divf %337, %338 : vector<8x1xf32>
    %340 = vector.broadcast %332 : vector<8x1xf32> to vector<8x128xf32>
    %341 = arith.subf %326, %340 : vector<8x128xf32>
    %cst_126 = arith.constant 9.99999974E-6 : f32
    %342 = vector.broadcast %cst_126 : f32 to vector<8x1xf32>
    %343 = arith.addf %339, %342 : vector<8x1xf32>
    %344 = math.rsqrt %343 : vector<8x1xf32>
    %345 = vector.broadcast %344 : vector<8x1xf32> to vector<8x128xf32>
    %346 = arith.mulf %341, %345 : vector<8x128xf32>
    %347 = vector.broadcast %327 : vector<1x128xf32> to vector<8x128xf32>
    %348 = arith.mulf %346, %347 : vector<8x128xf32>
    %349 = vector.broadcast %328 : vector<1x128xf32> to vector<8x128xf32>
    %350 = arith.addf %348, %349 : vector<8x128xf32>
    %c0_127 = arith.constant 0 : index
    %c0_128 = arith.constant 0 : index
    %c0_129 = arith.constant 0 : index
    %351 = vector.load %arg33[%c0_127, %c0_128, %c0_129] : memref<1x8x128xf32, #tpu.memory_space<vmem>>, vector<1x8x128xf32>
    %352 = vector.shape_cast %351 : vector<1x8x128xf32> to vector<8x128xf32>
    %353 = vector.shape_cast %350 : vector<8x128xf32> to vector<1x8x128xf32>
    tpu.vector_store %arg33[%c0_127, %c0_128, %c0_129], %353 {strides = array<i32>} : memref<1x8x128xf32, #tpu.memory_space<vmem>>, vector<1x8x128xf32>,
    return
  }
  func.func @transform_0(%arg0: i32) -> (i32, i32, i32) {
    %c0_i32 = arith.constant 0 : i32
    %c0_i32_0 = arith.constant 0 : i32
    %c0_i32_1 = arith.constant 0 : i32
    return %arg0, %c0_i32, %c0_i32_0 : i32, i32, i32
  }
  func.func @transform_1(%arg0: i32) -> (i32, i32) {
    %c0_i32 = arith.constant 0 : i32
    %c0_i32_0 = arith.constant 0 : i32
    %c0_i32_1 = arith.constant 0 : i32
    return %c0_i32, %c0_i32_0 : i32, i32
  }
  func.func @transform_2(%arg0: i32) -> (i32, i32) {
    %c0_i32 = arith.constant 0 : i32
    %c0_i32_0 = arith.constant 0 : i32
    %c0_i32_1 = arith.constant 0 : i32
    return %c0_i32, %c0_i32_0 : i32, i32
  }
  func.func @transform_3(%arg0: i32) -> (i32, i32) {
    %c0_i32 = arith.constant 0 : i32
    %c0_i32_0 = arith.constant 0 : i32
    %c0_i32_1 = arith.constant 0 : i32
    return %c0_i32, %c0_i32_0 : i32, i32
  }
  func.func @transform_4(%arg0: i32) -> (i32, i32) {
    %c0_i32 = arith.constant 0 : i32
    %c0_i32_0 = arith.constant 0 : i32
    %c0_i32_1 = arith.constant 0 : i32
    return %c0_i32, %c0_i32_0 : i32, i32
  }
  func.func @transform_5(%arg0: i32) -> (i32, i32) {
    %c0_i32 = arith.constant 0 : i32
    %c0_i32_0 = arith.constant 0 : i32
    %c0_i32_1 = arith.constant 0 : i32
    return %c0_i32, %c0_i32_0 : i32, i32
  }
  func.func @transform_6(%arg0: i32) -> (i32, i32) {
    %c0_i32 = arith.constant 0 : i32
    %c0_i32_0 = arith.constant 0 : i32
    %c0_i32_1 = arith.constant 0 : i32
    return %c0_i32, %c0_i32_0 : i32, i32
  }
  func.func @transform_7(%arg0: i32) -> (i32, i32) {
    %c0_i32 = arith.constant 0 : i32
    %c0_i32_0 = arith.constant 0 : i32
    %c0_i32_1 = arith.constant 0 : i32
    return %c0_i32, %c0_i32_0 : i32, i32
  }
  func.func @transform_8(%arg0: i32) -> (i32, i32) {
    %c0_i32 = arith.constant 0 : i32
    %c0_i32_0 = arith.constant 0 : i32
    %c0_i32_1 = arith.constant 0 : i32
    return %c0_i32, %c0_i32_0 : i32, i32
  }
  func.func @transform_9(%arg0: i32) -> (i32, i32) {
    %c0_i32 = arith.constant 0 : i32
    %c0_i32_0 = arith.constant 0 : i32
    %c0_i32_1 = arith.constant 0 : i32
    return %c0_i32, %c0_i32_0 : i32, i32
  }
  func.func @transform_10(%arg0: i32) -> (i32, i32) {
    %c0_i32 = arith.constant 0 : i32
    %c0_i32_0 = arith.constant 0 : i32
    %c0_i32_1 = arith.constant 0 : i32
    return %c0_i32, %c0_i32_0 : i32, i32
  }
  func.func @transform_11(%arg0: i32) -> (i32, i32) {
    %c0_i32 = arith.constant 0 : i32
    %c0_i32_0 = arith.constant 0 : i32
    %c0_i32_1 = arith.constant 0 : i32
    return %c0_i32, %c0_i32_0 : i32, i32
  }
  func.func @transform_12(%arg0: i32) -> (i32, i32) {
    %c0_i32 = arith.constant 0 : i32
    %c0_i32_0 = arith.constant 0 : i32
    %c0_i32_1 = arith.constant 0 : i32
    return %c0_i32, %c0_i32_0 : i32, i32
  }
  func.func @transform_13(%arg0: i32) -> (i32, i32) {
    %c0_i32 = arith.constant 0 : i32
    %c0_i32_0 = arith.constant 0 : i32
    %c0_i32_1 = arith.constant 0 : i32
    return %c0_i32, %c0_i32_0 : i32, i32
  }
  func.func @transform_14(%arg0: i32) -> (i32, i32) {
    %c0_i32 = arith.constant 0 : i32
    %c0_i32_0 = arith.constant 0 : i32
    %c0_i32_1 = arith.constant 0 : i32
    return %c0_i32, %c0_i32_0 : i32, i32
  }
  func.func @transform_15(%arg0: i32) -> (i32, i32) {
    %c0_i32 = arith.constant 0 : i32
    %c0_i32_0 = arith.constant 0 : i32
    %c0_i32_1 = arith.constant 0 : i32
    return %c0_i32, %c0_i32_0 : i32, i32
  }
  func.func @transform_16(%arg0: i32) -> (i32, i32) {
    %c0_i32 = arith.constant 0 : i32
    %c0_i32_0 = arith.constant 0 : i32
    %c0_i32_1 = arith.constant 0 : i32
    return %c0_i32, %c0_i32_0 : i32, i32
  }
  func.func @transform_17(%arg0: i32) -> (i32, i32) {
    %c0_i32 = arith.constant 0 : i32
    %c0_i32_0 = arith.constant 0 : i32
    %c0_i32_1 = arith.constant 0 : i32
    return %c0_i32, %c0_i32_0 : i32, i32
  }
  func.func @transform_18(%arg0: i32) -> (i32, i32) {
    %c0_i32 = arith.constant 0 : i32
    %c0_i32_0 = arith.constant 0 : i32
    %c0_i32_1 = arith.constant 0 : i32
    return %c0_i32, %c0_i32_0 : i32, i32
  }
  func.func @transform_19(%arg0: i32) -> (i32, i32) {
    %c0_i32 = arith.constant 0 : i32
    %c0_i32_0 = arith.constant 0 : i32
    %c0_i32_1 = arith.constant 0 : i32
    return %c0_i32, %c0_i32_0 : i32, i32
  }
  func.func @transform_20(%arg0: i32) -> (i32, i32) {
    %c0_i32 = arith.constant 0 : i32
    %c0_i32_0 = arith.constant 0 : i32
    %c0_i32_1 = arith.constant 0 : i32
    return %c0_i32, %c0_i32_0 : i32, i32
  }
  func.func @transform_21(%arg0: i32) -> (i32, i32) {
    %c0_i32 = arith.constant 0 : i32
    %c0_i32_0 = arith.constant 0 : i32
    %c0_i32_1 = arith.constant 0 : i32
    return %c0_i32, %c0_i32_0 : i32, i32
  }
  func.func @transform_22(%arg0: i32) -> (i32, i32) {
    %c0_i32 = arith.constant 0 : i32
    %c0_i32_0 = arith.constant 0 : i32
    %c0_i32_1 = arith.constant 0 : i32
    return %c0_i32, %c0_i32_0 : i32, i32
  }
  func.func @transform_23(%arg0: i32) -> (i32, i32) {
    %c0_i32 = arith.constant 0 : i32
    %c0_i32_0 = arith.constant 0 : i32
    %c0_i32_1 = arith.constant 0 : i32
    return %c0_i32, %c0_i32_0 : i32, i32
  }
  func.func @transform_24(%arg0: i32) -> (i32, i32) {
    %c0_i32 = arith.constant 0 : i32
    %c0_i32_0 = arith.constant 0 : i32
    %c0_i32_1 = arith.constant 0 : i32
    return %c0_i32, %c0_i32_0 : i32, i32
  }
  func.func @transform_25(%arg0: i32) -> (i32, i32) {
    %c0_i32 = arith.constant 0 : i32
    %c0_i32_0 = arith.constant 0 : i32
    %c0_i32_1 = arith.constant 0 : i32
    return %c0_i32, %c0_i32_0 : i32, i32
  }
  func.func @transform_26(%arg0: i32) -> (i32, i32) {
    %c0_i32 = arith.constant 0 : i32
    %c0_i32_0 = arith.constant 0 : i32
    %c0_i32_1 = arith.constant 0 : i32
    return %c0_i32, %c0_i32_0 : i32, i32
  }
  func.func @transform_27(%arg0: i32) -> (i32, i32) {
    %c0_i32 = arith.constant 0 : i32
    %c0_i32_0 = arith.constant 0 : i32
    %c0_i32_1 = arith.constant 0 : i32
    return %c0_i32, %c0_i32_0 : i32, i32
  }
  func.func @transform_28(%arg0: i32) -> (i32, i32) {
    %c0_i32 = arith.constant 0 : i32
    %c0_i32_0 = arith.constant 0 : i32
    %c0_i32_1 = arith.constant 0 : i32
    return %c0_i32, %c0_i32_0 : i32, i32
  }
  func.func @transform_29(%arg0: i32) -> (i32, i32) {
    %c0_i32 = arith.constant 0 : i32
    %c0_i32_0 = arith.constant 0 : i32
    %c0_i32_1 = arith.constant 0 : i32
    return %c0_i32, %c0_i32_0 : i32, i32
  }
  func.func @transform_30(%arg0: i32) -> (i32, i32) {
    %c0_i32 = arith.constant 0 : i32
    %c0_i32_0 = arith.constant 0 : i32
    %c0_i32_1 = arith.constant 0 : i32
    return %c0_i32, %c0_i32_0 : i32, i32
  }
  func.func @transform_31(%arg0: i32) -> (i32, i32) {
    %c0_i32 = arith.constant 0 : i32
    %c0_i32_0 = arith.constant 0 : i32
    %c0_i32_1 = arith.constant 0 : i32
    return %c0_i32, %c0_i32_0 : i32, i32
  }
  func.func @transform_32(%arg0: i32) -> (i32, i32, i32) {
    %c0_i32 = arith.constant 0 : i32
    %c0_i32_0 = arith.constant 0 : i32
    %c0_i32_1 = arith.constant 0 : i32
    return %arg0, %c0_i32, %c0_i32_0 : i32, i32, i32
  }
}

</mosaic_0001>

<bundles_post_ra>
// kernel: tpu_custom_call.1
= control target key start
LH: loop header
LB: loop body
LE: loop exit
PB: predicated region body
PF: predicated region fallthrough
CT: control target
= control target key end

     0   :  { %s6036_s6 = smov 1   ;;  %s6037_s10 = smov 2   ;;  %s6807_s0 = inlined_call_operand.smem [shape: u32[33], index: -1, kind: input, shape index: {}] }
   0x1   :  { %s6106_s5 = sld [smem:[%s6807_s0]]   ;;  %s6038_s14 = smov 3  }
   0x2   :  { %s6111_s9 = sld [smem:[%s6807_s0 + %s6036_s6]]   ;;  %s6039_s18 = smov 4  }
   0x3   :  { %s6116_s13 = sld [smem:[%s6807_s0 + %s6037_s10]]   ;;  %s6040_s22 = smov 5  }
   0x4   :  { %s6121_s17 = sld [smem:[%s6807_s0 + %s6038_s14]]   ;;  %s6041_s26 = smov 6  }
   0x5   :  { %s6126_s21 = sld [smem:[%s6807_s0 + %s6039_s18]]   ;;  %s6042_s30 = smov 7  }
   0x6   :  { %s6131_s25 = sld [smem:[%s6807_s0 + %s6040_s22]]   ;;  %s6043_s4 = smov 8  }
   0x7   :  { %6836 = sst [smem:[#allocation44_spill]] %s6106_s5  ;;  %s6044_s10 = smov 9  }
   0x8   :  { %6837 = sst [smem:[#allocation45_spill]] %s6111_s9  ;;  %s6045_s15 = smov 10  }
   0x9   :  { %6838 = sst [smem:[#allocation46_spill]] %s6116_s13  ;;  %s6046_s20 = smov 11  }
   0xa   :  { %6839 = sst [smem:[#allocation47_spill]] %s6121_s17  ;;  %s6048_s1 = smov 13  }
   0xb   :  { %s6136_s29 = sld [smem:[%s6807_s0 + %s6041_s26]]   ;;  %s6047_s26 = smov 12  }
   0xc   :  { %s6141_s3 = sld [smem:[%s6807_s0 + %s6042_s30]]   ;;  %s6049_s7 = smov 14  }
   0xd   :  { %s6146_s8 = sld [smem:[%s6807_s0 + %s6043_s4]]   ;;  %s6051_s22 = smov 16  }
   0xe   :  { %s6151_s14 = sld [smem:[%s6807_s0 + %s6044_s10]]   ;;  %s6052_s28 = smov 17  }
   0xf   :  { %s6156_s19 = sld [smem:[%s6807_s0 + %s6045_s15]]   ;;  %s6050_s15 = smov 15  }
  0x10   :  { %s6161_s24 = sld [smem:[%s6807_s0 + %s6046_s20]]  }
  0x11   :  { %s6166_s30 = sld [smem:[%s6807_s0 + %s6047_s26]]  }
  0x12   :  { %6840 = sst [smem:[#allocation48_spill]] %s6141_s3 }
  0x13   :  { %6841 = sst [smem:[#allocation49_spill]] %s6146_s8 }
  0x14   :  { %6842 = sst [smem:[#allocation50_spill]] %s6151_s14 }
  0x15   :  { %s6171_s6 = sld [smem:[%s6807_s0 + %s6048_s1]]  }
  0x16   :  { %s6176_s12 = sld [smem:[%s6807_s0 + %s6049_s7]]   ;;  %s6053_s7 = smov 18  }
  0x17   :  { %s6181_s20 = sld [smem:[%s6807_s0 + %s6050_s15]]   ;;  %s6054_s15 = smov 19  }
  0x18   :  { %s6186_s27 = sld [smem:[%s6807_s0 + %s6051_s22]]   ;;  %s6055_s22 = smov 20  }
  0x19   :  { %s6191_s4 = sld [smem:[%s6807_s0 + %s6052_s28]]   ;;  %s6056_s28 = smov 21  }
  0x1a   :  { %s6196_s8 = sld [smem:[%s6807_s0 + %s6053_s7]]   ;;  %s6057_s7 = smov 22  }
  0x1b   :  { %6843 = sst [smem:[#allocation51_spill]] %s6171_s6 }
  0x1c   :  { %6844 = sst [smem:[#allocation52_spill]] %s6176_s12 }
  0x1d   :  { %6845 = sst [smem:[#allocation53_spill]] %s6181_s20 }
  0x1e   :  { %6846 = sst [smem:[#allocation54_spill]] %s6186_s27 }
  0x1f   :  { %6847 = sst [smem:[#allocation55_spill]] %s6191_s4 }
  0x20   :  { %6848 = sst [smem:[#allocation56_spill]] %s6196_s8 }
  0x21   :  { %s6201_s5 = sld [smem:[%s6807_s0 + %s6054_s15]]   ;;  %s6058_s15 = smov 23  }
  0x22   :  { %s6206_s27 = sld [smem:[%s6807_s0 + %s6055_s22]]   ;;  %s6059_s22 = smov 24  }
  0x23   :  { %s6211_s20 = sld [smem:[%s6807_s0 + %s6056_s28]]   ;;  %s6060_s28 = smov 25  }
  0x24   :  { %s6216_s8 = sld [smem:[%s6807_s0 + %s6057_s7]]   ;;  %s6061_s7 = smov 26  }
  0x27   :  { %6849 = sst [smem:[#allocation57_spill]] %s6201_s5 }
  0x28   :  { %6850 = sst [smem:[#allocation58_spill]] %s6206_s27 }
  0x29   :  { %6851 = sst [smem:[#allocation59_spill]] %s6211_s20 }
  0x2a   :  { %6852 = sst [smem:[#allocation60_spill]] %s6216_s8 }
  0x2b   :  { %s6221_s5 = sld [smem:[%s6807_s0 + %s6058_s15]]   ;;  %s6062_s15 = smov 27  }
  0x2c   :  { %s6226_s27 = sld [smem:[%s6807_s0 + %s6059_s22]]   ;;  %s6063_s22 = smov 28  }
  0x2d   :  { %s6231_s20 = sld [smem:[%s6807_s0 + %s6060_s28]]   ;;  %s6064_s28 = smov 29  }
  0x2e   :  { %s6236_s8 = sld [smem:[%s6807_s0 + %s6061_s7]]   ;;  %s6065_s7 = smov 30  }
  0x2f   :  { %s6256_s6 = sld [smem:[%s6807_s0 + %s6065_s7]]  }
  0x31   :  { %6853 = sst [smem:[#allocation61_spill]] %s6221_s5 }
  0x32   :  { %6854 = sst [smem:[#allocation62_spill]] %s6226_s27 }
  0x33   :  { %6855 = sst [smem:[#allocation63_spill]] %s6231_s20 }
  0x34   :  { %6856 = sst [smem:[#allocation64_spill]] %s6236_s8 }
  0x35   :  { %s6241_s5 = sld [smem:[%s6807_s0 + %s6062_s15]]   ;;  %s6066_s15 = smov 31  }
  0x36   :  { %s6246_s27 = sld [smem:[%s6807_s0 + %s6063_s22]]   ;;  %s6067_s22 = smov 32  }
  0x37   :  { %s6251_s20 = sld [smem:[%s6807_s0 + %s6064_s28]]  }
  0x38   :  { %6860 = sst [smem:[#allocation68_spill]] %s6256_s6 }
  0x3b   :  { %6857 = sst [smem:[#allocation65_spill]] %s6241_s5 }
  0x3c   :  { %6858 = sst [smem:[#allocation66_spill]] %s6246_s27 }
  0x3d   :  { %6859 = sst [smem:[#allocation67_spill]] %s6251_s20 }
  0x3e   :  { %s6261_s5 = sld [smem:[%s6807_s0 + %s6066_s15]]  }
  0x3f   :  { %s6266_s27 = sld [smem:[%s6807_s0 + %s6067_s22]]  }
  0x44   :  { %6861 = sst [smem:[#allocation69_spill]] %s6261_s5 }
  0x45   :  { %6862 = sst [smem:[#allocation70_spill]] %s6266_s27 }
  0x46   :  { %70 = vsyncpa [#allocation3], 0 }
  0x47   :  { %72 = vsyncpa [#allocation3 + $0x1], 0 }
  0x48   :  { %73 = vsyncpa [#allocation6], 0 }
  0x49   :  { %74 = vsyncpa [#allocation9], 0 }
  0x4a   :  { %75 = vsyncpa [#allocation12], 0 }
  0x4b   :  { %76 = vsyncpa [#allocation15], 0 }
  0x4c   :  { %77 = vsyncpa [#allocation18], 0 }
  0x4d   :  { %78 = vsyncpa [#allocation21], 0 }
  0x4e   :  { %79 = vsyncpa [#allocation24], 0 }
  0x4f   :  { %80 = vsyncpa [#allocation27], 0 }
  0x50   :  { %81 = vsyncpa [#allocation30], 0 }
  0x51   :  { %82 = vsyncpa [#allocation4], 0 }
  0x52   :  { %84 = vsyncpa [#allocation4 + $0x1], 0  ;;  %s6268_s28 = smov 0   ;;  %s6270_s1 = smov 0  }
  0x53   :  { %s6272_s2 = smov 0   ;;  %s6274_s0 = smov 0  }
  0x54 LB: > { %s6863_s14 = sld [smem:[#allocation50_spill]]  ;;  %s6292_s10 = sadd.s32 4294967295, %s6034_s0   ;;  %s6034_s0 = sphi %s6274_s0, %s6935_s0   ;;  %s6030_s2 = sphi %s6272_s2, %s6934_s2   ;;  %s6026_s1 = sphi %s6270_s1, %s6933_s1   ;;  %s6022_s28 = sphi %s6268_s28, %s6932_s28  }
  0x55   : > { %s6864_s13 = sld [smem:[#allocation46_spill]]  ;;  %p4017_p0 = scmp.ge.s32.totalorder %s6034_s0, 1 }
  0x56   : > { %s6865_s12 = sld [smem:[#allocation52_spill]]  ;;  %p6835_p1 = scmp.eq.s32.totalorder %s6292_s10, 0 }
  0x57   : > { %s6866_s8 = sld [smem:[#allocation64_spill]]  ;;  %p798_p2 = scmp.lt.s32.totalorder %s6034_s0, 3 }
  0x58   : > { %s6867_s4 = sld [smem:[#allocation55_spill]]  ;;  %s6068_s15 = smov [#allocation5]  }
  0x59   : > { %s6868_s3 = sld [smem:[#allocation48_spill]]  ;;  %p6297_p3 = pnand %p4017_p0, %p798_p2 }
  0x5a   : > { %s6869_s17 = sld [smem:[#allocation47_spill]]  ;;  %s812_s16 = sshll.u32 %s6068_s15, 4  ;;  %s813_s16 = int_to_ptr.vmem [resolvable:$true] %s812_s16 }
  0x5b   : > { %s6870_s9 = sld [smem:[#allocation45_spill]]  ;;  %p5082_p5 = pneg %p6297_p3 }
  0x5c   : > { %s6871_s11 = scalar_select %p6297_p3, 1, 0 }
  0x5d   : > { %p6309_p6 = pnand %p5082_p5, %p6835_p1  ;;  %s6069_s23 = smov [#allocation8]  }
  0x5e   : > { %6872 = sst [smem:[#allocation71_spill]] %s6871_s11  ;;  %s6313_s26 = sshll.u32 %s6069_s23, 4 }
  0x5f   : > { %6874 = sst [smem:[#allocation72_spill]] %s6313_s26  ;;  %p6319_p8 = pneg %p6309_p6 }
  0x60   : > { %s833_s18 = sshll.u32 %s6869_s17, 4  ;;  %s6305_s18 = int_to_ptr.hbm [resolvable:$true] %s833_s18 }
  0x61   : > { %s810_s7 = sshll.u32 %s6870_s9, 4  ;;  %s5369_s6 = scalar_lea.hbm %s6870_s9, 8  ;;  %s6289_s7 = int_to_ptr.hbm [resolvable:$true] %s810_s7 }
  0x62   : > { %s5362_s15 = sshra.s32 %s6289_s7, 4  ;;  %s5363_s15 = int_to_ptr.hbm [resolvable:$true] %s5362_s15 }
  0x63   : > { %s5364_s5 = scalar_lea.hbm %s5363_s15, 8  ;;  %p5370_p11 = scmp.lt.s32.totalorder %s5363_s15, %s6870_s9 }
  0x64   : > { %p5365_p7 = scmp.ne.s32.totalorder %s5363_s15, %s5364_s5  ;;  %p5371_p12 = scmp.lt.s32.totalorder %s5369_s6, %s5364_s5 }
  0x66   : > { %p5367_p9 = pnand %p6319_p8, %p5365_p7  ;;  %p5372_p13 = por %p5371_p12, %p5370_p11 }
  0x68   : > { %p5368_p10 = pneg %p5367_p9 }
  0x6a   : > { %p5373_p0 = pnand %p5372_p13, %p5368_p10 }
  0x6c   : > { %5376 = shalt.err (!%p5373_p0)
}
  0x6d   : > { %5085 = dma.hbm_to_vmem [thread:$0]  (!%p6309_p6), %s6289_s7, 128, %s813_s16, [#allocation6]  }
  0x6e   : > { %s5392_s23 = sshra.s32 %s6305_s18, 4  ;;  %s5399_s15 = scalar_lea.hbm %s6869_s17, 128  ;;  %s5393_s23 = int_to_ptr.hbm [resolvable:$true] %s5392_s23 }
  0x6f   : > { %s5394_s26 = scalar_lea.hbm %s5393_s23, 128  ;;  %p5400_p9 = scmp.lt.s32.totalorder %s5393_s23, %s6869_s17 }
  0x70   : > { %p5395_p2 = scmp.ne.s32.totalorder %s5393_s23, %s5394_s26  ;;  %p5401_p11 = scmp.lt.s32.totalorder %s5399_s15, %s5394_s26 }
  0x72   : > { %p5397_p5 = pnand %p5395_p2, %p6319_p8  ;;  %p5402_p10 = por %p5401_p11, %p5400_p9 }
  0x74   : > { %p5398_p7 = pneg %p5397_p5 }
  0x76   : > { %p5403_p12 = pnand %p5402_p10, %p5398_p7 }
  0x78   : > { %5406 = shalt.err (!%p5403_p12)
}
  0x79   : > { %s6818_s5 = smov 128   ;;  %s6876_s6 = sld [smem:[#allocation72_spill]] }
  0x7a   : > { %s6826_s7 = smov 8   ;;  %s862_s26 = sshll.u32 %s6131_s25, 4  ;;  %s863_s26 = int_to_ptr.hbm [resolvable:$true] %s862_s26 }
  0x7b   : > { %s6072_s23 = smov [#allocation11]   ;;  %s885_s9 = sshll.u32 %s6868_s3, 4  ;;  %s886_s9 = int_to_ptr.hbm [resolvable:$true] %s885_s9 }
  0x7c   : > { %s864_s15 = sshll.u32 %s6072_s23, 4  ;;  %s5422_s17 = sshra.s32 %s863_s26, 4  ;;  %s865_s15 = int_to_ptr.vmem [resolvable:$true] %s864_s15  ;;  %s5423_s17 = int_to_ptr.hbm [resolvable:$true] %s5422_s17 }
  0x7d   : > { %s5424_s20 = scalar_lea.hbm %s5423_s17, 1  ;;  %s5429_s11 = scalar_lea.hbm %s6131_s25, 1 }
  0x7e   : > { %p5425_p13 = scmp.ne.s32.totalorder %s5423_s17, %s5424_s20  ;;  %p5430_p5 = scmp.lt.s32.totalorder %s5423_s17, %s6131_s25 }
  0x7f   : > { %s6877_s16 = int_to_ptr.vmem [resolvable:$true] %s6876_s6  ;;  %p5431_p7 = scmp.lt.s32.totalorder %s5429_s11, %s5424_s20 }
  0x80   : > { %5091 = dma.hbm_to_vmem [thread:$0]  (!%p6309_p6), %s6305_s18, 2048, %s6877_s16, [#allocation9], %s6818_s5, %s6818_s5, %s6826_s7  }
  0x81   : > { %p5427_p0 = pnand %p5425_p13, %p6319_p8  ;;  %p5432_p9 = por %p5431_p7, %p5430_p5 }
  0x83   : > { %p5428_p2 = pneg %p5427_p0 }
  0x85   : > { %p5433_p11 = pnand %p5432_p9, %p5428_p2 }
  0x87   : > { %5436 = shalt.err (!%p5433_p11)
}
  0x88   : > { %5097 = dma.hbm_to_vmem [thread:$0]  (!%p6309_p6), %s863_s26, 16, %s865_s15, [#allocation12]  }
  0x89   : > { %s6073_s18 = smov [#allocation14]   ;;  %s5452_s16 = sshra.s32 %s886_s9, 4  ;;  %s5453_s16 = int_to_ptr.hbm [resolvable:$true] %s5452_s16 }
  0x8a   : > { %s887_s6 = sshll.u32 %s6073_s18, 4  ;;  %s5454_s23 = scalar_lea.hbm %s5453_s16, 256  ;;  %s888_s6 = int_to_ptr.vmem [resolvable:$true] %s887_s6 }
  0x8b   : > { %p5455_p10 = scmp.ne.s32.totalorder %s5453_s16, %s5454_s23  ;;  %s5459_s17 = scalar_lea.hbm %s6868_s3, 256 }
  0x8c   : > { %p5460_p0 = scmp.lt.s32.totalorder %s5453_s16, %s6868_s3  ;;  %p5461_p2 = scmp.lt.s32.totalorder %s5459_s17, %s5454_s23 }
  0x8d   : > { %p5457_p12 = pnand %p5455_p10, %p6319_p8 }
  0x8e   : > { %p5462_p5 = por %p5461_p2, %p5460_p0 }
  0x8f   : > { %p5458_p13 = pneg %p5457_p12 }
  0x91   : > { %p5463_p7 = pnand %p5462_p5, %p5458_p13 }
  0x93   : > { %5466 = shalt.err (!%p5463_p7)
}
  0x94   : > { %s6820_s20 = smov 256   ;;  %s6821_s11 = smov 16  }
  0x95   : > { %5103 = dma.hbm_to_vmem [thread:$0]  (!%p6309_p6), %s886_s9, 4096, %s888_s6, [#allocation15], %s6820_s20, %s6820_s20, %s6821_s11  }
  0x96   : > { %s917_s26 = sshll.u32 %s6156_s19, 4  ;;  %s6076_s15 = smov [#allocation17]   ;;  %s918_s26 = int_to_ptr.hbm [resolvable:$true] %s917_s26 }
  0x97   : > { %s919_s18 = sshll.u32 %s6076_s15, 4  ;;  %s941_s16 = sshll.u32 %s6166_s30, 4  ;;  %s920_s18 = int_to_ptr.vmem [resolvable:$true] %s919_s18  ;;  %s942_s16 = int_to_ptr.hbm [resolvable:$true] %s941_s16 }
  0x98   : > { %s5482_s23 = sshra.s32 %s918_s26, 4  ;;  %s5489_s5 = scalar_lea.hbm %s6156_s19, 1  ;;  %s5483_s23 = int_to_ptr.hbm [resolvable:$true] %s5482_s23 }
  0x99   : > { %s5484_s17 = scalar_lea.hbm %s5483_s23, 1  ;;  %p5490_p12 = scmp.lt.s32.totalorder %s5483_s23, %s6156_s19 }
  0x9a   : > { %p5485_p9 = scmp.ne.s32.totalorder %s5483_s23, %s5484_s17  ;;  %p5491_p13 = scmp.lt.s32.totalorder %s5489_s5, %s5484_s17 }
  0x9c   : > { %p5487_p11 = pnand %p5485_p9, %p6319_p8  ;;  %p5492_p0 = por %p5491_p13, %p5490_p12 }
  0x9e   : > { %p5488_p10 = pneg %p5487_p11 }
  0xa0   : > { %p5493_p2 = pnand %p5492_p0, %p5488_p10 }
  0xa2   : > { %5496 = shalt.err (!%p5493_p2)
}
  0xa3   : > { %5109 = dma.hbm_to_vmem [thread:$0]  (!%p6309_p6), %s918_s26, 16, %s920_s18, [#allocation18]  }
  0xa4   : > { %s6077_s9 = smov [#allocation20]   ;;  %s5512_s15 = sshra.s32 %s942_s16, 4  ;;  %s5513_s15 = int_to_ptr.hbm [resolvable:$true] %s5512_s15 }
  0xa5   : > { %s943_s6 = sshll.u32 %s6077_s9, 4  ;;  %s5514_s20 = scalar_lea.hbm %s5513_s15, 1  ;;  %s944_s6 = int_to_ptr.vmem [resolvable:$true] %s943_s6 }
  0xa6   : > { %p5515_p5 = scmp.ne.s32.totalorder %s5513_s15, %s5514_s20  ;;  %s5519_s5 = scalar_lea.hbm %s6166_s30, 1 }
  0xa7   : > { %p5520_p11 = scmp.lt.s32.totalorder %s5513_s15, %s6166_s30  ;;  %p5521_p10 = scmp.lt.s32.totalorder %s5519_s5, %s5514_s20 }
  0xa8   : > { %p5517_p7 = pnand %p5515_p5, %p6319_p8 }
  0xa9   : > { %p5522_p12 = por %p5521_p10, %p5520_p11 }
  0xaa   : > { %p5518_p9 = pneg %p5517_p7 }
  0xac   : > { %p5523_p13 = pnand %p5522_p12, %p5518_p9 }
  0xae   : > { %5526 = shalt.err (!%p5523_p13)
}
  0xaf   : > { %5115 = dma.hbm_to_vmem [thread:$0]  (!%p6309_p6), %s942_s16, 16, %s944_s6, [#allocation21]  }
  0xb0   : > { %s966_s26 = sshll.u32 %s6865_s12, 4  ;;  %s6078_s18 = smov [#allocation23]   ;;  %s967_s26 = int_to_ptr.hbm [resolvable:$true] %s966_s26 }
  0xb1   : > { %s968_s23 = sshll.u32 %s6078_s18, 4  ;;  %s995_s17 = sshll.u32 %s6867_s4, 4  ;;  %s969_s23 = int_to_ptr.vmem [resolvable:$true] %s968_s23  ;;  %s996_s17 = int_to_ptr.hbm [resolvable:$true] %s995_s17 }
  0xb2   : > { %s5542_s9 = sshra.s32 %s967_s26, 4  ;;  %s5549_s15 = scalar_lea.hbm %s6865_s12, 64  ;;  %s5543_s9 = int_to_ptr.hbm [resolvable:$true] %s5542_s9 }
  0xb3   : > { %s5544_s20 = scalar_lea.hbm %s5543_s9, 64  ;;  %p5550_p7 = scmp.lt.s32.totalorder %s5543_s9, %s6865_s12 }
  0xb4   : > { %p5545_p0 = scmp.ne.s32.totalorder %s5543_s9, %s5544_s20  ;;  %p5551_p9 = scmp.lt.s32.totalorder %s5549_s15, %s5544_s20 }
  0xb6   : > { %p5547_p2 = pnand %p5545_p0, %p6319_p8  ;;  %p5552_p11 = por %p5551_p9, %p5550_p7 }
  0xb8   : > { %p5548_p5 = pneg %p5547_p2 }
  0xba   : > { %p5553_p10 = pnand %p5552_p11, %p5548_p5 }
  0xbc   : > { %5556 = shalt.err (!%p5553_p10)
}
  0xbd   : > { %s6822_s16 = smov 64   ;;  %s6824_s6 = smov 4  }
  0xbe   : > { %5121 = dma.hbm_to_vmem [thread:$0]  (!%p6309_p6), %s967_s26, 1024, %s969_s23, [#allocation24], %s6822_s16, %s6822_s16, %s6824_s6  }
  0xbf   : > { %s6081_s5 = smov [#allocation26]   ;;  %s1044_s9 = sshll.u32 %s6866_s8, 4  ;;  %s6386_s9 = int_to_ptr.hbm [resolvable:$true] %s1044_s9 }
  0xc0   : > { %s997_s18 = sshll.u32 %s6081_s5, 4  ;;  %s5572_s20 = sshra.s32 %s996_s17, 4  ;;  %s998_s18 = int_to_ptr.vmem [resolvable:$true] %s997_s18  ;;  %s5573_s20 = int_to_ptr.hbm [resolvable:$true] %s5572_s20 }
  0xc1   : > { %s5574_s15 = scalar_lea.hbm %s5573_s20, 128  ;;  %s5579_s11 = scalar_lea.hbm %s6867_s4, 128 }
  0xc2   : > { %p5575_p12 = scmp.ne.s32.totalorder %s5573_s20, %s5574_s15  ;;  %p5580_p2 = scmp.lt.s32.totalorder %s5573_s20, %s6867_s4 }
  0xc3   : > { %p5581_p5 = scmp.lt.s32.totalorder %s5579_s11, %s5574_s15 }
  0xc4   : > { %p5577_p13 = pnand %p5575_p12, %p6319_p8 }
  0xc5   : > { %p5582_p7 = por %p5581_p5, %p5580_p2 }
  0xc6   : > { %p5578_p0 = pneg %p5577_p13 }
  0xc8   : > { %p5583_p9 = pnand %p5582_p7, %p5578_p0 }
  0xca   : > { %5586 = shalt.err (!%p5583_p9)
}
  0xcb   : > { %s6878_s26 = smov 128   ;;  %s822_s23 = sshll.u32 %s6864_s13, 4  ;;  %s6398_s23 = int_to_ptr.hbm [resolvable:$true] %s822_s23 }
  0xcc   : > { %5127 = dma.hbm_to_vmem [thread:$0]  (!%p6309_p6), %s996_s17, 2048, %s998_s18, [#allocation27], %s6878_s26, %s6878_s26, %s6826_s7  }
  0xcd   : > { %s6082_s5 = smov [#allocation29]   ;;  %s5602_s11 = sshra.s32 %s6386_s9, 4  ;;  %s5603_s11 = int_to_ptr.hbm [resolvable:$true] %s5602_s11 }
  0xce   : > { %s1046_s16 = sshll.u32 %s6082_s5, 4  ;;  %s5604_s20 = scalar_lea.hbm %s5603_s11, 256  ;;  %s1047_s16 = int_to_ptr.vmem [resolvable:$true] %s1046_s16 }
  0xcf   : > { %p5605_p11 = scmp.ne.s32.totalorder %s5603_s11, %s5604_s20  ;;  %s5609_s15 = scalar_lea.hbm %s6866_s8, 256 }
  0xd0   : > { %p5610_p13 = scmp.lt.s32.totalorder %s5603_s11, %s6866_s8  ;;  %p5611_p0 = scmp.lt.s32.totalorder %s5609_s15, %s5604_s20 }
  0xd1   : > { %p5607_p10 = pnand %p5605_p11, %p6319_p8 }
  0xd2   : > { %p5612_p2 = por %p5611_p0, %p5610_p13 }
  0xd3   : > { %p5608_p12 = pneg %p5607_p10 }
  0xd5   : > { %p5613_p5 = pnand %p5612_p2, %p5608_p12 }
  0xd7   : > { %5616 = shalt.err (!%p5613_p5)
}
  0xd8   : > { %s6879_s17 = smov 16   ;;  %s6880_s18 = smov 256  }
  0xd9   : > { %5133 = dma.hbm_to_vmem [thread:$0]  (!%p6309_p6), %s6386_s9, 4096, %s1047_s16, [#allocation30], %s6880_s18, %s6880_s18, %s6879_s17  }
  0xda   : > { %s6083_s5 = smov [#allocation7]   ;;  %s847_s7 = sshll.u32 %s6126_s21, 4  ;;  %s6412_s7 = int_to_ptr.hbm [resolvable:$true] %s847_s7 }
  0xdb   : > { %s824_s6 = sshll.u32 %s6083_s5, 4  ;;  %s5632_s11 = sshra.s32 %s6398_s23, 4  ;;  %s825_s6 = int_to_ptr.vmem [resolvable:$true] %s824_s6  ;;  %s5633_s11 = int_to_ptr.hbm [resolvable:$true] %s5632_s11 }
  0xdc   : > { %s5634_s20 = scalar_lea.hbm %s5633_s11, 8  ;;  %s5639_s15 = scalar_lea.hbm %s6864_s13, 8 }
  0xdd   : > { %p5635_p7 = scmp.ne.s32.totalorder %s5633_s11, %s5634_s20  ;;  %p5640_p10 = scmp.lt.s32.totalorder %s5633_s11, %s6864_s13 }
  0xde   : > { %p5641_p12 = scmp.lt.s32.totalorder %s5639_s15, %s5634_s20 }
  0xdf   : > { %p5637_p9 = pnand %p5635_p7, %p6319_p8 }
  0xe0   : > { %p5642_p13 = por %p5641_p12, %p5640_p10 }
  0xe1   : > { %p5638_p11 = pneg %p5637_p9 }
  0xe3   : > { %p5643_p0 = pnand %p5642_p13, %p5638_p11 }
  0xe5   : > { %5646 = shalt.err (!%p5643_p0)
}
  0xe6   : > { %5088 = dma.hbm_to_vmem [thread:$0]  (!%p6309_p6), %s6398_s23, 128, %s825_s6, [#allocation6]  }
  0xe7   : > { %s874_s16 = sshll.u32 %s6136_s29, 4  ;;  %s6084_s9 = smov [#allocation10]   ;;  %s6423_s16 = int_to_ptr.hbm [resolvable:$true] %s874_s16 }
  0xe8   : > { %s849_s17 = sshll.u32 %s6084_s9, 4  ;;  %s5662_s18 = sshra.s32 %s6412_s7, 4  ;;  %s850_s17 = int_to_ptr.vmem [resolvable:$true] %s849_s17  ;;  %s5663_s18 = int_to_ptr.hbm [resolvable:$true] %s5662_s18 }
  0xe9   : > { %s5664_s5 = scalar_lea.hbm %s5663_s18, 128  ;;  %s5669_s11 = scalar_lea.hbm %s6126_s21, 128 }
  0xea   : > { %p5665_p2 = scmp.ne.s32.totalorder %s5663_s18, %s5664_s5  ;;  %p5670_p9 = scmp.lt.s32.totalorder %s5663_s18, %s6126_s21 }
  0xeb   : > { %p5671_p11 = scmp.lt.s32.totalorder %s5669_s11, %s5664_s5 }
  0xec   : > { %p5667_p5 = pnand %p5665_p2, %p6319_p8 }
  0xed   : > { %p5672_p10 = por %p5671_p11, %p5670_p9 }
  0xee   : > { %p5668_p7 = pneg %p5667_p5 }
  0xf0   : > { %p5673_p12 = pnand %p5672_p10, %p5668_p7 }
  0xf2   : > { %5676 = shalt.err (!%p5673_p12)
}
  0xf3   : > { %s6881_s6 = smov 8   ;;  %s6085_s23 = smov [#allocation13]  }
  0xf4   : > { %5094 = dma.hbm_to_vmem [thread:$0]  (!%p6309_p6), %s6412_s7, 2048, %s850_s17, [#allocation9], %s6878_s26, %s6878_s26, %s6881_s6  }
  0xf5   : > { %s876_s20 = sshll.u32 %s6085_s23, 4  ;;  %s902_s15 = sshll.u32 %s6863_s14, 4  ;;  %s877_s20 = int_to_ptr.vmem [resolvable:$true] %s876_s20  ;;  %s6437_s15 = int_to_ptr.hbm [resolvable:$true] %s902_s15 }
  0xf6   : > { %s5692_s9 = sshra.s32 %s6423_s16, 4  ;;  %s5699_s5 = scalar_lea.hbm %s6136_s29, 1  ;;  %s5693_s9 = int_to_ptr.hbm [resolvable:$true] %s5692_s9 }
  0xf7   : > { %s5694_s18 = scalar_lea.hbm %s5693_s9, 1  ;;  %p5700_p5 = scmp.lt.s32.totalorder %s5693_s9, %s6136_s29 }
  0xf8   : > { %p5695_p13 = scmp.ne.s32.totalorder %s5693_s9, %s5694_s18  ;;  %p5701_p7 = scmp.lt.s32.totalorder %s5699_s5, %s5694_s18 }
  0xfa   : > { %p5697_p0 = pnand %p5695_p13, %p6319_p8  ;;  %p5702_p9 = por %p5701_p7, %p5700_p5 }
  0xfc   : > { %p5698_p2 = pneg %p5697_p0 }
  0xfe   : > { %p5703_p11 = pnand %p5702_p9, %p5698_p2 }
 0x100   : > { %5706 = shalt.err (!%p5703_p11)
}
 0x101   : > { %5100 = dma.hbm_to_vmem [thread:$0]  (!%p6309_p6), %s6423_s16, 16, %s877_s20, [#allocation12]  }
 0x102   : > { %s929_s7 = sshll.u32 %s6161_s24, 4  ;;  %s6086_s26 = smov [#allocation16]   ;;  %s6448_s7 = int_to_ptr.hbm [resolvable:$true] %s929_s7 }
 0x103   : > { %s904_s17 = sshll.u32 %s6086_s26, 4  ;;  %s5722_s11 = sshra.s32 %s6437_s15, 4  ;;  %s905_s17 = int_to_ptr.vmem [resolvable:$true] %s904_s17  ;;  %s5723_s11 = int_to_ptr.hbm [resolvable:$true] %s5722_s11 }
 0x104   : > { %s5724_s6 = scalar_lea.hbm %s5723_s11, 256  ;;  %s5729_s23 = scalar_lea.hbm %s6863_s14, 256 }
 0x105   : > { %p5725_p10 = scmp.ne.s32.totalorder %s5723_s11, %s5724_s6  ;;  %p5730_p0 = scmp.lt.s32.totalorder %s5723_s11, %s6863_s14 }
 0x106   : > { %p5731_p2 = scmp.lt.s32.totalorder %s5729_s23, %s5724_s6 }
 0x107   : > { %p5727_p12 = pnand %p5725_p10, %p6319_p8 }
 0x108   : > { %p5732_p5 = por %p5731_p2, %p5730_p0 }
 0x109   : > { %p5728_p13 = pneg %p5727_p12 }
 0x10b   : > { %p5733_p7 = pnand %p5732_p5, %p5728_p13 }
 0x10d   : > { %5736 = shalt.err (!%p5733_p7)
}
 0x10e   : > { %s6882_s16 = smov 4   ;;  %s6883_s20 = smov 64  }
 0x10f   : > { %s6884_s9 = sld [smem:[#allocation51_spill]]  ;;  %s6087_s18 = smov [#allocation19]  }
 0x110   : > { %5106 = dma.hbm_to_vmem [thread:$0]  (!%p6309_p6), %s6437_s15, 4096, %s905_s17, [#allocation15], %s6883_s20, %s6883_s20, %s6882_s16  }
 0x111   : > { %s931_s5 = sshll.u32 %s6087_s18, 4  ;;  %s5752_s11 = sshra.s32 %s6448_s7, 4  ;;  %s932_s5 = int_to_ptr.vmem [resolvable:$true] %s931_s5  ;;  %s5753_s11 = int_to_ptr.hbm [resolvable:$true] %s5752_s11 }
 0x112   : > { %s5754_s6 = scalar_lea.hbm %s5753_s11, 1  ;;  %s5759_s23 = scalar_lea.hbm %s6161_s24, 1 }
 0x113   : > { %p5755_p9 = scmp.ne.s32.totalorder %s5753_s11, %s5754_s6  ;;  %p5760_p12 = scmp.lt.s32.totalorder %s5753_s11, %s6161_s24 }
 0x114   : > { %p5761_p13 = scmp.lt.s32.totalorder %s5759_s23, %s5754_s6 }
 0x115   : > { %s952_s26 = sshll.u32 %s6884_s9, 4  ;;  %p5757_p11 = pnand %p5755_p9, %p6319_p8  ;;  %s6462_s26 = int_to_ptr.hbm [resolvable:$true] %s952_s26 }
 0x116   : > { %p5762_p0 = por %p5761_p13, %p5760_p12 }
 0x117   : > { %p5758_p10 = pneg %p5757_p11 }
 0x119   : > { %p5763_p2 = pnand %p5762_p0, %p5758_p10 }
 0x11b   : > { %5766 = shalt.err (!%p5763_p2)
}
 0x11c   : > { %s6885_s15 = sld [smem:[#allocation53_spill]]  ;;  %s6088_s17 = smov [#allocation22]  }
 0x11d   : > { %5112 = dma.hbm_to_vmem [thread:$0]  (!%p6309_p6), %s6448_s7, 16, %s932_s5, [#allocation18]  }
 0x11e   : > { %s954_s18 = sshll.u32 %s6088_s17, 4  ;;  %s5782_s4 = sshra.s32 %s6462_s26, 4  ;;  %s955_s18 = int_to_ptr.vmem [resolvable:$true] %s954_s18  ;;  %s5783_s4 = int_to_ptr.hbm [resolvable:$true] %s5782_s4 }
 0x11f   : > { %s5784_s11 = scalar_lea.hbm %s5783_s4, 192  ;;  %s5789_s6 = scalar_lea.hbm %s6884_s9, 192 }
 0x120   : > { %p5785_p5 = scmp.ne.s32.totalorder %s5783_s4, %s5784_s11  ;;  %p5790_p11 = scmp.lt.s32.totalorder %s5783_s4, %s6884_s9 }
 0x121   : > { %p5791_p10 = scmp.lt.s32.totalorder %s5789_s6, %s5784_s11 }
 0x122   : > { %s981_s3 = sshll.u32 %s6885_s15, 4  ;;  %p5787_p7 = pnand %p5785_p5, %p6319_p8  ;;  %s982_s3 = int_to_ptr.hbm [resolvable:$true] %s981_s3 }
 0x123   : > { %p5792_p12 = por %p5791_p10, %p5790_p11 }
 0x124   : > { %p5788_p9 = pneg %p5787_p7 }
 0x126   : > { %p5793_p13 = pnand %p5792_p12, %p5788_p9 }
 0x128   : > { %5796 = shalt.err (!%p5793_p13)
}
 0x129   : > { %s6089_s23 = smov 192   ;;  %s6886_s7 = sld [smem:[#allocation60_spill]] }
 0x12a   : > { %s6090_s5 = smov 12   ;;  %s6091_s17 = smov [#allocation25]  }
 0x12b   : > { %5118 = dma.hbm_to_vmem [thread:$0]  (!%p6309_p6), %s6462_s26, 3072, %s955_s18, [#allocation21], %s6089_s23, %s6089_s23, %s6090_s5  }
 0x12c   : > { %s983_s8 = sshll.u32 %s6091_s17, 4  ;;  %s5812_s4 = sshra.s32 %s982_s3, 4  ;;  %s984_s8 = int_to_ptr.vmem [resolvable:$true] %s983_s8  ;;  %s5813_s4 = int_to_ptr.hbm [resolvable:$true] %s5812_s4 }
 0x12d   : > { %s5814_s11 = scalar_lea.hbm %s5813_s4, 1  ;;  %s5819_s6 = scalar_lea.hbm %s6885_s15, 1 }
 0x12e   : > { %p5815_p0 = scmp.ne.s32.totalorder %s5813_s4, %s5814_s11  ;;  %p5820_p7 = scmp.lt.s32.totalorder %s5813_s4, %s6885_s15 }
 0x12f   : > { %s1021_s12 = sshll.u32 %s6886_s7, 4  ;;  %p5821_p9 = scmp.lt.s32.totalorder %s5819_s6, %s5814_s11  ;;  %s6482_s12 = int_to_ptr.hbm [resolvable:$true] %s1021_s12 }
 0x130   : > { %p5817_p2 = pnand %p5815_p0, %p6319_p8 }
 0x131   : > { %p5822_p11 = por %p5821_p9, %p5820_p7 }
 0x132   : > { %p5818_p5 = pneg %p5817_p2 }
 0x134   : > { %p5823_p10 = pnand %p5822_p11, %p5818_p5 }
 0x136   : > { %5826 = shalt.err (!%p5823_p10)
}
 0x137   : > { %s6887_s26 = sld [smem:[#allocation66_spill]]  ;;  %s6092_s23 = smov [#allocation28]  }
 0x138   : > { %5124 = dma.hbm_to_vmem [thread:$0]  (!%p6309_p6), %s982_s3, 16, %s984_s8, [#allocation24]  }
 0x139   : > { %s1023_s5 = sshll.u32 %s6092_s23, 4  ;;  %s5842_s17 = sshra.s32 %s6482_s12, 4  ;;  %s1024_s5 = int_to_ptr.vmem [resolvable:$true] %s1023_s5  ;;  %s5843_s17 = int_to_ptr.hbm [resolvable:$true] %s5842_s17 }
 0x13a   : > { %s5844_s4 = scalar_lea.hbm %s5843_s17, 64  ;;  %s5849_s11 = scalar_lea.hbm %s6886_s7, 64 }
 0x13b   : > { %p5845_p12 = scmp.ne.s32.totalorder %s5843_s17, %s5844_s4  ;;  %p5850_p2 = scmp.lt.s32.totalorder %s5843_s17, %s6886_s7 }
 0x13c   : > { %p5851_p5 = scmp.lt.s32.totalorder %s5849_s11, %s5844_s4 }
 0x13d   : > { %s1061_s18 = sshll.u32 %s6887_s26, 4  ;;  %p5847_p13 = pnand %p5845_p12, %p6319_p8  ;;  %s6491_s18 = int_to_ptr.hbm [resolvable:$true] %s1061_s18 }
 0x13e   : > { %p5852_p7 = por %p5851_p5, %p5850_p2 }
 0x13f   : > { %p5848_p0 = pneg %p5847_p13 }
 0x141   : > { %p5853_p9 = pnand %p5852_p7, %p5848_p0 }
 0x143   : > { %5856 = shalt.err (!%p5853_p9)
}
 0x144   : > { %5130 = dma.hbm_to_vmem [thread:$0]  (!%p6309_p6), %s6482_s12, 1024, %s1024_s5, [#allocation27], %s6883_s20, %s6883_s20, %s6882_s16  }
 0x145   : > { %s6093_s3 = smov [#allocation31]   ;;  %s5872_s6 = sshra.s32 %s6491_s18, 4  ;;  %s5873_s6 = int_to_ptr.hbm [resolvable:$true] %s5872_s6 }
 0x146   : > { %s1063_s8 = sshll.u32 %s6093_s3, 4  ;;  %s5874_s23 = scalar_lea.hbm %s5873_s6, 256  ;;  %s1064_s8 = int_to_ptr.vmem [resolvable:$true] %s1063_s8 }
 0x147   : > { %p5875_p11 = scmp.ne.s32.totalorder %s5873_s6, %s5874_s23  ;;  %s5879_s17 = scalar_lea.hbm %s6887_s26, 256 }
 0x148   : > { %p5880_p13 = scmp.lt.s32.totalorder %s5873_s6, %s6887_s26  ;;  %p5881_p0 = scmp.lt.s32.totalorder %s5879_s17, %s5874_s23 }
 0x149   : > { %p5877_p10 = pnand %p5875_p11, %p6319_p8 }
 0x14a   : > { %p5882_p2 = por %p5881_p0, %p5880_p13 }
 0x14b   : > { %p5878_p12 = pneg %p5877_p10 }
 0x14d   : > { %p5883_p5 = pnand %p5882_p2, %p5878_p12 }
 0x14f   : > { %5886 = shalt.err (!%p5883_p5)
}
 0x150   : > { %5136 = dma.hbm_to_vmem [thread:$0]  (!%p6309_p6), %s6491_s18, 4096, %s1064_s8, [#allocation30], %s6883_s20, %s6883_s20, %s6882_s16  }
 0x151   : > { %s4016_s12 = sadd.s32 4294967294, %s6034_s0   ;;  %s6517_s27 = sadd.s32 1, %s6034_s0  }
 0x152   : > { %s94_s22 = ssub.s32 %s6034_s0, %s6517_s27  ;;  %s97_s5 = sadd.s32 1, %s6030_s2 }
 0x153   : > { %s6888_s4 = sld [smem:[#allocation44_spill]]  ;;  %p95_p8 = scmp.eq.s32.totalorder %s94_s22, 0 }
 0x154   : > { %p104_p7 = scmp.ne.s32.totalorder %s6030_s2, %s6026_s1  ;;  %p105_p9 = scmp.eq.s32.totalorder %s6034_s0, 0 }
 0x155   : > { %p110_p11 = scmp.ne.s32.totalorder %s6026_s1, %s6022_s28  ;;  %p785_p12 = scmp.eq.s32.totalorder %s6292_s10, 1 }
 0x156   : > { %s6528_s11 = scalar_select %p95_p8, %s6030_s2, %s97_s5  }
 0x157   : > { %p6530_p10 = por %p105_p9, %p104_p7  ;;  %p6536_p6 = por %p6835_p1, %p110_p11 }
 0x158   : > { %p791_p13 = scmp.eq.s32.totalorder %s4016_s12, 1  ;;  %p5163_p0 = scmp.lt.s32.totalorder %s6034_s0, 2 }
 0x159   : > { %s1086_s20 = sand.u32 1, %s6030_s2   ;;  %p6543_p2 = por %p785_p12, %p104_p7 }
 0x15a   : > { %p6547_p5 = por %p791_p13, %p110_p11  ;;  %s4037_s6 = sshll.u32 %s1086_s20, 3 }
 0x15b   : > { %s4038_s23 = sshll.u32 %s6034_s0, 3  ;;  %s1090_s22 = scalar_lea.vmem [#allocation2], %s4037_s6 }
 0x15c   : > { %s6892_s8 = scalar_select %p6547_p5, 1, 0 }
 0x15d   : > { %s1094_s17 = scalar_lea.hbm %s6888_s4, %s4038_s23  ;;  %s1098_s5 = sshll.u32 %s1090_s22, 4  ;;  %s1099_s5 = int_to_ptr.vmem [resolvable:$true] %s1098_s5 }
 0x15e   : > { %s1096_s7 = sshll.u32 %s1094_s17, 4  ;;  %p6555_p8 = pnand %p5163_p0, %p6530_p10  ;;  %s1097_s7 = int_to_ptr.hbm [resolvable:$true] %s1096_s7 }
 0x15f   : > { %s1087_s9 = scalar_lea.sflag [#allocation3], %s1086_s20  ;;  %s5902_s13 = sshra.s32 %s1097_s7, 4  ;;  %s5903_s13 = int_to_ptr.hbm [resolvable:$true] %s5902_s13 }
 0x160   : > { %s5904_s14 = scalar_lea.hbm %s5903_s13, 8  ;;  %p5906_p9 = pneg %p6555_p8 }
 0x161   : > { %p5905_p7 = scmp.ne.s32.totalorder %s5903_s13, %s5904_s14  ;;  %s5909_s6 = scalar_lea.hbm %s6888_s4, 16 }
 0x162   : > { %p5910_p13 = scmp.lt.s32.totalorder %s5903_s13, %s6888_s4  ;;  %p5911_p4 = scmp.lt.s32.totalorder %s5909_s6, %s5904_s14 }
 0x163   : > { %p5907_p11 = pnand %p5906_p9, %p5905_p7 }
 0x164   : > { %p5912_p1 = por %p5911_p4, %p5910_p13 }
 0x165   : > { %p5908_p12 = pneg %p5907_p11 }
 0x167   : > { %p5913_p5 = pnand %p5912_p1, %p5908_p12 }
 0x169   : > { %5916 = shalt.err (!%p5913_p5)
}
 0x16a   : > { %5140 = dma.hbm_to_vmem [thread:$0]  (!%p6555_p8), %s1097_s7, 128, %s1099_s5, %s1087_s9  }
 0x16b   : > { %1107 = sbr.rel (%p6297_p3) target bundleno = 4334 (0x10ee), region = 148  ;;  %s6568_s20 = sand.u32 (!%p6297_p3), 1, %s6026_s1  }
 0x16c   : > { %s4040_s23 = sshll.u32 (!%p6297_p3), %s6568_s20, 3  ;;  %s1110_s17 = scalar_lea.sflag (!%p6297_p3), [#allocation3], %s6568_s20 }
 0x16d   : > { %s1113_s13 = scalar_lea.vmem (!%p6297_p3), [#allocation2], %s4040_s23 }
 0x170   : > { %5977 = dma.done.wait (%p6536_p6), %s1110_s17, 128  }
 0x171   : > { %5979 = vsyncadd (%p6536_p6), %s1110_s17, 4294967168  ;;  %p6895_p1 = scmp.eq.s32.totalorder %s6292_s10, 0 }
 0x173   : > { %5981 = dma.done.wait (%p6895_p1), [#allocation6], 256   ;;  %p6896_p3 = pmov %p6895_p1 }
 0x174   : > { %p6897_p4 = pmov %p6895_p1 }
 0x175   : > { %5983 = vsyncadd (%p6896_p3), [#allocation6], 4294967040 }
 0x176   : > { %5985 = dma.done.wait (%p6897_p4), [#allocation9], 4096   ;;  %p6898_p10 = pmov %p6895_p1 }
 0x177   : > { %p6899_p0 = pmov %p6895_p1 }
 0x178   : > { %5987 = vsyncadd (%p6898_p10), [#allocation9], 4294963200 }
 0x179   : > { %5989 = dma.done.wait (%p6899_p0), [#allocation12], 32   ;;  %p6900_p5 = pmov %p6899_p0 }
 0x17a   : > { %p6901_p6 = pmov %p6899_p0 }
 0x17b   : > { %5991 = vsyncadd (%p6900_p5), [#allocation12], 4294967264 }
 0x17c   : > { %5993 = dma.done.wait (%p6901_p6), [#allocation15], 8192   ;;  %p6902_p8 = pmov %p6899_p0 }
 0x17d   : > { %p6903_p7 = pmov %p6899_p0 }
 0x17e   : > { %5995 = vsyncadd (%p6902_p8), [#allocation15], 4294959104 }
 0x17f   : > { %5997 = dma.done.wait (%p6903_p7), [#allocation18], 32   ;;  %p6904_p9 = pmov %p6899_p0 }
 0x180   : > { %p6905_p11 = pmov %p6899_p0 }
 0x181   : > { %5999 = vsyncadd (%p6904_p9), [#allocation18], 4294967264 }
 0x182   : > { %6001 = dma.done.wait (%p6905_p11), [#allocation21], 3088   ;;  %p6906_p12 = pmov %p6899_p0 }
 0x183   : > { %p6907_p13 = pmov %p6899_p0 }
 0x184   : > { %6003 = vsyncadd (%p6906_p12), [#allocation21], 4294964208 }
 0x185   : > { %6005 = dma.done.wait (%p6907_p13), [#allocation24], 1040   ;;  %p6908_p1 = pmov %p6899_p0 }
 0x186   : > { %p6909_p3 = pmov %p6899_p0 }
 0x187   : > { %6007 = vsyncadd (%p6908_p1), [#allocation24], 4294966256 }
 0x188   : > { %6009 = dma.done.wait (%p6909_p3), [#allocation27], 3072   ;;  %p6910_p4 = pmov %p6899_p0 }
 0x189   : > { %p6911_p10 = pmov %p6899_p0 }
 0x18a   : > { %6011 = vsyncadd (%p6910_p4), [#allocation27], 4294964224 }
 0x18b   : > { %6013 = dma.done.wait (%p6911_p10), [#allocation30], 8192  }
 0x18c   : > { %6015 = vsyncadd (%p6899_p0), [#allocation30], 4294959104  ;;  %v6614_v0 = vld [vmem:[%s1113_s13] sm:$0xff]  ;;  %v6094_v1 = vmov 128.0   ;;  %v4852_v3 = vld [vmem:[#allocation14 + $0xec] sm:$0xf0] }
 0x18d   : > { %1323 = vadd.xlane.f32.xlu0 %v6614_v0  ;;  %5292 = vrcp.f32 %v6094_v1  ;;  %v4174_v2 = vld [vmem:[#allocation14 + $0xe0] sm:$0xf]  ;;  %v4850_v4 = vld [vmem:[#allocation14 + $0xe4] sm:$0xf]  ;;  %v4176_v6 = vld [vmem:[#allocation14 + $0xf0] sm:$0xf0] }
 0x18e   : > { %v4175_v5 = vor.u32 %v4852_v3, %v4174_v2  ;;  %v4182_v7 = vld [vmem:[#allocation14 + $0xe8] sm:$0xf]  ;;  %v4853_v8 = vld [vmem:[#allocation14 + $0xf4] sm:$0xf0]  ;;  %v4179_v9 = vor.u32 %v4850_v4, %v4176_v6  ;;  %v4851_v11 = vld [vmem:[#allocation14 + $0xec] sm:$0xf] }
 0x18f   : > { %v4183_v10 = vor.u32 %v4853_v8, %v4182_v7  ;;  %v4184_v12 = vld [vmem:[#allocation14 + $0xf8] sm:$0xf0]  ;;  %v4158_v24 = vld [vmem:[#allocation14 + $0xc0] sm:$0xf]  ;;  %v4848_v25 = vld [vmem:[#allocation14 + $0xcc] sm:$0xf0] }
 0x190   : > { %1561 = vmatpush.bf16.msra.mxu0 %v4175_v5  ;;  %v4187_v13 = vor.u32 %v4851_v11, %v4184_v12  ;;  %1574 = vmatpush.bf16.msra.mxu1 %v4179_v9  ;;  %v4846_v26 = vld [vmem:[#allocation14 + $0xc4] sm:$0xf]  ;;  %v4159_v27 = vor.u32 %v4848_v25, %v4158_v24  ;;  %v4160_v28 = vld [vmem:[#allocation14 + $0xd0] sm:$0xf0]  ;;  %v4166_v29 = vld [vmem:[#allocation14 + $0xc8] sm:$0xf] }
 0x191   : > { %1587 = vmatpush.bf16.msra.mxu2 %v4183_v10  ;;  %v4849_v30 = vld [vmem:[#allocation14 + $0xd4] sm:$0xf0]  ;;  %v4163_v31 = vor.u32 %v4846_v26, %v4160_v28  ;;  %v4847_v33 = vld [vmem:[#allocation14 + $0xcc] sm:$0xf]  ;;  %v4168_v34 = vld [vmem:[#allocation14 + $0xd8] sm:$0xf0] }
 0x192   : > { %1600 = vmatpush.bf16.msra.mxu3 %v4187_v13  ;;  %v4167_v32 = vor.u32 %v4849_v30, %v4166_v29  ;;  %v4171_v35 = vor.u32 %v4847_v33, %v4168_v34  ;;  %v4142_v36 = vld [vmem:[#allocation14 + $0xa0] sm:$0xf]  ;;  %v4844_v37 = vld [vmem:[#allocation14 + $0xac] sm:$0xf0]  ;;  %v4842_v38 = vld [vmem:[#allocation14 + $0xa4] sm:$0xf] }
 0x193   : > { %v5293_v14 = vpop.eup %5292  ;;  %v4143_v39 = vor.u32 %v4844_v37, %v4142_v36  ;;  %v4144_v40 = vld [vmem:[#allocation14 + $0xb0] sm:$0xf0]  ;;  %v4150_v41 = vld [vmem:[#allocation14 + $0xa8] sm:$0xf]  ;;  %v4845_v42 = vld [vmem:[#allocation14 + $0xb4] sm:$0xf0] }
 0x194   : > { %v1326_v15 = vmul.f32 128.0, %v5293_v14  ;;  %vm1330_vm0 = vweird.f32 %v5293_v14  ;;  %1562 = vmatpush.bf16.msra.mxu0 %v4159_v27  ;;  %1575 = vmatpush.bf16.msra.mxu1 %v4163_v31  ;;  %v4147_v43 = vor.u32 %v4842_v38, %v4144_v40  ;;  %v4151_v44 = vor.u32 %v4845_v42, %v4150_v41  ;;  %v4843_v45 = vld [vmem:[#allocation14 + $0xac] sm:$0xf]  ;;  %v4152_v46 = vld [vmem:[#allocation14 + $0xb8] sm:$0xf0]  ;;  %s6912_s14 = sld [smem:[#allocation49_spill]] }
 0x195   : > { %1588 = vmatpush.bf16.msra.mxu2 %v4167_v32  ;;  %v4155_v47 = vor.u32 %v4843_v45, %v4152_v46  ;;  %v4126_v48 = vld [vmem:[#allocation14 + $0x80] sm:$0xf]  ;;  %v4840_v49 = vld [vmem:[#allocation14 + $0x8c] sm:$0xf0]  ;;  %v4838_v50 = vld [vmem:[#allocation14 + $0x84] sm:$0xf] }
 0x196   : > { %v1327_v16 = vsub.f32 1.0, %v1326_v15  ;;  %1601 = vmatpush.bf16.msra.mxu3 %v4171_v35  ;;  %v4127_v51 = vor.u32 %v4840_v49, %v4126_v48  ;;  %v4128_v52 = vld [vmem:[#allocation14 + $0x90] sm:$0xf0]  ;;  %v4134_v53 = vld [vmem:[#allocation14 + $0x88] sm:$0xf]  ;;  %s6095_s9 = smov 96  }
 0x197   : > { %v4841_v54 = vld [vmem:[#allocation14 + $0x94] sm:$0xf0]  ;;  %v4131_v55 = vor.u32 %v4838_v50, %v4128_v52  ;;  %v4839_v57 = vld [vmem:[#allocation14 + $0x8c] sm:$0xf]  ;;  %v4136_v58 = vld [vmem:[#allocation14 + $0x98] sm:$0xf0] }
 0x198   : > { %v1328_v17 = vmul.f32 %v5293_v14, %v1327_v16  ;;  %1563 = vmatpush.bf16.msra.mxu0 %v4143_v39  ;;  %1576 = vmatpush.bf16.msra.mxu1 %v4147_v43  ;;  %v4135_v56 = vor.u32 %v4841_v54, %v4134_v53  ;;  %v4139_v59 = vor.u32 %v4839_v57, %v4136_v58  ;;  %v4110_v60 = vld [vmem:[#allocation14 + $0x60] sm:$0xf]  ;;  %v4836_v61 = vld [vmem:[#allocation14 + $0x6c] sm:$0xf0]  ;;  %v4834_v62 = vld [vmem:[#allocation14 + $0x64] sm:$0xf] }
 0x199   : > { %1589 = vmatpush.bf16.msra.mxu2 %v4151_v44  ;;  %v4111_v63 = vor.u32 %v4836_v61, %v4110_v60  ;;  %v4112_v1 = vld [vmem:[#allocation14 + $0x70] sm:$0xf0]  ;;  %v4118_v2 = vld [vmem:[#allocation14 + $0x68] sm:$0xf]  ;;  %v4837_v3 = vld [vmem:[#allocation14 + $0x74] sm:$0xf0] }
 0x19a   : > { %v1329_v18 = vadd.f32 %v5293_v14, %v1328_v17  ;;  %1602 = vmatpush.bf16.msra.mxu3 %v4155_v47  ;;  %v4115_v4 = vor.u32 %v4834_v62, %v4112_v1  ;;  %v4119_v5 = vor.u32 %v4837_v3, %v4118_v2  ;;  %v4835_v6 = vld [vmem:[#allocation14 + $0x6c] sm:$0xf]  ;;  %v4120_v7 = vld [vmem:[#allocation14 + $0x78] sm:$0xf0]  ;;  %v4094_v9 = vld [vmem:[#allocation14 + $0x40] sm:$0xf] }
 0x19b   : > { %v4123_v8 = vor.u32 %v4835_v6, %v4120_v7  ;;  %v4832_v10 = vld [vmem:[#allocation14 + $0x4c] sm:$0xf0]  ;;  %v4830_v11 = vld [vmem:[#allocation14 + $0x44] sm:$0xf]  ;;  %v4096_v13 = vld [vmem:[#allocation14 + $0x50] sm:$0xf0] }
 0x19c   : > { %v6617_v19 = vsel %vm1330_vm0, %v5293_v14, %v1329_v18  ;;  %1564 = vmatpush.bf16.msra.mxu0 %v4127_v51  ;;  %1577 = vmatpush.bf16.msra.mxu1 %v4131_v55  ;;  %v4095_v12 = vor.u32 %v4832_v10, %v4094_v9  ;;  %v4102_v14 = vld [vmem:[#allocation14 + $0x48] sm:$0xf]  ;;  %v4833_v15 = vld [vmem:[#allocation14 + $0x54] sm:$0xf0]  ;;  %v4099_v16 = vor.u32 %v4830_v11, %v4096_v13  ;;  %v4831_v18 = vld [vmem:[#allocation14 + $0x4c] sm:$0xf] }
 0x19d   : > { %1590 = vmatpush.bf16.msra.mxu2 %v4135_v56  ;;  %v4103_v17 = vor.u32 %v4833_v15, %v4102_v14  ;;  %v4828_v24 = vld [vmem:[#allocation14 + $0x2c] sm:$0xf0]  ;;  %v4826_v25 = vld [vmem:[#allocation14 + $0x24] sm:$0xf]  ;;  %v4080_v27 = vld [vmem:[#allocation14 + $0x30] sm:$0xf0] }
 0x19e   : > { %1603 = vmatpush.bf16.msra.mxu3 %v4139_v59  ;;  %v4086_v28 = vld [vmem:[#allocation14 + $0x28] sm:$0xf]  ;;  %v4829_v29 = vld [vmem:[#allocation14 + $0x34] sm:$0xf0]  ;;  %v4083_v30 = vor.u32 %v4826_v25, %v4080_v27  ;;  %v4827_v32 = vld [vmem:[#allocation14 + $0x2c] sm:$0xf] }
 0x19f   : > { %v4087_v31 = vor.u32 %v4829_v29, %v4086_v28  ;;  %v4088_v33 = vld [vmem:[#allocation14 + $0x38] sm:$0xf0]  ;;  %v4062_v34 = vld [vmem:[#allocation14] sm:$0xf]  ;;  %v4824_v36 = vld [vmem:[#allocation14 + $0xc] sm:$0xf0] }
 0x1a0   : > { %1565 = vmatpush.bf16.msra.mxu0 %v4111_v63  ;;  %1578 = vmatpush.bf16.msra.mxu1 %v4115_v4  ;;  %v4091_v35 = vor.u32 %v4827_v32, %v4088_v33  ;;  %v4822_v37 = vld [vmem:[#allocation14 + $0x4] sm:$0xf]  ;;  %v4064_v38 = vld [vmem:[#allocation14 + $0x10] sm:$0xf0]  ;;  %v4063_v39 = vor.u32 %v4824_v36, %v4062_v34  ;;  %v4070_v41 = vld [vmem:[#allocation14 + $0x8] sm:$0xf] }
 0x1a1   : > { %1591 = vmatpush.bf16.msra.mxu2 %v4119_v5  ;;  %v4067_v40 = vor.u32 %v4822_v37, %v4064_v38  ;;  %v4825_v42 = vld [vmem:[#allocation14 + $0x14] sm:$0xf0]  ;;  %v4823_v43 = vld [vmem:[#allocation14 + $0xc] sm:$0xf]  ;;  %v4072_v45 = vld [vmem:[#allocation14 + $0x18] sm:$0xf0] }
 0x1a2   : > { %1604 = vmatpush.bf16.msra.mxu3 %v4123_v8  ;;  %v4071_v44 = vor.u32 %v4825_v42, %v4070_v41  ;;  %v4075_v46 = vor.u32 %v4823_v43, %v4072_v45  ;;  %v5277_v56 = vld [vmem:[#allocation11] ss:$0 sm:$0xff]  ;;  %v5278_v59 = vld [vmem:[#allocation13] ss:$0 sm:$0xff]  ;;  %v4860_v2 = vld [vmem:[#allocation16 + $0x30] sm:$0xff]  ;;  %s6096_s7 = smov 32  }
 0x1a3   : > { %v4861_v63 = vld [vmem:[#allocation16 + $0x38] sm:$0xff]  ;;  %v4868_v3 = vld [vmem:[#allocation16 + $0x70] sm:$0xff]  ;;  %v4867_v6 = vld [vmem:[#allocation16 + $0x68] sm:$0xff]  ;;  %s6097_s16 = smov 64   ;;  %s6913_s22 = sld [smem:[#allocation54_spill]] }
 0x1a4   : > { %1566 = vmatpush.bf16.msra.mxu0 %v4095_v12  ;;  %1579 = vmatpush.bf16.msra.mxu1 %v4099_v16  ;;  %v4869_v1 = vld [vmem:[#allocation16 + $0x78] sm:$0xff]  ;;  %v4876_v7 = vld [vmem:[#allocation16 + $0xb0] sm:$0xff]  ;;  %v4858_v9 = vld [vmem:[#allocation16 + $0x20] sm:$0xff]  ;;  %s6914_s5 = sld [smem:[#allocation56_spill]] }
 0x1a5   : > { %1592 = vmatpush.bf16.msra.mxu2 %v4103_v17  ;;  %v4877_v4 = vld [vmem:[#allocation16 + $0xb8] sm:$0xff]  ;;  %v4884_v8 = vld [vmem:[#allocation16 + $0xf0] sm:$0xff]  ;;  %v4866_v10 = vld [vmem:[#allocation16 + $0x60] sm:$0xff]  ;;  %s6915_s12 = sld [smem:[#allocation57_spill]] }
 0x1a6   : > { %v4885_v5 = vld [vmem:[#allocation16 + $0xf8] sm:$0xff]  ;;  %v4875_v11 = vld [vmem:[#allocation16 + $0xa8] sm:$0xff]  ;;  %v4874_v15 = vld [vmem:[#allocation16 + $0xa0] sm:$0xff]  ;;  %s6916_s6 = sld [smem:[#allocation58_spill]] }
 0x1a7   : > { %v4883_v12 = vld [vmem:[#allocation16 + $0xe8] sm:$0xff]  ;;  %v4857_v13 = vld [vmem:[#allocation16 + $0x18] sm:$0xff]  ;;  %v4882_v16 = vld [vmem:[#allocation16 + $0xe0] sm:$0xff]  ;;  %s6917_s3 = sld [smem:[#allocation59_spill]] }
 0x1a8   : > { %1580 = vmatpush.bf16.msra.mxu1 %v4083_v30  ;;  %v4865_v14 = vld [vmem:[#allocation16 + $0x58] sm:$0xff]  ;;  %v4863_v27 = vld [vmem:[#allocation16 + $0x48] sm:$0xff]  ;;  %v4872_v30 = vld [vmem:[#allocation16 + $0x90] sm:$0xff]  ;;  %s6918_s17 = sld [smem:[#allocation61_spill]] }
 0x1a9   : > { %1593 = vmatpush.bf16.msra.mxu2 %v4087_v31  ;;  %v1391_v17 = vld [vmem:[%s6912_s14] sm:$0xf]  ;;  %v4880_v31 = vld [vmem:[#allocation16 + $0xd0] sm:$0xff]  ;;  %v4854_v34 = vld [vmem:[#allocation16] sm:$0xff]  ;;  %s6919_s13 = sld [smem:[#allocation62_spill]] }
 0x1aa   : > { %v1394_v25 = vperm.slane %v1391_v17, 1  ;;  %v1395_v38 = vperm.slane %v1391_v17, 2  ;;  %v4879_v41 = vld [vmem:[#allocation16 + $0xc8] sm:$0xff]  ;;  %s6920_s14 = sld [smem:[#allocation63_spill]] }
 0x1ac   : > { %1581 = vmatpush.bf16.msra.mxu1 %v4067_v40  ;;  %v4871_v40 = vld [vmem:[#allocation16 + $0x88] sm:$0xff] }
 0x1ad   : > { %1594 = vmatpush.bf16.msra.mxu2 %v4071_v44 }
 0x1b0   : > { %1970 = vmatpush.bf16.msrb.mxu1 %v4869_v1 }
 0x1b1   : > { %1983 = vmatpush.bf16.msrb.mxu2 %v4877_v4 }
 0x1b4   : > { %1971 = vmatpush.bf16.msrb.mxu1 %v4868_v3 }
 0x1b5   : > { %1984 = vmatpush.bf16.msrb.mxu2 %v4876_v7 }
 0x1b8   : > { %1972 = vmatpush.bf16.msrb.mxu1 %v4867_v6 }
 0x1b9   : > { %1985 = vmatpush.bf16.msrb.mxu2 %v4875_v11 }
 0x1bc   : > { %1973 = vmatpush.bf16.msrb.mxu1 %v4866_v10 }
 0x1bd   : > { %1986 = vmatpush.bf16.msrb.mxu2 %v4874_v15 }
 0x1c0   : > { %1974 = vmatpush.bf16.msrb.mxu1 %v4865_v14 }
 0x200   : > { %v1324_v20 = vpop.xlane.xlu0 %1323 }
 0x201   : > { %v1332_v21 = vmul.f32 %v6617_v19, %v1324_v20  ;;  %v4104_v20 = vld [vmem:[#allocation14 + $0x58] sm:$0xf0] }
 0x203   : > { %v6621_v22 = vsub.f32 %v6614_v0, %v1332_v21  ;;  %v4107_v21 = vor.u32 %v4831_v18, %v4104_v20  ;;  %v4856_v18 = vld [vmem:[#allocation16 + $0x10] sm:$0xff] }
 0x204   : > { %v4864_v20 = vld [vmem:[#allocation16 + $0x50] sm:$0xff] }
 0x205   : > { %v1334_v23 = vmul.f32 %v6621_v22, %v6621_v22  ;;  %1605 = vmatpush.bf16.msra.mxu3 %v4107_v21  ;;  %1975 = vmatpush.bf16.msrb.mxu1 %v4864_v20  ;;  %v4873_v21 = vld [vmem:[#allocation16 + $0x98] sm:$0xff] }
 0x206   : > { %1987 = vmatpush.bf16.msrb.mxu2 %v4873_v21 }
 0x207   : > { %1335 = vadd.xlane.f32.xlu0 %v1334_v23  ;;  %v4078_v23 = vld [vmem:[#allocation14 + $0x20] sm:$0xf] }
 0x208   : > { %v4079_v26 = vor.u32 %v4828_v24, %v4078_v23  ;;  %v4881_v23 = vld [vmem:[#allocation16 + $0xd8] sm:$0xff]  ;;  %v1393_v24 = vperm.slane %v1391_v17, 0 }
 0x209   : > { %1606 = vmatpush.bf16.msra.mxu3 %v4091_v35  ;;  %1976 = vmatpush.bf16.msrb.mxu1 %v4863_v27  ;;  %v4862_v35 = vld [vmem:[#allocation16 + $0x40] sm:$0xff] }
 0x20a   : > { %1567 = vmatpush.bf16.msra.mxu0 %v4079_v26  ;;  %v4855_v26 = vld [vmem:[#allocation16 + $0x8] sm:$0xff]  ;;  %1988 = vmatpush.bf16.msrb.mxu2 %v4872_v30 }
 0x20d   : > { %1607 = vmatpush.bf16.msra.mxu3 %v4075_v46  ;;  %1977 = vmatpush.bf16.msrb.mxu1 %v4862_v35 }
 0x20e   : > { %1568 = vmatpush.bf16.msra.mxu0 %v4063_v39  ;;  %v1396_v39 = vperm.slane %v1391_v17, 3  ;;  %1989 = vmatpush.bf16.msrb.mxu2 %v4871_v40 }
 0x211   : > { %1996 = vmatpush.bf16.msrb.mxu3 %v4885_v5 }
 0x212   : > { %1957 = vmatpush.bf16.msrb.mxu0 %v4861_v63 }
 0x215   : > { %1997 = vmatpush.bf16.msrb.mxu3 %v4884_v8 }
 0x216   : > { %1958 = vmatpush.bf16.msrb.mxu0 %v4860_v2 }
 0x219   : > { %1998 = vmatpush.bf16.msrb.mxu3 %v4883_v12 }
 0x21d   : > { %1999 = vmatpush.bf16.msrb.mxu3 %v4882_v16 }
 0x221   : > { %2000 = vmatpush.bf16.msrb.mxu3 %v4881_v23 }
 0x225   : > { %2001 = vmatpush.bf16.msrb.mxu3 %v4880_v31 }
 0x229   : > { %2002 = vmatpush.bf16.msrb.mxu3 %v4879_v41 }
 0x27a   : > { %v1336_v47 = vpop.xlane.xlu0 %1335 }
 0x27b   : > { %v1337_v48 = vmul.f32 %v1336_v47, %v6617_v19 }
 0x27d   : > { %v1338_v49 = vadd.f32 1e-05, %v1337_v48  ;;  %v4870_v48 = vld [vmem:[#allocation16 + $0x80] sm:$0xff] }
 0x27e   : > { %1990 = vmatpush.bf16.msrb.mxu2 %v4870_v48 }
 0x27f   : > { %5294 = vrsqrt.f32 %v1338_v49  ;;  %vm1345_vm2 = vweird.f32 %v1338_v49 }
 0x285   : > { %v5295_v50 = vpop.eup %5294 }
 0x286   : > { %v1340_v51 = vmul.f32 %v5295_v50, %v1338_v49  ;;  %vm1346_vm1 = vweird.f32 %v5295_v50  ;;  %v4878_v49 = vld [vmem:[#allocation16 + $0xc0] sm:$0xff] }
 0x287   : > { %vm1347_vm3 = vmor %vm1345_vm2, %vm1346_vm1  ;;  %2003 = vmatpush.bf16.msrb.mxu3 %v4878_v49 }
 0x288   : > { %v1341_v52 = vmul.f32 %v5295_v50, %v1340_v51 }
 0x28a   : > { %v1342_v53 = vmul.f32 0.5, %v1341_v52 }
 0x28c   : > { %v1343_v54 = vsub.f32 1.5, %v1342_v53 }
 0x28e   : > { %v1344_v55 = vmul.f32 %v5295_v50, %v1343_v54 }
 0x290   : > { %v1348_v57 = vsel %vm1347_vm3, %v5295_v50, %v1344_v55 }
 0x291   : > { %v1349_v58 = vmul.f32 %v1348_v57, %v6621_v22  ;;  %v4859_v22 = vld [vmem:[#allocation16 + $0x28] sm:$0xff] }
 0x292   : > { %1959 = vmatpush.bf16.msrb.mxu0 %v4859_v22 }
 0x293   : > { %v1353_v60 = vmul.f32 %v5277_v56, %v1349_v58 }
 0x295   : > { %v1357_v61 = vadd.f32 %v5278_v59, %v1353_v60 }
 0x296   : > { %1960 = vmatpush.bf16.msrb.mxu0 %v4858_v9 }
 0x297   : > { %v1390_v62 = vpack.c.bf16 %v1357_v61, %v1357_v61 }
 0x299   : > { %1569 = vmatmul.bf16.vlgmr.msra.gmra.mxu0 %v1390_v62  ;;  %1582 = vmatmul.bf16.vlgmr.msra.gmra.mxu1 %v1390_v62 }
 0x29a   : > { %1595 = vmatmul.bf16.vlgmr.msra.gmra.mxu2 %v1390_v62  ;;  %1608 = vmatmul.bf16.vlgmr.msra.gmra.mxu3 %v1390_v62 }
 0x29b   : > { %1961 = vmatpush.bf16.msrb.mxu0 %v4857_v13 }
 0x29f   : > { %1962 = vmatpush.bf16.msrb.mxu0 %v4856_v18 }
 0x2a3   : > { %1963 = vmatpush.bf16.msrb.mxu0 %v4855_v26 }
 0x2a7   : > { %1964 = vmatpush.bf16.msrb.mxu0 %v4854_v34 }
 0x316   : > { %v1570_v28 = vpop.f32.mrf.mxu0  ;;  %v1583_v29 = vpop.f32.mrf.mxu1 }
 0x317   : > { %v6628_v32 = vadd.f32 %v1570_v28, %v1393_v24  ;;  %v6630_v33 = vadd.f32 %v1583_v29, %v1394_v25 }
 0x319   : > { %v4188_v36 = vmul.f32 -1.442695, %v6628_v32  ;;  %v4189_v37 = vmul.f32 -1.442695, %v6630_v33 }
 0x31b   : > { %5296 = vpow2.f32 %v4188_v36 }
 0x31c   : > { %5298 = vpow2.f32 %v4189_v37 }
 0x31d   : > { %v1596_v42 = vpop.f32.mrf.mxu2  ;;  %v1609_v43 = vpop.f32.mrf.mxu3 }
 0x31e   : > { %v6634_v44 = vadd.f32 %v1596_v42, %v1395_v38  ;;  %v6636_v45 = vadd.f32 %v1609_v43, %v1396_v39  ;;  %v1572_v46 = vpop.f32.mrf.mxu0  ;;  %v1585_v47 = vpop.f32.mrf.mxu1 }
 0x320   : > { %v4190_v50 = vmul.f32 -1.442695, %v6634_v44  ;;  %v4191_v51 = vmul.f32 -1.442695, %v6636_v45 }
 0x321   : > { %v5297_v52 = vpop.eup %5296 }
 0x322   : > { %v5299_v53 = vpop.eup %5298  ;;  %v1625_v54 = vadd.f32 1.0, %v5297_v52  ;;  %5300 = vpow2.f32 %v4190_v50  ;;  %v5279_v52 = vld [vmem:[#allocation17] ss:$0 sm:$0xff] }
 0x323   : > { %v1626_v55 = vadd.f32 1.0, %v5299_v53  ;;  %5302 = vpow2.f32 %v4191_v51 }
 0x324   : > { %5304 = vrcp.f32 %v1625_v54  ;;  %v1638_v4 = vand.u32 2147483647, %v1625_v54  ;;  %v1640_v5 = vand.u32 2147483648, %v1625_v54  ;;  %vm1634_vm6 = vweird.f32 %v1625_v54 }
 0x325   : > { %5306 = vrcp.f32 %v1626_v55  ;;  %v1598_v56 = vpop.f32.mrf.mxu2  ;;  %v1611_v57 = vpop.f32.mrf.mxu3  ;;  %v1653_v7 = vand.u32 2147483647, %v1626_v55  ;;  %v1655_v8 = vand.u32 2147483648, %v1626_v55  ;;  %vm1649_vm8 = vweird.f32 %v1626_v55 }
 0x326   : > { %v1641_v12 = vor.u32 1.1754944e-38, %v1640_v5  ;;  %vm1639_vm9 = vcmp.eq.f32.partialorder %v1638_v4, 8.507059e+37  ;;  %v4408_v4 = vld [vmem:[#allocation22 + $0xb4] sm:$0xf0]  ;;  %v4414_v5 = vld [vmem:[#allocation22 + $0xb0] sm:$0xf] }
 0x327   : > { %vm1654_vm11 = vcmp.eq.f32.partialorder %v1653_v7, 8.507059e+37  ;;  %v1656_v17 = vor.u32 1.1754944e-38, %v1655_v8 }
 0x328   : > { %v5301_v58 = vpop.eup %5300 }
 0x329   : > { %v5303_v59 = vpop.eup %5302  ;;  %v1627_v60 = vadd.f32 1.0, %v5301_v58 }
 0x32a   : > { %v5305_v61 = vpop.eup %5304  ;;  %v6640_v62 = vadd.f32 1.0, %v5303_v59 }
 0x32b   : > { %v5307_v63 = vpop.eup %5306  ;;  %v1630_v1 = vmul.f32 %v5305_v61, %v1625_v54  ;;  %5308 = vrcp.f32 %v1627_v60  ;;  %vm1635_vm4 = vweird.f32 %v5305_v61  ;;  %v1668_v26 = vand.u32 2147483647, %v1627_v60 }
 0x32c   : > { %v1645_v2 = vmul.f32 %v5307_v63, %v1626_v55  ;;  %5310 = vrcp.f32 %v6640_v62  ;;  %vm1650_vm5 = vweird.f32 %v5307_v63  ;;  %vm1636_vm7 = vmor %vm1634_vm6, %vm1635_vm4  ;;  %v1670_v27 = vand.u32 2147483648, %v1627_v60 }
 0x32d   : > { %v1631_v3 = vsub.f32 1.0, %v1630_v1  ;;  %vm1651_vm10 = vmor %vm1649_vm8, %vm1650_vm5  ;;  %vm1664_vm13 = vweird.f32 %v1627_v60  ;;  %v1683_v34 = vand.u32 2147483647, %v6640_v62  ;;  %v1685_v35 = vand.u32 2147483648, %v6640_v62  ;;  %v4908_v1 = vld [vmem:[#allocation22 + $0xb0] sm:$0xf0] }
 0x32e   : > { %v1646_v22 = vsub.f32 1.0, %v1645_v2  ;;  %vm1669_vm0 = vcmp.eq.f32.partialorder %v1668_v26, 8.507059e+37  ;;  %vm1679_vm1 = vweird.f32 %v6640_v62  ;;  %v4907_v2 = vld [vmem:[#allocation22 + $0xac] sm:$0xf]  ;;  %v4384_v26 = vld [vmem:[#allocation22 + $0x84] sm:$0xf0] }
 0x32f   : > { %v1632_v6 = vmul.f32 %v5305_v61, %v1631_v3  ;;  %v1686_v41 = vor.u32 1.1754944e-38, %v1685_v35  ;;  %vm1684_vm3 = vcmp.eq.f32.partialorder %v1683_v34, 8.507059e+37  ;;  %v4899_v34 = vld [vmem:[#allocation22 + $0x68] sm:$0xf0]  ;;  %v4898_v35 = vld [vmem:[#allocation22 + $0x64] sm:$0xf] }
 0x330   : > { %v1647_v9 = vmul.f32 %v5307_v63, %v1646_v22  ;;  %v4909_v22 = vld [vmem:[#allocation22 + $0xb8] sm:$0xf0]  ;;  %vm2301_vm8 = vcmask 261120  }
 0x331   : > { %v5309_v10 = vpop.eup %5308  ;;  %v1633_v11 = vadd.f32 %v5305_v61, %v1632_v6  ;;  %v4411_v6 = vor.u32 %v4907_v2, %v4408_v4  ;;  %v4415_v7 = vor.u32 %v4909_v22, %v4414_v5  ;;  %v4891_v2 = vld [vmem:[#allocation22 + $0x28] sm:$0xf0]  ;;  %v4322_v5 = vld [vmem:[#allocation22] sm:$0xf] }
 0x332   : > { %v1648_v13 = vadd.f32 %v5307_v63, %v1647_v9  ;;  %v1660_v14 = vmul.f32 %v5309_v10, %v1627_v60  ;;  %v5311_v15 = vpop.eup %5310  ;;  %vm1665_vm12 = vweird.f32 %v5309_v10  ;;  %v4887_v22 = vld [vmem:[#allocation22 + $0x8] sm:$0xf0] }
 0x333   : > { %v1637_v16 = vsel %vm1636_vm7, %v5305_v61, %v1633_v11  ;;  %v1675_v23 = vmul.f32 %v5311_v15, %v6640_v62  ;;  %vm1680_vm14 = vweird.f32 %v5311_v15  ;;  %vm1666_vm15 = vmor %vm1664_vm13, %vm1665_vm12  ;;  %2215 = vmatpush.bf16.msra.mxu1 %v4411_v6  ;;  %2228 = vmatpush.bf16.msra.mxu2 %v4415_v7  ;;  %v4394_v11 = vld [vmem:[#allocation22 + $0x90] sm:$0xf]  ;;  %v4886_v6 = vld [vmem:[#allocation22 + $0x4] sm:$0xf]  ;;  %vm2338_vm7 = vcmask 1043456  }
 0x334   : > { %v1642_v18 = vsel %vm1639_vm9, %v1641_v12, %v1637_v16  ;;  %v1652_v20 = vsel %vm1651_vm10, %v5307_v63, %v1648_v13  ;;  %v1661_v21 = vsub.f32 1.0, %v1660_v14  ;;  %vm1681_vm2 = vmor %vm1679_vm1, %vm1680_vm14  ;;  %v4406_v63 = vld [vmem:[#allocation22 + $0xa8] sm:$0xf]  ;;  %v4905_v12 = vld [vmem:[#allocation22 + $0x98] sm:$0xf0]  ;;  %vm2321_vm9 = vcmask 64512  }
 0x335   : > { %v1689_v24 = vmul.f32 %v1642_v18, %v6628_v32  ;;  %v1657_v25 = vsel %vm1654_vm11, %v1656_v17, %v1652_v20  ;;  %v1676_v30 = vsub.f32 1.0, %v1675_v23  ;;  %v1671_v32 = vor.u32 1.1754944e-38, %v1670_v27  ;;  %v4904_v13 = vld [vmem:[#allocation22 + $0x94] sm:$0xf]  ;;  %v4402_v16 = vld [vmem:[#allocation22 + $0x98] sm:$0xf] }
 0x336   : > { %v1690_v28 = vmul.f32 %v1657_v25, %v6630_v33  ;;  %v1662_v29 = vmul.f32 %v5309_v10, %v1661_v21  ;;  %v4407_v3 = vor.u32 %v4908_v1, %v4406_v63  ;;  %v4395_v14 = vor.u32 %v4905_v12, %v4394_v11  ;;  %v4906_v17 = vld [vmem:[#allocation22 + $0xa0] sm:$0xf0]  ;;  %v4382_v21 = vld [vmem:[#allocation22 + $0x78] sm:$0xf]  ;;  %v4390_v27 = vld [vmem:[#allocation22 + $0x80] sm:$0xf] }
 0x337   : > { %v1757_v31 = vpack.c.bf16 %v1689_v24, %v1689_v24  ;;  %v1677_v38 = vmul.f32 %v5311_v15, %v1676_v30  ;;  %v4403_v20 = vor.u32 %v4906_v17, %v4402_v16  ;;  %v4902_v23 = vld [vmem:[#allocation22 + $0x80] sm:$0xf0]  ;;  %v4901_v24 = vld [vmem:[#allocation22 + $0x7c] sm:$0xf]  ;;  %v4336_v63 = vld [vmem:[#allocation22 + $0x24] sm:$0xf0] }
 0x338   : > { %v1758_v36 = vpack.c.bf16 %v1690_v28, %v1690_v28  ;;  %v1663_v37 = vadd.f32 %v5309_v10, %v1662_v29  ;;  %2202 = vmatpush.bf16.msra.mxu0 %v4407_v3  ;;  %v4383_v25 = vor.u32 %v4902_v23, %v4382_v21  ;;  %v4903_v28 = vld [vmem:[#allocation22 + $0x88] sm:$0xf0]  ;;  %v4387_v29 = vor.u32 %v4901_v24, %v4384_v26  ;;  %v4342_v1 = vld [vmem:[#allocation22 + $0x20] sm:$0xf]  ;;  %v4324_v7 = vld [vmem:[#allocation22 + $0xc] sm:$0xf0] }
 0x339   : > { %1965 = vmatmul.bf16.vlgmr.msrb.gmra.mxu0 %v1757_v31  ;;  %v1678_v40 = vadd.f32 %v5311_v15, %v1677_v38  ;;  %2229 = vmatpush.bf16.msra.mxu2 %v4403_v20  ;;  %v4391_v30 = vor.u32 %v4903_v28, %v4390_v27  ;;  %v4370_v31 = vld [vmem:[#allocation22 + $0x60] sm:$0xf]  ;;  %v4378_v38 = vld [vmem:[#allocation22 + $0x68] sm:$0xf]  ;;  %v4343_v4 = vor.u32 %v4891_v2, %v4342_v1  ;;  %v1301_v16 = vld [vmem:[#allocation8 + $0x60] sm:$0xff]  ;;  %vm2828_vm1 = vcmask 1040384  }
 0x33a   : > { %v1667_v39 = vsel %vm1666_vm15, %v5309_v10, %v1663_v37  ;;  %1978 = vmatmul.bf16.vlgmr.msrb.gmra.mxu1 %v1758_v36  ;;  %v4371_v36 = vor.u32 %v4899_v34, %v4370_v31  ;;  %v4372_v37 = vld [vmem:[#allocation22 + $0x6c] sm:$0xf0]  ;;  %v4327_v11 = vor.u32 %v4886_v6, %v4324_v7  ;;  %v1302_v20 = vld [vmem:[#allocation8 + $0x68] sm:$0xff]  ;;  %v1299_v24 = vld [vmem:[#allocation8 + $0x50] sm:$0xff] }
 0x33b   : > { %v1672_v33 = vsel %vm1669_vm0, %v1671_v32, %v1667_v39  ;;  %v1682_v43 = vsel %vm1681_vm2, %v5311_v15, %v1678_v40  ;;  %v4396_v15 = vld [vmem:[#allocation22 + $0x9c] sm:$0xf0]  ;;  %v4900_v32 = vld [vmem:[#allocation22 + $0x70] sm:$0xf0]  ;;  %v4375_v39 = vor.u32 %v4898_v35, %v4372_v37  ;;  %v2249_v23 = vpack.c.bf16 %v1302_v20, %v1301_v16  ;;  %v1295_v34 = vld [vmem:[#allocation8 + $0x30] sm:$0xff] }
 0x33c   : > { %v1691_v42 = vmul.f32 %v1672_v33, %v6634_v44  ;;  %v1687_v46 = vsel %vm1684_vm3, %v1686_v41, %v1682_v43  ;;  %v4399_v18 = vor.u32 %v4904_v13, %v4396_v15  ;;  %2203 = vmatpush.bf16.msra.mxu0 %v4395_v14  ;;  %v4379_v40 = vor.u32 %v4900_v32, %v4378_v38  ;;  %v4358_v33 = vld [vmem:[#allocation22 + $0x48] sm:$0xf]  ;;  %v4896_v41 = vld [vmem:[#allocation22 + $0x50] sm:$0xf0]  ;;  %v1298_v28 = vld [vmem:[#allocation8 + $0x48] sm:$0xff] }
 0x33d   : > { %v1692_v48 = vmul.f32 %v1687_v46, %v6636_v45  ;;  %2230 = vmatpush.bf16.msra.mxu2 %v4391_v30  ;;  %v4359_v43 = vor.u32 %v4896_v41, %v4358_v33  ;;  %v4360_v46 = vld [vmem:[#allocation22 + $0x54] sm:$0xf0]  ;;  %v1303_v14 = vld [vmem:[#allocation8 + $0x70] sm:$0xff]  ;;  %v1304_v15 = vld [vmem:[#allocation8 + $0x78] sm:$0xff]  ;;  %vm2832_vm2 = vcmask 1046528  }
 0x33e   : > { %v1759_v47 = vpack.c.bf16 %v1691_v42, %v1691_v42  ;;  %2216 = vmatpush.bf16.msra.mxu1 %v4399_v18  ;;  %v4895_v42 = vld [vmem:[#allocation22 + $0x4c] sm:$0xf]  ;;  %v2250_v18 = vpack.c.bf16 %v1304_v15, %v1303_v14  ;;  %v1297_v27 = vld [vmem:[#allocation8 + $0x40] sm:$0xff]  ;;  %v4910_v20 = vld [vmem:[#allocation23] sm:$0xff] }
 0x33f   : > { %v1760_v49 = vpack.c.bf16 %v1692_v48, %v1692_v48  ;;  %v4897_v48 = vld [vmem:[#allocation22 + $0x58] sm:$0xf0]  ;;  %v2247_v30 = vpack.c.bf16 %v1298_v28, %v1297_v27  ;;  %v1296_v35 = vld [vmem:[#allocation8 + $0x38] sm:$0xff]  ;;  %v1287_v2 = vld [vmem:[#allocation5] sm:$0xff] }
 0x340   : > { %1991 = vmatmul.bf16.vlgmr.msrb.gmra.mxu2 %v1759_v47  ;;  %2204 = vmatpush.bf16.msra.mxu0 %v4383_v25  ;;  %v4366_v47 = vld [vmem:[#allocation22 + $0x50] sm:$0xf]  ;;  %v2246_v37 = vpack.c.bf16 %v1296_v35, %v1295_v34  ;;  %v1293_v32 = vld [vmem:[#allocation8 + $0x20] sm:$0xff]  ;;  %v4911_v16 = vld [vmem:[#allocation23 + $0x8] sm:$0xff] }
 0x341   : > { %2004 = vmatmul.bf16.vlgmr.msrb.gmra.mxu3 %v1760_v49  ;;  %2231 = vmatpush.bf16.msra.mxu2 %v4379_v40  ;;  %v4363_v49 = vor.u32 %v4895_v42, %v4360_v46  ;;  %v1300_v25 = vld [vmem:[#allocation8 + $0x58] sm:$0xff]  ;;  %v1291_v42 = vld [vmem:[#allocation8 + $0x10] sm:$0xff]  ;;  %v5280_v46 = vld [vmem:[#allocation19] ss:$0 sm:$0xff] }
 0x342   : > { %2217 = vmatpush.bf16.msra.mxu1 %v4387_v29  ;;  %2251 = vmatpush.bf16.msra.mxu3 %v2250_v18  ;;  %v2248_v26 = vpack.c.bf16 %v1300_v25, %v1299_v24 }
 0x344   : > { %2205 = vmatpush.bf16.msra.mxu0 %v4371_v36 }
 0x346   : > { %2218 = vmatpush.bf16.msra.mxu1 %v4375_v39  ;;  %2252 = vmatpush.bf16.msra.mxu3 %v2249_v23  ;;  %v1294_v39 = vld [vmem:[#allocation8 + $0x28] sm:$0xff] }
 0x347   : > { %v2245_v33 = vpack.c.bf16 %v1294_v39, %v1293_v32 }
 0x348   : > { %2206 = vmatpush.bf16.msra.mxu0 %v4359_v43  ;;  %v1292_v43 = vld [vmem:[#allocation8 + $0x18] sm:$0xff] }
 0x34a   : > { %2219 = vmatpush.bf16.msra.mxu1 %v4363_v49  ;;  %2253 = vmatpush.bf16.msra.mxu3 %v2248_v26  ;;  %v5281_v49 = vld [vmem:[#allocation20] ss:$0 sm:$0xff] }
 0x34e   : > { %2254 = vmatpush.bf16.msra.mxu3 %v2247_v30 }
 0x352   : > { %2255 = vmatpush.bf16.msra.mxu3 %v2246_v37 }
 0x356   : > { %2256 = vmatpush.bf16.msra.mxu3 %v2245_v33 }
 0x3b6   : > { %v1966_v50 = vpop.f32.mrf.mxu0 }
 0x3b7   : > { %v1979_v51 = vpop.f32.mrf.mxu1  ;;  %v1967_v53 = vadd.f32 %v5279_v52, %v1966_v50  ;;  %v4367_v50 = vor.u32 %v4897_v48, %v4366_v47  ;;  %v4893_v52 = vld [vmem:[#allocation22 + $0x38] sm:$0xf0] }
 0x3b9   : > { %v1980_v56 = vadd.f32 %v1979_v51, %v1967_v53  ;;  %2232 = vmatpush.bf16.msra.mxu2 %v4367_v50  ;;  %v4346_v51 = vld [vmem:[#allocation22 + $0x30] sm:$0xf]  ;;  %v4892_v53 = vld [vmem:[#allocation22 + $0x34] sm:$0xf]  ;;  %v2244_v50 = vpack.c.bf16 %v1292_v43, %v1291_v42 }
 0x3bb   : > { %2257 = vmatpush.bf16.msra.mxu3 %v2244_v50 }
 0x3be   : > { %v1968_v54 = vpop.f32.mrf.mxu0 }
 0x3bf   : > { %v1981_v55 = vpop.f32.mrf.mxu1  ;;  %v4347_v54 = vor.u32 %v4893_v52, %v4346_v51 }
 0x3c0   : > { %v4348_v55 = vld [vmem:[#allocation22 + $0x3c] sm:$0xf0] }
 0x3c1   : > { %2207 = vmatpush.bf16.msra.mxu0 %v4347_v54  ;;  %v1289_v54 = vld [vmem:[#allocation8] sm:$0xff] }
 0x3c3   : > { %v1992_v57 = vpop.f32.mrf.mxu2 }
 0x3c4   : > { %v1993_v58 = vadd.f32 %v1992_v57, %v1980_v56  ;;  %v2005_v59 = vpop.f32.mrf.mxu3  ;;  %v4354_v56 = vld [vmem:[#allocation22 + $0x38] sm:$0xf]  ;;  %v4894_v57 = vld [vmem:[#allocation22 + $0x40] sm:$0xf0] }
 0x3c6   : > { %v2006_v44 = vadd.f32 %v2005_v59, %v1993_v58  ;;  %v4351_v58 = vor.u32 %v4892_v53, %v4348_v55  ;;  %v4355_v59 = vor.u32 %v4894_v57, %v4354_v56  ;;  %v1290_v55 = vld [vmem:[#allocation8 + $0x8] sm:$0xff] }
 0x3c7   : > { %v2243_v56 = vpack.c.bf16 %v1290_v55, %v1289_v54 }
 0x3c8   : > { %v2009_v60 = vadd.f32 %v2006_v44, %v6614_v0  ;;  %v4334_v44 = vld [vmem:[#allocation22 + $0x18] sm:$0xf]  ;;  %2220 = vmatpush.bf16.msra.mxu1 %v4351_v58  ;;  %2233 = vmatpush.bf16.msra.mxu2 %v4355_v59 }
 0x3c9   : > { %2258 = vmatpush.bf16.msra.mxu3 %v2243_v56 }
 0x3ca   : > { %v6653_v61 = vadd.f32 %v2009_v60, %v6614_v0  ;;  %v4890_v60 = vld [vmem:[#allocation22 + $0x20] sm:$0xf0] }
 0x3cb   : > { %v1994_v45 = vpop.f32.mrf.mxu2 }
 0x3cc   : > { %2013 = vadd.xlane.f32.xlu1 %v6653_v61  ;;  %v2007_v62 = vpop.f32.mrf.mxu3  ;;  %v4889_v45 = vld [vmem:[#allocation22 + $0x1c] sm:$0xf]  ;;  %2234 = vmatpush.bf16.msra.mxu2 %v4343_v4 }
 0x3cd   : > { %v4335_v62 = vor.u32 %v4890_v60, %v4334_v44  ;;  %v4339_v3 = vor.u32 %v4889_v45, %v4336_v63 }
 0x3cf   : > { %2208 = vmatpush.bf16.msra.mxu0 %v4335_v62  ;;  %2221 = vmatpush.bf16.msra.mxu1 %v4339_v3  ;;  %v1288_v3 = vld [vmem:[#allocation7] sm:$0xff] }
 0x3d3   : > { %2222 = vmatpush.bf16.msra.mxu1 %v4327_v11 }
 0x43f   : > { %v2014_v8 = vpop.xlane.xlu1 %2013 }
 0x440   : > { %v2015_v0 = vmul.f32 %v2014_v8, %v6617_v19  ;;  %v4330_v8 = vld [vmem:[#allocation22 + $0x8] sm:$0xf] }
 0x442   : > { %v6658_v9 = vsub.f32 %v6653_v61, %v2015_v0  ;;  %v4888_v0 = vld [vmem:[#allocation22 + $0x10] sm:$0xf0] }
 0x443   : > { %v4331_v12 = vor.u32 %v4888_v0, %v4330_v8 }
 0x444   : > { %v2017_v10 = vmul.f32 %v6658_v9, %v6658_v9 }
 0x445   : > { %2235 = vmatpush.bf16.msra.mxu2 %v4331_v12 }
 0x446   : > { %2018 = vadd.xlane.f32.xlu1 %v2017_v10  ;;  %v4323_v10 = vor.u32 %v4887_v22, %v4322_v5 }
 0x448   : > { %2209 = vmatpush.bf16.msra.mxu0 %v4323_v10 }
 0x44c   : > { %2268 = vmatpush.bf16.msrb.mxu0 %v2250_v18 }
 0x450   : > { %2269 = vmatpush.bf16.msrb.mxu0 %v2249_v23 }
 0x454   : > { %2270 = vmatpush.bf16.msrb.mxu0 %v2248_v26 }
 0x458   : > { %2271 = vmatpush.bf16.msrb.mxu0 %v2247_v30 }
 0x45c   : > { %2272 = vmatpush.bf16.msrb.mxu0 %v2246_v37 }
 0x460   : > { %2273 = vmatpush.bf16.msrb.mxu0 %v2245_v33 }
 0x464   : > { %2274 = vmatpush.bf16.msrb.mxu0 %v2244_v50 }
 0x468   : > { %2275 = vmatpush.bf16.msrb.mxu0 %v2243_v56 }
 0x4b9   : > { %v2019_v13 = vpop.xlane.xlu1 %2018 }
 0x4ba   : > { %v2020_v17 = vmul.f32 %v2019_v13, %v6617_v19 }
 0x4bc   : > { %v2021_v21 = vadd.f32 1e-05, %v2020_v17 }
 0x4be   : > { %5312 = vrsqrt.f32 %v2021_v21  ;;  %vm2028_vm5 = vweird.f32 %v2021_v21 }
 0x4c4   : > { %v5313_v29 = vpop.eup %5312 }
 0x4c5   : > { %v2023_v31 = vmul.f32 %v5313_v29, %v2021_v21  ;;  %vm2029_vm4 = vweird.f32 %v5313_v29 }
 0x4c6   : > { %vm2030_vm6 = vmor %vm2028_vm5, %vm2029_vm4 }
 0x4c7   : > { %v2024_v36 = vmul.f32 %v5313_v29, %v2023_v31 }
 0x4c9   : > { %v2025_v38 = vmul.f32 0.5, %v2024_v36 }
 0x4cb   : > { %v2026_v40 = vsub.f32 1.5, %v2025_v38 }
 0x4cd   : > { %v2027_v41 = vmul.f32 %v5313_v29, %v2026_v40 }
 0x4cf   : > { %v2031_v47 = vsel %vm2030_vm6, %v5313_v29, %v2027_v41 }
 0x4d0   : > { %v2032_v48 = vmul.f32 %v2031_v47, %v6658_v9 }
 0x4d2   : > { %v2036_v51 = vmul.f32 %v5280_v46, %v2032_v48 }
 0x4d4   : > { %v2040_v52 = vadd.f32 %v5281_v49, %v2036_v51 }
 0x4d6   : > { %v2073_v53 = vpack.c.bf16 %v2040_v52, %v2040_v52 }
 0x4d8   : > { %2210 = vmatmul.bf16.vlgmr.msra.gmra.mxu0 %v2073_v53  ;;  %2223 = vmatmul.bf16.vlgmr.msra.gmra.mxu1 %v2073_v53 }
 0x4d9   : > { %2236 = vmatmul.bf16.vlgmr.msra.gmra.mxu2 %v2073_v53 }
 0x555   : > { %v2211_v57 = vpop.f32.mrf.mxu0  ;;  %v2224_v58 = vpop.f32.mrf.mxu1 }
 0x556   : > { %v2242_v9 = vpack.c.bf16 %v2211_v57, %v2211_v57  ;;  %v2267_v59 = vpack.c.bf16 %v2224_v58, %v2224_v58  ;;  %v2266_v5 = vmul.f32 %v2224_v58, %v1287_v2  ;;  %v2241_v0 = vmul.f32 %v2211_v57, %v1287_v2  ;;  %v4913_v2 = vld [vmem:[#allocation23 + $0x18] sm:$0xff] }
 0x558   : > { %2259 = vmatmul.bf16.vlgmr.msra.gmra.mxu3 %v2242_v9  ;;  %2276 = vmatmul.bf16.vlgmr.msrb.gmra.mxu0 %v2267_v59 }
 0x55c   : > { %v2237_v44 = vpop.f32.mrf.mxu2 }
 0x55d   : > { %v6664_v60 = vpack.c.bf16 %v2237_v44, %v2237_v44  ;;  %v2213_v45 = vpop.f32.mrf.mxu0  ;;  %v2226_v62 = vpop.f32.mrf.mxu1 }
 0x55f   : > { %v2340_v63 = vsel %vm2338_vm7, %v6664_v60, 0 }
 0x560   : > { %2349 = vmatpush.bf16.msrb.mxu2 %v2340_v63 }
 0x564   : > { %v2239_v1 = vpop.f32.mrf.mxu2  ;;  %2437 = vmatpush.bf16.msra.mxu2 %v4913_v2 }
 0x5d5   : > { %v2277_v4 = vpop.f32.mrf.mxu0 }
 0x5d6   : > { %v2281_v22 = vmul.f32 %v2277_v4, %v1288_v3 }
 0x5d8   : > { %v2282_v6 = vadd.f32 %v2281_v22, %v2266_v5 }
 0x5da   : > { %v2300_v7 = vpack.c.bf16 %v2282_v6, %v2282_v6 }
 0x5db   : > { %v2260_v8 = vpop.f32.mrf.mxu3 }
 0x5dc   : > { %v2264_v10 = vmul.f32 %v2260_v8, %v1288_v3  ;;  %2360 = vrot.lane.b32.xlu0 %v2300_v7, %s6095_s9  ;;  %v2306_v11 = vsel %vm2301_vm8, %v2300_v7, 0 }
 0x5dd   : > { %v2279_v12 = vpop.f32.mrf.mxu0  ;;  %2315 = vmatpush.bf16.xpose.msrb.mxu1 %v2306_v11  ;;  %v4912_v11 = vld [vmem:[#allocation23 + $0x10] sm:$0xff] }
 0x5de   : > { %v2265_v13 = vadd.f32 %v2264_v10, %v2241_v0  ;;  %2438 = vmatpush.bf16.msra.mxu2 %v4912_v11  ;;  %v4927_v11 = vld [vmem:[#allocation26 + $0x44] sm:$0xf0] }
 0x5e0   : > { %v2299_v14 = vpack.c.bf16 %v2265_v13, %v2265_v13 }
 0x5e2   : > { %2357 = vrot.lane.b32.xlu1 %v2299_v14, %s6095_s9 }
 0x5e3   : > { %v2262_v15 = vpop.f32.mrf.mxu3 }
 0x5e4   : > { %2560 = vrot.lane.b32.xlu0 %v2300_v7, %s6096_s7  ;;  %4416 = vmatmul.msk.bf16.vlgmr.msrb.gmra.mxu1 %vm2301_vm8, %v2299_v14 }
 0x5ea   : > { %2558 = vrot.lane.b32.xlu1 %v2299_v14, %s6096_s7 }
 0x64e   : > { %v2361_v17 = vpop.permute.xlu0 %2360 }
 0x64f   : > { %v2366_v18 = vsel %vm2301_vm8, %v2361_v17, 0 }
 0x650   : > { %2375 = vmatpush.bf16.xpose.msrb.mxu3 %v2366_v18 }
 0x654   : > { %v2358_v21 = vpop.permute.xlu1 %2357 }
 0x656   : > { %v2561_v23 = vpop.permute.xlu0 %2560 }
 0x657   : > { %v2566_v24 = vsel %vm2301_vm8, %v2561_v23, 0  ;;  %4418 = vmatmul.msk.bf16.vlgmr.msrb.gmra.mxu3 %vm2301_vm8, %v2358_v21 }
 0x658   : > { %2465 = vmatpush.bf16.msra.mxu3 %v4911_v16 }
 0x65c   : > { %2466 = vmatpush.bf16.msra.mxu3 %v4910_v20  ;;  %v2559_v56 = vpop.permute.xlu1 %2558 }
 0x660   : > { %2575 = vmatpush.bf16.xpose.msrb.mxu3 %v2566_v24 }
 0x661   : > { %v2317_v25 = vpop.f32.mrf.mxu1 }
 0x662   : > { %v2322_v26 = vsel %vm2321_vm9, %v2317_v25, -inf }
 0x663   : > { %2323 = vmax.xlane.f32.xlu2 %v2322_v26  ;;  %v4915_v26 = vld [vmem:[#allocation23 + $0x28] sm:$0xff] }
 0x669   : > { %v2319_v27 = vpop.f32.mrf.mxu1 }
 0x66a   : > { %v4914_v27 = vld [vmem:[#allocation23 + $0x20] sm:$0xff] }
 0x6d6   : > { %v2324_v28 = vpop.xlane.xlu2 %2323 }
 0x6d7   : > { %v2325_v29 = vsub.f32 %v2317_v25, %v2324_v28 }
 0x6d9   : > { %v2326_v30 = vmul.f32 1.442695, %v2325_v29  ;;  %v4917_v29 = vld [vmem:[#allocation23 + $0x38] sm:$0xff] }
 0x6da   : > { %v2377_v31 = vpop.f32.mrf.mxu3 }
 0x6db   : > { %5314 = vpow2.f32 %v2326_v30  ;;  %v2381_v34 = vsel %vm2321_vm9, %v2377_v31, -inf }
 0x6dc   : > { %2382 = vmax.xlane.f32.xlu0 %v2381_v34 }
 0x6e1   : > { %v5315_v35 = vpop.eup %5314 }
 0x6e2   : > { %v2379_v36 = vpop.f32.mrf.mxu3  ;;  %v2328_v37 = vsel %vm2321_vm9, %v5315_v35, 0.0 }
 0x6e3   : > { %2329 = vadd.xlane.f32.xlu2 %v2328_v37 }
 0x6fb   : > { %2474 = vrot.lane.b32.xlu2 %v2300_v7, %s6097_s16 }
 0x703   : > { %2472 = vrot.lane.b32.xlu2 %v2299_v14, %s6097_s16 }
 0x74f   : > { %v2383_v38 = vpop.xlane.xlu0 %2382 }
 0x750   : > { %v2384_v32 = vsub.f32 %v2377_v31, %v2383_v38 }
 0x752   : > { %v2385_v39 = vmul.f32 1.442695, %v2384_v32 }
 0x754   : > { %5316 = vpow2.f32 %v2385_v39 }
 0x756   : > { %v2330_v40 = vpop.xlane.xlu2 %2329 }
 0x757   : > { %5318 = vrcp.f32 %v2330_v40  ;;  %v4916_v40 = vld [vmem:[#allocation23 + $0x30] sm:$0xff] }
 0x75a   : > { %v5317_v33 = vpop.eup %5316 }
 0x75b   : > { %v2387_v41 = vsel %vm2321_vm9, %v5317_v33, 0.0 }
 0x75c   : > { %2388 = vadd.xlane.f32.xlu0 %v2387_v41 }
 0x75d   : > { %v5319_v42 = vpop.eup %5318 }
 0x75e   : > { %v2332_v43 = vmul.f32 %v5319_v42, %v5315_v35  ;;  %v2475_v46 = vpop.permute.xlu2 %2474 }
 0x75f   : > { %v2480_v47 = vsel %vm2301_vm8, %v2475_v46, 0 }
 0x760   : > { %v2333_v48 = vpack.c.bf16 %v2332_v43, %v2332_v43  ;;  %2489 = vmatpush.bf16.xpose.msra.mxu0 %v2480_v47 }
 0x762   : > { %4417 = vmatmul.msk.bf16.vlgmr.msrb.gmra.mxu2 %vm2321_vm9, %v2333_v48 }
 0x763   : > { %2550 = vmatpush.bf16.msrb.mxu2 %v4915_v26  ;;  %v4922_v26 = vld [vmem:[#allocation26 + $0x24] sm:$0xf] }
 0x766   : > { %v2473_v49 = vpop.permute.xlu2 %2472 }
 0x767   : > { %4438 = vmatmul.msk.bf16.vlgmr.msra.gmra.mxu0 %vm2301_vm8, %v2473_v49  ;;  %2551 = vmatpush.bf16.msrb.mxu2 %v4914_v27 }
 0x770   : > { %2507 = vrot.lane.b32.xlu0 %v6664_v60, %s6097_s16  ;;  %s6927_s16 = sld [smem:[#allocation68_spill]] }
 0x7cf   : > { %v2389_v57 = vpop.xlane.xlu0 %2388 }
 0x7d0   : > { %5320 = vrcp.f32 %v2389_v57 }
 0x7d6   : > { %v5321_v9 = vpop.eup %5320 }
 0x7d7   : > { %v2391_v59 = vmul.f32 %v5321_v9, %v5317_v33 }
 0x7d9   : > { %v2392_v1 = vpack.c.bf16 %v2391_v59, %v2391_v59 }
 0x7e2   : > { %v2508_v44 = vpop.permute.xlu0 %2507 }
 0x7e3   : > { %v2513_v63 = vsel %vm2338_vm7, %v2508_v44, 0 }
 0x7e4   : > { %v2491_v50 = vpop.f32.mrf.mxu0 }
 0x7e5   : > { %v2351_v51 = vpop.f32.mrf.mxu2  ;;  %v2495_v52 = vsel %vm2321_vm9, %v2491_v50, -inf }
 0x7e6   : > { %v2355_v53 = vpack.c.bf16 %v2351_v51, %v2351_v51  ;;  %2496 = vmax.xlane.f32.xlu2 %v2495_v52 }
 0x7e8   : > { %4437 = vmatmul.msk.bf16.vlgmr.msra.gmra.mxu3 %vm2301_vm8, %v2355_v53 }
 0x7ec   : > { %v2493_v54 = vpop.f32.mrf.mxu0 }
 0x7ed   : > { %v2353_v55 = vpop.f32.mrf.mxu2  ;;  %v4518_v54 = vld [vmem:[#allocation26 + $0x70] sm:$0xf] }
 0x7ee   : > { %v4933_v55 = vld [vmem:[#allocation26 + $0x74] sm:$0xf0] }
 0x7ef   : > { %v4519_v57 = vor.u32 %v4933_v55, %v4518_v54 }
 0x7f8   : > { %4449 = vmatmul.msk.bf16.vlgmr.msrb.gmra.mxu3 %vm2301_vm8, %v2559_v56  ;;  %v4932_v56 = vld [vmem:[#allocation26 + $0x74] sm:$0xf] }
 0x7fe   : > { %2394 = vrot.lane.b32.xlu2 %v6664_v60, %s6095_s9  ;;  %s6921_s9 = sld [smem:[#allocation65_spill]] }
 0x859   : > { %v2497_v58 = vpop.xlane.xlu2 %2496 }
 0x85a   : > { %v2498_v4 = vsub.f32 %v2491_v50, %v2497_v58  ;;  %v4520_v58 = vld [vmem:[#allocation26 + $0x78] sm:$0xf0] }
 0x85b   : > { %v4523_v9 = vor.u32 %v4932_v56, %v4520_v58  ;;  %v5283_v56 = vld [vmem:[%s6913_s22] ss:$0 sm:$0xff]  ;;  %s6928_s22 = sld [smem:[#allocation70_spill]] }
 0x85c   : > { %v2499_v22 = vmul.f32 1.442695, %v2498_v4 }
 0x85d   : > { %2792 = vmatpush.bf16.msra.mxu3 %v4523_v9 }
 0x85e   : > { %5322 = vpow2.f32 %v2499_v22  ;;  %v4929_v22 = vld [vmem:[#allocation26 + $0x54] sm:$0xf0] }
 0x861   : > { %v2395_v45 = vpop.permute.xlu2 %2394 }
 0x862   : > { %v2400_v62 = vsel %vm2338_vm7, %v2395_v45, 0 }
 0x863   : > { %2409 = vmatpush.bf16.msra.mxu1 %v2400_v62  ;;  %v4510_v62 = vld [vmem:[#allocation26 + $0x60] sm:$0xf] }
 0x864   : > { %v5323_v8 = vpop.eup %5322 }
 0x865   : > { %v2501_v10 = vsel %vm2321_vm9, %v5323_v8, 0.0 }
 0x866   : > { %4419 = vmatmul.msk.bf16.vlgmr.msra.gmra.mxu1 %vm2321_vm9, %v2392_v1  ;;  %v4930_v1 = vld [vmem:[#allocation26 + $0x64] sm:$0xf] }
 0x867   : > { %2522 = vmatpush.bf16.msrb.mxu1 %v2513_v63  ;;  %v4931_v63 = vld [vmem:[#allocation26 + $0x64] sm:$0xf0] }
 0x868   : > { %v4511_v2 = vor.u32 %v4931_v63, %v4510_v62  ;;  %v1320_v62 = vld [vmem:[#allocation10 + $0x78] sm:$0xff]  ;;  %v1317_v63 = vld [vmem:[#allocation10 + $0x60] sm:$0xff] }
 0x86b   : > { %v2468_v3 = vpop.f32.mrf.mxu3  ;;  %2636 = vmatpush.bf16.msra.mxu1 %v4917_v29 }
 0x86f   : > { %2637 = vmatpush.bf16.msra.mxu1 %v4916_v40 }
 0x873   : > { %v2470_v5 = vpop.f32.mrf.mxu3 }
 0x874   : > { %v4502_v5 = vld [vmem:[#allocation26 + $0x50] sm:$0xf] }
 0x87b   : > { %v2577_v6 = vpop.f32.mrf.mxu3 }
 0x87c   : > { %v2581_v7 = vsel %vm2321_vm9, %v2577_v6, -inf }
 0x87d   : > { %2582 = vmax.xlane.f32.xlu1 %v2581_v7  ;;  %v4503_v7 = vor.u32 %v4929_v22, %v4502_v5 }
 0x883   : > { %v2579_v0 = vpop.f32.mrf.mxu3 }
 0x885   : > { %2502 = vadd.xlane.f32.xlu1 %v2501_v10  ;;  %v4494_v10 = vld [vmem:[#allocation26 + $0x40] sm:$0xf] }
 0x8e3   : > { %v2411_v12 = vpop.f32.mrf.mxu1 }
 0x8e4   : > { %v2415_v13 = vpack.c.bf16 %v2411_v12, %v2411_v12  ;;  %v4926_v12 = vld [vmem:[#allocation26 + $0x44] sm:$0xf] }
 0x8e6   : > { %4428 = vmatmul.msk.bf16.vlgmr.msra.gmra.mxu2 %vm2301_vm8, %v2415_v13  ;;  %v4495_v13 = vor.u32 %v4927_v11, %v4494_v10  ;;  %v1314_v10 = vld [vmem:[#allocation10 + $0x48] sm:$0xff] }
 0x8e7   : > { %2779 = vmatpush.bf16.msra.mxu2 %v4519_v57 }
 0x8eb   : > { %v2413_v14 = vpop.f32.mrf.mxu1  ;;  %2780 = vmatpush.bf16.msra.mxu2 %v4511_v2  ;;  %v1318_v2 = vld [vmem:[#allocation10 + $0x68] sm:$0xff] }
 0x8ec   : > { %v4496_v14 = vld [vmem:[#allocation26 + $0x48] sm:$0xf0]  ;;  %v2884_v5 = vpack.c.bf16 %v1318_v2, %v1317_v63 }
 0x8ef   : > { %2781 = vmatpush.bf16.msra.mxu2 %v4503_v7 }
 0x8f0   : > { %v2583_v15 = vpop.xlane.xlu1 %2582 }
 0x8f1   : > { %v2584_v16 = vsub.f32 %v2577_v6, %v2583_v15  ;;  %v4928_v6 = vld [vmem:[#allocation26 + $0x54] sm:$0xf]  ;;  %v4499_v15 = vor.u32 %v4926_v12, %v4496_v14  ;;  %v1311_v14 = vld [vmem:[#allocation10 + $0x30] sm:$0xff] }
 0x8f3   : > { %v2585_v17 = vmul.f32 1.442695, %v2584_v16  ;;  %2782 = vmatpush.bf16.msra.mxu2 %v4495_v13  ;;  %v4486_v16 = vld [vmem:[#allocation26 + $0x30] sm:$0xf] }
 0x8f5   : > { %5324 = vpow2.f32 %v2585_v17  ;;  %v4925_v17 = vld [vmem:[#allocation26 + $0x34] sm:$0xf0] }
 0x8f8   : > { %v2503_v18 = vpop.xlane.xlu1 %2502 }
 0x8f9   : > { %5326 = vrcp.f32 %v2503_v18  ;;  %v4924_v18 = vld [vmem:[#allocation26 + $0x34] sm:$0xf] }
 0x8fb   : > { %v5325_v20 = vpop.eup %5324 }
 0x8fc   : > { %v2587_v21 = vsel %vm2321_vm9, %v5325_v20, 0.0 }
 0x8fd   : > { %2588 = vadd.xlane.f32.xlu1 %v2587_v21  ;;  %v4488_v21 = vld [vmem:[#allocation26 + $0x38] sm:$0xf0] }
 0x8ff   : > { %v5327_v23 = vpop.eup %5326 }
 0x900   : > { %v2505_v24 = vmul.f32 %v5327_v23, %v5323_v8  ;;  %v4504_v8 = vld [vmem:[#allocation26 + $0x58] sm:$0xf0]  ;;  %v4491_v23 = vor.u32 %v4924_v18, %v4488_v21 }
 0x901   : > { %v4507_v0 = vor.u32 %v4928_v6, %v4504_v8  ;;  %v1315_v6 = vld [vmem:[#allocation10 + $0x50] sm:$0xff]  ;;  %v1310_v21 = vld [vmem:[#allocation10 + $0x28] sm:$0xff] }
 0x902   : > { %v2506_v25 = vpack.c.bf16 %v2505_v24, %v2505_v24  ;;  %v4478_v24 = vld [vmem:[#allocation26 + $0x20] sm:$0xf] }
 0x904   : > { %4439 = vmatmul.msk.bf16.vlgmr.msrb.gmra.mxu1 %vm2321_vm9, %v2506_v25  ;;  %v4923_v25 = vld [vmem:[#allocation26 + $0x24] sm:$0xf0] }
 0x905   : > { %v4479_v27 = vor.u32 %v4923_v25, %v4478_v24  ;;  %v1307_v24 = vld [vmem:[#allocation10 + $0x10] sm:$0xff]  ;;  %v1308_v25 = vld [vmem:[#allocation10 + $0x18] sm:$0xff] }
 0x916   : > { %2593 = vrot.lane.b32.xlu1 %v6664_v60, %s6096_s7  ;;  %s6926_s7 = sld [smem:[#allocation67_spill]] }
 0x969   : > { %v2440_v28 = vpop.f32.mrf.mxu2 }
 0x96a   : > { %v2469_v33 = vadd.f32 %v2468_v3, %v2440_v28  ;;  %v4512_v3 = vld [vmem:[#allocation26 + $0x68] sm:$0xf0] }
 0x96b   : > { %v4515_v4 = vor.u32 %v4930_v1, %v4512_v3  ;;  %v4480_v28 = vld [vmem:[#allocation26 + $0x28] sm:$0xf0] }
 0x96c   : > { %v4483_v29 = vor.u32 %v4922_v26, %v4480_v28 }
 0x96d   : > { %2793 = vmatpush.bf16.msra.mxu3 %v4515_v4 }
 0x970   : > { %v2589_v31 = vpop.xlane.xlu1 %2588 }
 0x971   : > { %v2442_v30 = vpop.f32.mrf.mxu2  ;;  %5328 = vrcp.f32 %v2589_v31  ;;  %2794 = vmatpush.bf16.msra.mxu3 %v4507_v0  ;;  %v4921_v31 = vld [vmem:[#allocation26 + $0x14] sm:$0xf0] }
 0x972   : > { %v4470_v30 = vld [vmem:[#allocation26 + $0x10] sm:$0xf]  ;;  %v1313_v0 = vld [vmem:[#allocation10 + $0x40] sm:$0xff] }
 0x973   : > { %v2882_v13 = vpack.c.bf16 %v1314_v10, %v1313_v0 }
 0x975   : > { %2795 = vmatpush.bf16.msra.mxu3 %v4499_v15  ;;  %v1312_v15 = vld [vmem:[#allocation10 + $0x38] sm:$0xff] }
 0x976   : > { %v2881_v18 = vpack.c.bf16 %v1312_v15, %v1311_v14 }
 0x977   : > { %v5329_v36 = vpop.eup %5328 }
 0x978   : > { %v2591_v37 = vmul.f32 %v5329_v36, %v5325_v20  ;;  %v4487_v20 = vor.u32 %v4925_v17, %v4486_v16  ;;  %v4472_v36 = vld [vmem:[#allocation26 + $0x18] sm:$0xf0] }
 0x979   : > { %2796 = vmatpush.bf16.msra.mxu3 %v4491_v23 }
 0x97a   : > { %v2592_v39 = vpack.c.bf16 %v2591_v37, %v2591_v37  ;;  %2783 = vmatpush.bf16.msra.mxu2 %v4487_v20  ;;  %v4462_v37 = vld [vmem:[#allocation26] sm:$0xf]  ;;  %v1309_v20 = vld [vmem:[#allocation10 + $0x20] sm:$0xff] }
 0x97b   : > { %v2880_v23 = vpack.c.bf16 %v1310_v21, %v1309_v20 }
 0x97d   : > { %2797 = vmatpush.bf16.msra.mxu3 %v4483_v29  ;;  %v1305_v29 = vld [vmem:[#allocation10] sm:$0xff] }
 0x97e   : > { %2784 = vmatpush.bf16.msra.mxu2 %v4479_v27  ;;  %v2879_v27 = vpack.c.bf16 %v1308_v25, %v1307_v24  ;;  %v4940_v24 = vld [vmem:[#allocation28 + $0x30] sm:$0xff]  ;;  %v4939_v25 = vld [vmem:[#allocation28 + $0x28] sm:$0xff] }
 0x981   : > { %v2524_v34 = vpop.f32.mrf.mxu1 }
 0x982   : > { %v2528_v35 = vpack.c.bf16 %v2524_v34, %v2524_v34  ;;  %v4920_v34 = vld [vmem:[#allocation26 + $0x14] sm:$0xf] }
 0x984   : > { %4448 = vmatmul.msk.bf16.vlgmr.msrb.gmra.mxu2 %vm2301_vm8, %v2528_v35  ;;  %v4471_v35 = vor.u32 %v4921_v31, %v4470_v30  ;;  %v1306_v30 = vld [vmem:[#allocation10 + $0x8] sm:$0xff] }
 0x986   : > { %2785 = vmatpush.bf16.msra.mxu2 %v4471_v35  ;;  %v2878_v35 = vpack.c.bf16 %v1306_v30, %v1305_v29  ;;  %v4935_v29 = vld [vmem:[#allocation28 + $0x8] sm:$0xff] }
 0x988   : > { %v2594_v38 = vpop.permute.xlu1 %2593 }
 0x989   : > { %v2599_v32 = vsel %vm2338_vm7, %v2594_v38, 0  ;;  %v2526_v60 = vpop.f32.mrf.mxu1  ;;  %v4919_v38 = vld [vmem:[#allocation26 + $0x4] sm:$0xf0] }
 0x98a   : > { %2608 = vmatpush.bf16.msrb.mxu0 %v2599_v32  ;;  %v4475_v32 = vor.u32 %v4920_v34, %v4472_v36  ;;  %v4918_v60 = vld [vmem:[#allocation26 + $0x4] sm:$0xf]  ;;  %v4463_v40 = vor.u32 %v4919_v38, %v4462_v37 }
 0x98c   : > { %2798 = vmatpush.bf16.msra.mxu3 %v4475_v32  ;;  %2786 = vmatpush.bf16.msra.mxu2 %v4463_v40 }
 0x98d   : > { %4450 = vmatmul.msk.bf16.vlgmr.msrb.gmra.mxu0 %vm2321_vm9, %v2592_v39  ;;  %v4464_v39 = vld [vmem:[#allocation26 + $0x8] sm:$0xf0] }
 0xa07   : > { %v2553_v41 = vpop.f32.mrf.mxu2 }
 0xa08   : > { %v2557_v42 = vadd.f32 %v2553_v41, %v2469_v33  ;;  %v4467_v33 = vor.u32 %v4918_v60, %v4464_v39 }
 0xa0a   : > { %v2610_v43 = vpop.f32.mrf.mxu0  ;;  %2799 = vmatpush.bf16.msra.mxu3 %v4467_v33  ;;  %v2834_v33 = vld [vmem:[%s6915_s12] sm:$0x7]  ;;  %s4819_s12 = sshll.u32 %s6292_s10, 3  ;;  %s3728_s10 = scalar_lea.sflag [#allocation4], %s6568_s20 }
 0xa0b   : > { %v2614_v46 = vpack.c.bf16 %v2610_v43, %v2610_v43 }
 0xa0d   : > { %4459 = vmatmul.msk.bf16.vlgmr.msra.gmra.mxu1 %vm2301_vm8, %v2614_v46 }
 0xa0f   : > { %v2555_v47 = vpop.f32.mrf.mxu2 }
 0xa12   : > { %v2612_v48 = vpop.f32.mrf.mxu0 }
 0xa8a   : > { %v2639_v49 = vpop.f32.mrf.mxu1 }
 0xa8b   : > { %v2643_v50 = vadd.f32 %v2639_v49, %v2557_v42 }
 0xa8d   : > { %v2644_v51 = vadd.f32 %v2643_v50, %v6653_v61 }
 0xa8f   : > { %v6706_v52 = vadd.f32 %v2644_v51, %v6653_v61 }
 0xa91   : > { %2648 = vadd.xlane.f32.xlu2 %v6706_v52 }
 0xa92   : > { %v2641_v53 = vpop.f32.mrf.mxu1 }
 0xa93   : > { %v5282_v53 = vld [vmem:[#allocation25] ss:$0 sm:$0xff] }
 0xb04   : > { %v2649_v59 = vpop.xlane.xlu2 %2648 }
 0xb05   : > { %v2650_v44 = vmul.f32 %v2649_v59, %v6617_v19  ;;  %v2693_v59 = vld [vmem:[%s6914_s5] sm:$0x3]  ;;  %s6929_s5 = sld [smem:[#allocation69_spill]] }
 0xb06   : > { %v2695_v36 = vperm.slane %v2693_v59, 0 }
 0xb07   : > { %v6711_v45 = vsub.f32 %v6706_v52, %v2650_v44  ;;  %v2696_v44 = vperm.slane %v2693_v59, 1 }
 0xb09   : > { %v2652_v61 = vmul.f32 %v6711_v45, %v6711_v45 }
 0xb0b   : > { %2653 = vadd.xlane.f32.xlu0 %v2652_v61  ;;  %v1319_v61 = vld [vmem:[#allocation10 + $0x70] sm:$0xff] }
 0xb0c   : > { %v2885_v1 = vpack.c.bf16 %v1320_v62, %v1319_v61 }
 0xb0e   : > { %2886 = vmatpush.bf16.msra.mxu0 %v2885_v1 }
 0xb12   : > { %2887 = vmatpush.bf16.msra.mxu0 %v2884_v5 }
 0xb7e   : > { %v2654_v41 = vpop.xlane.xlu0 %2653 }
 0xb7f   : > { %v2655_v42 = vmul.f32 %v2654_v41, %v6617_v19 }
 0xb81   : > { %v2656_v43 = vadd.f32 1e-05, %v2655_v42 }
 0xb83   : > { %5330 = vrsqrt.f32 %v2656_v43  ;;  %vm2663_vm11 = vweird.f32 %v2656_v43 }
 0xb89   : > { %v5331_v46 = vpop.eup %5330 }
 0xb8a   : > { %v2658_v47 = vmul.f32 %v5331_v46, %v2656_v43  ;;  %vm2664_vm10 = vweird.f32 %v5331_v46  ;;  %v2835_v43 = vperm.slane %v2834_v33, 0 }
 0xb8b   : > { %vm2665_vm12 = vmor %vm2663_vm11, %vm2664_vm10 }
 0xb8c   : > { %v2659_v48 = vmul.f32 %v5331_v46, %v2658_v47 }
 0xb8e   : > { %v2660_v49 = vmul.f32 0.5, %v2659_v48 }
 0xb90   : > { %v2661_v50 = vsub.f32 1.5, %v2660_v49  ;;  %v2840_v49 = vperm.slane %v2834_v33, 2 }
 0xb92   : > { %v2662_v51 = vmul.f32 %v5331_v46, %v2661_v50 }
 0xb94   : > { %v2666_v54 = vsel %vm2665_vm12, %v5331_v46, %v2662_v51  ;;  %v2837_v46 = vperm.slane %v2834_v33, 1 }
 0xb95   : > { %v2667_v55 = vmul.f32 %v2666_v54, %v6711_v45  ;;  %v1316_v45 = vld [vmem:[#allocation10 + $0x58] sm:$0xff] }
 0xb96   : > { %v2883_v8 = vpack.c.bf16 %v1316_v45, %v1315_v6 }
 0xb97   : > { %v2671_v57 = vmul.f32 %v5282_v53, %v2667_v55 }
 0xb98   : > { %2888 = vmatpush.bf16.msra.mxu0 %v2883_v8 }
 0xb99   : > { %v2675_v58 = vadd.f32 %v5283_v56, %v2671_v57 }
 0xb9b   : > { %v2692_v9 = vpack.c.bf16 %v2675_v58, %v2675_v58 }
 0xb9c   : > { %2889 = vmatpush.bf16.msra.mxu0 %v2882_v13 }
 0xb9d   : > { %2787 = vmatmul.bf16.vlgmr.msra.gmra.mxu2 %v2692_v9  ;;  %2800 = vmatmul.bf16.vlgmr.msra.gmra.mxu3 %v2692_v9 }
 0xba0   : > { %2890 = vmatpush.bf16.msra.mxu0 %v2881_v18 }
 0xba4   : > { %2891 = vmatpush.bf16.msra.mxu0 %v2880_v23  ;;  %v4941_v23 = vld [vmem:[#allocation28 + $0x38] sm:$0xff] }
 0xba5   : > { %2998 = vmatpush.bf16.msrb.mxu1 %v4941_v23 }
 0xba8   : > { %2892 = vmatpush.bf16.msra.mxu0 %v2879_v27  ;;  %v4937_v27 = vld [vmem:[#allocation28 + $0x18] sm:$0xff] }
 0xba9   : > { %2999 = vmatpush.bf16.msrb.mxu1 %v4940_v24  ;;  %v4640_v24 = vld [vmem:[#allocation29 + $0xa0] sm:$0xf] }
 0xbac   : > { %2893 = vmatpush.bf16.msra.mxu0 %v2878_v35 }
 0xbad   : > { %3000 = vmatpush.bf16.msrb.mxu1 %v4939_v25  ;;  %v4964_v25 = vld [vmem:[#allocation29 + $0xac] sm:$0xf0] }
 0xc20   : > { %v2788_v3 = vpop.f32.mrf.mxu2  ;;  %v2801_v4 = vpop.f32.mrf.mxu3 }
 0xc21   : > { %v2802_v22 = vadd.f32 %v2801_v4, %v2696_v44  ;;  %v2789_v39 = vadd.f32 %v2788_v3, %v2695_v36 }
 0xc23   : > { %v4524_v7 = vmul.f32 -1.442695, %v2802_v22 }
 0xc25   : > { %5332 = vpow2.f32 %v4524_v7 }
 0xc28   : > { %v2790_v11 = vpop.f32.mrf.mxu2  ;;  %v2803_v12 = vpop.f32.mrf.mxu3 }
 0xc2b   : > { %v5333_v16 = vpop.eup %5332 }
 0xc2c   : > { %v2808_v17 = vadd.f32 1.0, %v5333_v16 }
 0xc2e   : > { %5334 = vrcp.f32 %v2808_v17  ;;  %v2820_v34 = vand.u32 2147483648, %v2808_v17  ;;  %v2818_v38 = vand.u32 2147483647, %v2808_v17  ;;  %vm2814_vm14 = vweird.f32 %v2808_v17 }
 0xc30   : > { %v2821_v60 = vor.u32 1.1754944e-38, %v2820_v34  ;;  %vm2819_vm0 = vcmp.eq.f32.partialorder %v2818_v38, 8.507059e+37  ;;  %v4934_v34 = vld [vmem:[#allocation28] sm:$0xff] }
 0xc34   : > { %v5335_v26 = vpop.eup %5334 }
 0xc35   : > { %v2810_v28 = vmul.f32 %v5335_v26, %v2808_v17  ;;  %vm2815_vm13 = vweird.f32 %v5335_v26 }
 0xc36   : > { %vm2816_vm15 = vmor %vm2814_vm14, %vm2815_vm13 }
 0xc37   : > { %v2811_v31 = vsub.f32 1.0, %v2810_v28  ;;  %v4936_v28 = vld [vmem:[#allocation28 + $0x10] sm:$0xff] }
 0xc39   : > { %v2812_v37 = vmul.f32 %v5335_v26, %v2811_v31 }
 0xc3b   : > { %v2813_v32 = vadd.f32 %v5335_v26, %v2812_v37 }
 0xc3d   : > { %v2817_v40 = vsel %vm2816_vm15, %v5335_v26, %v2813_v32  ;;  %v4938_v26 = vld [vmem:[#allocation28 + $0x20] sm:$0xff] }
 0xc3e   : > { %v2822_v41 = vsel %vm2819_vm0, %v2821_v60, %v2817_v40  ;;  %3001 = vmatpush.bf16.msrb.mxu1 %v4938_v26  ;;  %v4962_v26 = vld [vmem:[#allocation29 + $0xa4] sm:$0xf] }
 0xc3f   : > { %v2824_v42 = vmul.f32 %v2822_v41, %v2789_v39 }
 0xc41   : > { %v2826_v47 = vrot.slane %v2824_v42, 7  ;;  %v2830_v48 = vrot.slane %v2824_v42, 1  ;;  %v2838_v54 = vmul.f32 %v2837_v46, %v2824_v42 }
 0xc42   : > { %3002 = vmatpush.bf16.msrb.mxu1 %v4937_v27  ;;  %v4641_v27 = vor.u32 %v4964_v25, %v4640_v24  ;;  %v4944_v24 = vld [vmem:[#allocation29 + $0xc] sm:$0xf0]  ;;  %v4942_v25 = vld [vmem:[#allocation29 + $0x4] sm:$0xf] }
 0xc43   : > { %v2829_v50 = vsel %vm2828_vm1, 0.0, %v2826_v47  ;;  %v2833_v51 = vsel %vm2832_vm2, %v2830_v48, 0.0  ;;  %v5284_v48 = vld [vmem:[%s6916_s6] ss:$0 sm:$0xff]  ;;  %s3738_s6 = scalar_lea.hbm %s6928_s22, %s4819_s12 }
 0xc44   : > { %v2836_v53 = vmul.f32 %v2835_v43, %v2829_v50  ;;  %v2841_v56 = vmul.f32 %v2840_v49, %v2833_v51  ;;  %v5285_v50 = vld [vmem:[%s6917_s3] ss:$0 sm:$0xff]  ;;  %s1284_s3 = scalar_lea.vmem [#allocation32], %s4040_s23 }
 0xc46   : > { %v2839_v55 = vadd.f32 %v2838_v54, %v2836_v53  ;;  %3003 = vmatpush.bf16.msrb.mxu1 %v4936_v28  ;;  %v4642_v28 = vld [vmem:[#allocation29 + $0xb0] sm:$0xf0] }
 0xc48   : > { %v2842_v57 = vadd.f32 %v2841_v56, %v2839_v55  ;;  %v5286_v55 = vld [vmem:[%s6918_s17] ss:$0 sm:$0xff]  ;;  %s3740_s17 = sshll.u32 %s1284_s3, 4  ;;  %s3741_s17 = int_to_ptr.vmem [resolvable:$true] %s3740_s17 }
 0xc4a   : > { %v4525_v58 = vmul.f32 -1.442695, %v2842_v57  ;;  %3004 = vmatpush.bf16.msrb.mxu1 %v4935_v29  ;;  %v4648_v29 = vld [vmem:[#allocation29 + $0xa8] sm:$0xf] }
 0xc4c   : > { %5336 = vpow2.f32 %v4525_v58 }
 0xc4e   : > { %3005 = vmatpush.bf16.msrb.mxu1 %v4934_v34 }
 0xc52   : > { %v5337_v9 = vpop.eup %5336 }
 0xc53   : > { %v2846_v59 = vadd.f32 1.0, %v5337_v9 }
 0xc55   : > { %5338 = vrcp.f32 %v2846_v59  ;;  %v2858_v63 = vand.u32 2147483648, %v2846_v59  ;;  %v2856_v2 = vand.u32 2147483647, %v2846_v59  ;;  %vm2852_vm4 = vweird.f32 %v2846_v59 }
 0xc57   : > { %v2859_v4 = vor.u32 1.1754944e-38, %v2858_v63  ;;  %vm2857_vm6 = vcmp.eq.f32.partialorder %v2856_v2, 8.507059e+37  ;;  %v4680_v2 = vld [vmem:[#allocation29 + $0xe8] sm:$0xf] }
 0xc5b   : > { %v5339_v44 = vpop.eup %5338 }
 0xc5c   : > { %v2848_v61 = vmul.f32 %v5339_v44, %v2846_v59  ;;  %vm2853_vm3 = vweird.f32 %v5339_v44 }
 0xc5d   : > { %vm2854_vm5 = vmor %vm2852_vm4, %vm2853_vm3 }
 0xc5e   : > { %v2849_v62 = vsub.f32 1.0, %v2848_v61  ;;  %v4972_v61 = vld [vmem:[#allocation29 + $0xec] sm:$0xf0] }
 0xc60   : > { %v2850_v1 = vmul.f32 %v5339_v44, %v2849_v62  ;;  %v4970_v62 = vld [vmem:[#allocation29 + $0xe4] sm:$0xf] }
 0xc62   : > { %v2851_v3 = vadd.f32 %v5339_v44, %v2850_v1  ;;  %v4674_v1 = vld [vmem:[#allocation29 + $0xf0] sm:$0xf0] }
 0xc64   : > { %v2855_v5 = vsel %vm2854_vm5, %v5339_v44, %v2851_v3  ;;  %v4672_v44 = vld [vmem:[#allocation29 + $0xe0] sm:$0xf]  ;;  %v4973_v3 = vld [vmem:[#allocation29 + $0xf4] sm:$0xf0] }
 0xc65   : > { %v2860_v22 = vsel %vm2857_vm6, %v2859_v4, %v2855_v5  ;;  %v4673_v63 = vor.u32 %v4972_v61, %v4672_v44  ;;  %v4677_v4 = vor.u32 %v4970_v62, %v4674_v1  ;;  %v4681_v5 = vor.u32 %v4973_v3, %v4680_v2  ;;  %v4618_v44 = vld [vmem:[#allocation29 + $0x78] sm:$0xf0]  ;;  %v4592_v62 = vld [vmem:[#allocation29 + $0x40] sm:$0xf]  ;;  %v4950_v1 = vld [vmem:[#allocation29 + $0x44] sm:$0xf] }
 0xc66   : > { %v2862_v6 = vmul.f32 %v2860_v22, %v2842_v57  ;;  %v4971_v22 = vld [vmem:[#allocation29 + $0xec] sm:$0xf]  ;;  %v4594_v3 = vld [vmem:[#allocation29 + $0x50] sm:$0xf0] }
 0xc67   : > { %3246 = vmatpush.bf16.msrb.mxu2 %v4673_v63  ;;  %3259 = vmatpush.bf16.msrb.mxu3 %v4677_v4  ;;  %v4952_v63 = vld [vmem:[#allocation29 + $0x4c] sm:$0xf0]  ;;  %v4600_v4 = vld [vmem:[#allocation29 + $0x48] sm:$0xf] }
 0xc68   : > { %v2863_v45 = vrot.slane %v2862_v6, 4  ;;  %v2869_v7 = vmul.f32 %v2862_v6, %v2862_v6  ;;  %3272 = vmatpush.bf16.msrb.mxu0 %v4681_v5  ;;  %v4593_v2 = vor.u32 %v4952_v63, %v4592_v62  ;;  %v4953_v5 = vld [vmem:[#allocation29 + $0x54] sm:$0xf0]  ;;  %v4994_v62 = vld [vmem:[#allocation31 + $0xa0] sm:$0xff] }
 0xc69   : > { %v5002_v63 = vld [vmem:[#allocation31 + $0xe0] sm:$0xff] }
 0xc6a   : > { %v2864_v8 = vadd.f32 %v2863_v45, %v2862_v6  ;;  %v2870_v0 = vrot.slane %v2869_v7, 4 }
 0xc6c   : > { %v2865_v10 = vrot.slane %v2864_v8, 2  ;;  %v2871_v11 = vadd.f32 %v2870_v0, %v2869_v7 }
 0xc6e   : > { %v2866_v12 = vadd.f32 %v2865_v10, %v2864_v8  ;;  %v2872_v13 = vrot.slane %v2871_v11, 2  ;;  %v4656_v10 = vld [vmem:[#allocation29 + $0xc0] sm:$0xf] }
 0xc70   : > { %v2867_v14 = vrot.slane %v2866_v12, 1  ;;  %v2873_v15 = vadd.f32 %v2872_v13, %v2871_v11  ;;  %v4968_v11 = vld [vmem:[#allocation29 + $0xcc] sm:$0xf0] }
 0xc71   : > { %v4657_v13 = vor.u32 %v4968_v11, %v4656_v10  ;;  %v4948_v10 = vld [vmem:[#allocation29 + $0x2c] sm:$0xf0]  ;;  %v4946_v11 = vld [vmem:[#allocation29 + $0x24] sm:$0xf] }
 0xc72   : > { %v2874_v16 = vrot.slane %v2873_v15, 1  ;;  %v2868_v17 = vadd.f32 %v2867_v14, %v2866_v12  ;;  %v4966_v12 = vld [vmem:[#allocation29 + $0xc4] sm:$0xf]  ;;  %v4658_v14 = vld [vmem:[#allocation29 + $0xd0] sm:$0xf0] }
 0xc73   : > { %3247 = vmatpush.bf16.msrb.mxu2 %v4657_v13  ;;  %v4578_v13 = vld [vmem:[#allocation29 + $0x30] sm:$0xf0] }
 0xc74   : > { %v2875_v18 = vadd.f32 %v2874_v16, %v2873_v15  ;;  %v4664_v15 = vld [vmem:[#allocation29 + $0xc8] sm:$0xf]  ;;  %v4969_v16 = vld [vmem:[#allocation29 + $0xd4] sm:$0xf0] }
 0xc76   : > { %v2876_v20 = vsel %vm2828_vm1, %v2868_v17, %v2875_v18  ;;  %v4661_v17 = vor.u32 %v4966_v12, %v4658_v14  ;;  %v4665_v18 = vor.u32 %v4969_v16, %v4664_v15  ;;  %v4584_v14 = vld [vmem:[#allocation29 + $0x28] sm:$0xf]  ;;  %v4949_v15 = vld [vmem:[#allocation29 + $0x34] sm:$0xf0]  ;;  %v4581_v16 = vor.u32 %v4946_v11, %v4578_v13 }
 0xc77   : > { %v2877_v21 = vpack.c.bf16 %v2876_v20, %v2876_v20  ;;  %v4967_v20 = vld [vmem:[#allocation29 + $0xcc] sm:$0xf]  ;;  %3248 = vmatpush.bf16.msrb.mxu2 %v4641_v27 }
 0xc78   : > { %3260 = vmatpush.bf16.msrb.mxu3 %v4661_v17  ;;  %3273 = vmatpush.bf16.msrb.mxu0 %v4665_v18  ;;  %v4585_v17 = vor.u32 %v4949_v15, %v4584_v14  ;;  %v4947_v18 = vld [vmem:[#allocation29 + $0x2c] sm:$0xf]  ;;  %v4976_v14 = vld [vmem:[#allocation31 + $0x10] sm:$0xff] }
 0xc79   : > { %2894 = vmatmul.bf16.vlgmr.msra.gmra.mxu0 %v2877_v21  ;;  %v4666_v21 = vld [vmem:[#allocation29 + $0xd8] sm:$0xf0]  ;;  %v4999_v11 = vld [vmem:[#allocation31 + $0xc8] sm:$0xff]  ;;  %v4984_v15 = vld [vmem:[#allocation31 + $0x50] sm:$0xff] }
 0xc7a   : > { %v4669_v23 = vor.u32 %v4967_v20, %v4666_v21  ;;  %v4586_v20 = vld [vmem:[#allocation29 + $0x38] sm:$0xf0]  ;;  %v4560_v21 = vld [vmem:[#allocation29] sm:$0xf] }
 0xc7b   : > { %v4561_v27 = vor.u32 %v4944_v24, %v4560_v21 }
 0xcf6   : > { %v2895_v30 = vpop.f32.mrf.mxu0 }
 0xcf7   : > { %v2899_v31 = vmul.f32 %v2895_v30, %v2895_v30  ;;  %v2904_v41 = vperm.slane %v2895_v30, 0 }
 0xcf9   : > { %v2901_v35 = vrot.slane %v2899_v31, 7  ;;  %v2905_v46 = vsub.f32 %v2862_v6, %v2904_v41  ;;  %v4682_v6 = vld [vmem:[#allocation29 + $0xf8] sm:$0xf0]  ;;  %v4645_v31 = vor.u32 %v4962_v26, %v4642_v28  ;;  %v4961_v41 = vld [vmem:[#allocation29 + $0x94] sm:$0xf0] }
 0xcfa   : > { %v4685_v45 = vor.u32 %v4971_v22, %v4682_v6  ;;  %v4597_v22 = vor.u32 %v4950_v1, %v4594_v3  ;;  %v4601_v6 = vor.u32 %v4953_v5, %v4600_v4  ;;  %v4562_v26 = vld [vmem:[#allocation29 + $0x10] sm:$0xf0]  ;;  %v4568_v28 = vld [vmem:[#allocation29 + $0x8] sm:$0xf]  ;;  %v4993_v3 = vld [vmem:[#allocation31 + $0x98] sm:$0xff] }
 0xcfb   : > { %v2903_v36 = vsub.f32 %v2895_v30, %v2901_v35  ;;  %v4965_v30 = vld [vmem:[#allocation29 + $0xb4] sm:$0xf0]  ;;  %v4963_v35 = vld [vmem:[#allocation29 + $0xac] sm:$0xf]  ;;  %3261 = vmatpush.bf16.msrb.mxu3 %v4645_v31  ;;  %v4565_v31 = vor.u32 %v4942_v25, %v4562_v26  ;;  %v4978_v5 = vld [vmem:[#allocation31 + $0x20] sm:$0xff] }
 0xcfc   : > { %3285 = vmatpush.bf16.msra.mxu1 %v4685_v45  ;;  %v4649_v34 = vor.u32 %v4965_v30, %v4648_v29  ;;  %v4951_v45 = vld [vmem:[#allocation29 + $0x4c] sm:$0xf]  ;;  %v4945_v29 = vld [vmem:[#allocation29 + $0x14] sm:$0xf0] }
 0xcfd   : > { %v2906_v37 = vadd.f32 1e-05, %v2903_v36  ;;  %v4650_v36 = vld [vmem:[#allocation29 + $0xb8] sm:$0xf0]  ;;  %v4943_v30 = vld [vmem:[#allocation29 + $0xc] sm:$0xf] }
 0xcfe   : > { %v2897_v38 = vpop.f32.mrf.mxu0  ;;  %3274 = vmatpush.bf16.msrb.mxu0 %v4649_v34  ;;  %v4569_v34 = vor.u32 %v4945_v29, %v4568_v28  ;;  %v4979_v1 = vld [vmem:[#allocation31 + $0x28] sm:$0xff]  ;;  %v5001_v4 = vld [vmem:[#allocation31 + $0xd8] sm:$0xff] }
 0xcff   : > { %5340 = vrsqrt.f32 %v2906_v37  ;;  %vm2913_vm8 = vweird.f32 %v2906_v37  ;;  %v4624_v38 = vld [vmem:[#allocation29 + $0x80] sm:$0xf]  ;;  %v4975_v26 = vld [vmem:[#allocation31 + $0x8] sm:$0xff] }
 0xd00   : > { %3286 = vmatpush.bf16.msra.mxu1 %v4669_v23  ;;  %v4589_v23 = vor.u32 %v4947_v18, %v4586_v20  ;;  %v4990_v18 = vld [vmem:[#allocation31 + $0x80] sm:$0xff] }
 0xd01   : > { %v4998_v20 = vld [vmem:[#allocation31 + $0xc0] sm:$0xff] }
 0xd05   : > { %v5341_v32 = vpop.eup %5340 }
 0xd06   : > { %v2908_v60 = vmul.f32 %v5341_v32, %v2906_v37  ;;  %vm2914_vm7 = vweird.f32 %v5341_v32  ;;  %v4653_v37 = vor.u32 %v4963_v35, %v4650_v36  ;;  %v4570_v35 = vld [vmem:[#allocation29 + $0x18] sm:$0xf0] }
 0xd07   : > { %vm2915_vm9 = vmor %vm2913_vm8, %vm2914_vm7  ;;  %v4573_v36 = vor.u32 %v4943_v30, %v4570_v35 }
 0xd08   : > { %v2909_v39 = vmul.f32 %v5341_v32, %v2908_v60  ;;  %v4958_v60 = vld [vmem:[#allocation29 + $0x84] sm:$0xf]  ;;  %3287 = vmatpush.bf16.msra.mxu1 %v4653_v37 }
 0xd0a   : > { %v2910_v40 = vmul.f32 0.5, %v2909_v39 }
 0xd0c   : > { %v2911_v33 = vsub.f32 1.5, %v2910_v40  ;;  %v4626_v40 = vld [vmem:[#allocation29 + $0x90] sm:$0xf0] }
 0xd0e   : > { %v2912_v42 = vmul.f32 %v5341_v32, %v2911_v33  ;;  %v4632_v33 = vld [vmem:[#allocation29 + $0x88] sm:$0xf] }
 0xd10   : > { %v2916_v43 = vsel %vm2915_vm9, %v5341_v32, %v2912_v42  ;;  %v4960_v32 = vld [vmem:[#allocation29 + $0x8c] sm:$0xf0]  ;;  %v4629_v42 = vor.u32 %v4958_v60, %v4626_v40 }
 0xd11   : > { %v2917_v47 = vperm.slane %v2916_v43, 1  ;;  %v4625_v39 = vor.u32 %v4960_v32, %v4624_v38  ;;  %v4633_v43 = vor.u32 %v4961_v41, %v4632_v33 }
 0xd12   : > { %3262 = vmatpush.bf16.msrb.mxu3 %v4629_v42 }
 0xd13   : > { %v2918_v49 = vmul.f32 %v2917_v47, %v2905_v46  ;;  %v4959_v46 = vld [vmem:[#allocation29 + $0x8c] sm:$0xf]  ;;  %v4634_v47 = vld [vmem:[#allocation29 + $0x98] sm:$0xf0]  ;;  %3249 = vmatpush.bf16.msrb.mxu2 %v4625_v39  ;;  %3275 = vmatpush.bf16.msrb.mxu0 %v4633_v43  ;;  %v5287_v43 = vld [vmem:[%s6919_s13] ss:$0 sm:$0xff] }
 0xd14   : > { %s3742_s13 = sshll.u32 %s3738_s6, 4  ;;  %s3743_s13 = int_to_ptr.hbm [resolvable:$true] %s3742_s13 }
 0xd15   : > { %v2923_v51 = vmul.f32 %v5284_v48, %v2918_v49  ;;  %v4637_v48 = vor.u32 %v4959_v46, %v4634_v47  ;;  %v4608_v49 = vld [vmem:[#allocation29 + $0x60] sm:$0xf] }
 0xd17   : > { %v2928_v53 = vadd.f32 %v5285_v50, %v2923_v51  ;;  %v4956_v50 = vld [vmem:[#allocation29 + $0x6c] sm:$0xf0]  ;;  %v4954_v51 = vld [vmem:[#allocation29 + $0x64] sm:$0xf]  ;;  %3288 = vmatpush.bf16.msra.mxu1 %v4637_v48  ;;  %v5288_v48 = vld [vmem:[%s6920_s14] ss:$0 sm:$0xff] }
 0xd18   : > { %s5946_s14 = sshra.s32 %s3743_s13, 4  ;;  %s5947_s14 = int_to_ptr.hbm [resolvable:$true] %s5946_s14 }
 0xd19   : > { %v2945_v54 = vpack.c.bf16 %v2928_v53, %v2928_v53  ;;  %v4609_v53 = vor.u32 %v4956_v50, %v4608_v49  ;;  %p5953_p7 = scmp.lt.s32.totalorder %s5947_s14, %s6928_s22 }
 0xd1b   : > { %3006 = vmatmul.bf16.vlgmr.msrb.gmra.mxu1 %v2945_v54  ;;  %v4610_v54 = vld [vmem:[#allocation29 + $0x70] sm:$0xf0]  ;;  %3250 = vmatpush.bf16.msrb.mxu2 %v4609_v53  ;;  %v4997_v53 = vld [vmem:[#allocation31 + $0xb8] sm:$0xff] }
 0xd1f   : > { %3251 = vmatpush.bf16.msrb.mxu2 %v4593_v2  ;;  %v4987_v2 = vld [vmem:[#allocation31 + $0x68] sm:$0xff] }
 0xd98   : > { %v3007_v56 = vpop.f32.mrf.mxu1 }
 0xd99   : > { %v3008_v57 = vadd.f32 %v5286_v55, %v3007_v56  ;;  %v4616_v55 = vld [vmem:[#allocation29 + $0x68] sm:$0xf]  ;;  %v4957_v56 = vld [vmem:[#allocation29 + $0x74] sm:$0xf0] }
 0xd9b   : > { %v3011_v58 = vadd.f32 %v3008_v57, %v6706_v52  ;;  %v4613_v57 = vor.u32 %v4954_v51, %v4610_v54  ;;  %v5005_v54 = vld [vmem:[#allocation31 + $0xf8] sm:$0xff] }
 0xd9d   : > { %v6727_v9 = vadd.f32 %v3011_v58, %v6706_v52  ;;  %v4617_v58 = vor.u32 %v4957_v56, %v4616_v55  ;;  %3263 = vmatpush.bf16.msrb.mxu3 %v4613_v57  ;;  %v4996_v55 = vld [vmem:[#allocation31 + $0xb0] sm:$0xff]  ;;  %v4981_v57 = vld [vmem:[#allocation31 + $0x38] sm:$0xff] }
 0xd9e   : > { %v5004_v56 = vld [vmem:[#allocation31 + $0xf0] sm:$0xff] }
 0xd9f   : > { %3015 = vadd.xlane.f32.xlu1 %v6727_v9  ;;  %3276 = vmatpush.bf16.msrb.mxu0 %v4617_v58  ;;  %v4989_v58 = vld [vmem:[#allocation31 + $0x78] sm:$0xff] }
 0xda0   : > { %v3009_v59 = vpop.f32.mrf.mxu1 }
 0xda1   : > { %v4955_v59 = vld [vmem:[#allocation29 + $0x6c] sm:$0xf]  ;;  %3264 = vmatpush.bf16.msrb.mxu3 %v4597_v22  ;;  %v4986_v22 = vld [vmem:[#allocation31 + $0x60] sm:$0xff] }
 0xda2   : > { %v4621_v61 = vor.u32 %v4955_v59, %v4618_v44  ;;  %v5003_v59 = vld [vmem:[#allocation31 + $0xe8] sm:$0xff]  ;;  %v4980_v44 = vld [vmem:[#allocation31 + $0x30] sm:$0xff] }
 0xda3   : > { %3277 = vmatpush.bf16.msrb.mxu0 %v4601_v6  ;;  %v4992_v6 = vld [vmem:[#allocation31 + $0x90] sm:$0xff] }
 0xda4   : > { %3289 = vmatpush.bf16.msra.mxu1 %v4621_v61  ;;  %v4988_v61 = vld [vmem:[#allocation31 + $0x70] sm:$0xff] }
 0xda5   : > { %3265 = vmatpush.bf16.msrb.mxu3 %v4581_v16 }
 0xda7   : > { %3278 = vmatpush.bf16.msrb.mxu0 %v4585_v17 }
 0xda9   : > { %3266 = vmatpush.bf16.msrb.mxu3 %v4565_v31 }
 0xdab   : > { %3279 = vmatpush.bf16.msrb.mxu0 %v4569_v34 }
 0xdad   : > { %3655 = vmatpush.bf16.msra.mxu3 %v4989_v58 }
 0xdaf   : > { %3668 = vmatpush.bf16.msra.mxu0 %v4997_v53 }
 0xdb1   : > { %3656 = vmatpush.bf16.msra.mxu3 %v4988_v61 }
 0xdb3   : > { %3669 = vmatpush.bf16.msra.mxu0 %v4996_v55 }
 0xdb5   : > { %3657 = vmatpush.bf16.msra.mxu3 %v4987_v2 }
 0xdb9   : > { %3658 = vmatpush.bf16.msra.mxu3 %v4986_v22 }
 0xe12   : > { %v3016_v52 = vpop.xlane.xlu1 %3015 }
 0xe13   : > { %v3017_v7 = vmul.f32 %v3016_v52, %v6617_v19  ;;  %v4602_v52 = vld [vmem:[#allocation29 + $0x58] sm:$0xf0] }
 0xe15   : > { %v6732_v8 = vsub.f32 %v6727_v9, %v3017_v7  ;;  %v4605_v7 = vor.u32 %v4951_v45, %v4602_v52  ;;  %v5000_v45 = vld [vmem:[#allocation31 + $0xd0] sm:$0xff] }
 0xe16   : > { %v3076_v52 = vld [vmem:[%s6921_s9] sm:$0xf]  ;;  %s5948_s9 = scalar_lea.hbm %s5947_s14, 8 }
 0xe17   : > { %v3019_v0 = vmul.f32 %v6732_v8, %v6732_v8  ;;  %3290 = vmatpush.bf16.msra.mxu1 %v4605_v7  ;;  %v4977_v7 = vld [vmem:[#allocation31 + $0x18] sm:$0xff]  ;;  %v3081_v13 = vperm.slane %v3076_v52, 3  ;;  %v3078_v24 = vperm.slane %v3076_v52, 0  ;;  %v3079_v25 = vperm.slane %v3076_v52, 1  ;;  %p5949_p5 = scmp.ne.s32.totalorder %s5947_s14, %s5948_s9 }
 0xe19   : > { %3020 = vadd.xlane.f32.xlu2 %v3019_v0  ;;  %v4576_v0 = vld [vmem:[#allocation29 + $0x20] sm:$0xf]  ;;  %p5950_p6 = pnand %p5949_p5, %p6543_p2 }
 0xe1a   : > { %v4577_v12 = vor.u32 %v4948_v10, %v4576_v0  ;;  %v4985_v0 = vld [vmem:[#allocation31 + $0x58] sm:$0xff]  ;;  %v4991_v10 = vld [vmem:[#allocation31 + $0x88] sm:$0xff] }
 0xe1b   : > { %3291 = vmatpush.bf16.msra.mxu1 %v4589_v23  ;;  %3659 = vmatpush.bf16.msra.mxu3 %v4985_v0  ;;  %p5951_p8 = pneg %p5950_p6 }
 0xe1c   : > { %3252 = vmatpush.bf16.msrb.mxu2 %v4577_v12  ;;  %v3080_v12 = vperm.slane %v3076_v52, 2 }
 0xe1f   : > { %3292 = vmatpush.bf16.msra.mxu1 %v4573_v36  ;;  %3660 = vmatpush.bf16.msra.mxu3 %v4984_v15  ;;  %v4974_v36 = vld [vmem:[#allocation31] sm:$0xff] }
 0xe20   : > { %3253 = vmatpush.bf16.msrb.mxu2 %v4561_v27  ;;  %v4983_v27 = vld [vmem:[#allocation31 + $0x48] sm:$0xff] }
 0xe23   : > { %3681 = vmatpush.bf16.msrb.mxu1 %v5005_v54  ;;  %3661 = vmatpush.bf16.msra.mxu3 %v4983_v27 }
 0xe24   : > { %3642 = vmatpush.bf16.msra.mxu2 %v4981_v57 }
 0xe27   : > { %3682 = vmatpush.bf16.msrb.mxu1 %v5004_v56 }
 0xe28   : > { %3643 = vmatpush.bf16.msra.mxu2 %v4980_v44 }
 0xe2b   : > { %3683 = vmatpush.bf16.msrb.mxu1 %v5003_v59 }
 0xe2c   : > { %3644 = vmatpush.bf16.msra.mxu2 %v4979_v1 }
 0xe2f   : > { %3684 = vmatpush.bf16.msrb.mxu1 %v5002_v63 }
 0xe30   : > { %3645 = vmatpush.bf16.msra.mxu2 %v4978_v5 }
 0xe33   : > { %3685 = vmatpush.bf16.msrb.mxu1 %v5001_v4 }
 0xe34   : > { %3646 = vmatpush.bf16.msra.mxu2 %v4977_v7 }
 0xe37   : > { %3686 = vmatpush.bf16.msrb.mxu1 %v5000_v45 }
 0xe38   : > { %3647 = vmatpush.bf16.msra.mxu2 %v4976_v14 }
 0xe3b   : > { %3687 = vmatpush.bf16.msrb.mxu1 %v4999_v11 }
 0xe3c   : > { %3648 = vmatpush.bf16.msra.mxu2 %v4975_v26 }
 0xe3f   : > { %3688 = vmatpush.bf16.msrb.mxu1 %v4998_v20 }
 0xe40   : > { %3649 = vmatpush.bf16.msra.mxu2 %v4974_v36 }
 0xe8c   : > { %v3021_v37 = vpop.xlane.xlu2 %3020 }
 0xe8d   : > { %v3022_v38 = vmul.f32 %v3021_v37, %v6617_v19  ;;  %v4982_v37 = vld [vmem:[#allocation31 + $0x40] sm:$0xff] }
 0xe8e   : > { %3662 = vmatpush.bf16.msra.mxu3 %v4982_v37 }
 0xe8f   : > { %v3023_v32 = vadd.f32 1e-05, %v3022_v38 }
 0xe91   : > { %5342 = vrsqrt.f32 %v3023_v32  ;;  %vm3030_vm11 = vweird.f32 %v3023_v32 }
 0xe97   : > { %v5343_v60 = vpop.eup %5342 }
 0xe98   : > { %v3025_v39 = vmul.f32 %v5343_v60, %v3023_v32  ;;  %vm3031_vm10 = vweird.f32 %v5343_v60 }
 0xe99   : > { %vm3032_vm12 = vmor %vm3030_vm11, %vm3031_vm10 }
 0xe9a   : > { %v3026_v40 = vmul.f32 %v5343_v60, %v3025_v39 }
 0xe9c   : > { %v3027_v33 = vmul.f32 0.5, %v3026_v40 }
 0xe9e   : > { %v3028_v41 = vsub.f32 1.5, %v3027_v33 }
 0xea0   : > { %v3029_v42 = vmul.f32 %v5343_v60, %v3028_v41 }
 0xea2   : > { %v3033_v46 = vsel %vm3032_vm12, %v5343_v60, %v3029_v42 }
 0xea3   : > { %v3034_v47 = vmul.f32 %v3033_v46, %v6732_v8  ;;  %v4995_v8 = vld [vmem:[#allocation31 + $0xa8] sm:$0xff] }
 0xea4   : > { %3670 = vmatpush.bf16.msra.mxu0 %v4995_v8 }
 0xea5   : > { %v3038_v49 = vmul.f32 %v5287_v43, %v3034_v47 }
 0xea7   : > { %v3042_v50 = vadd.f32 %v5288_v48, %v3038_v49 }
 0xea8   : > { %3671 = vmatpush.bf16.msra.mxu0 %v4994_v62 }
 0xea9   : > { %v3075_v51 = vpack.c.bf16 %v3042_v50, %v3042_v50 }
 0xeab   : > { %3254 = vmatmul.bf16.vlgmr.msrb.gmra.mxu2 %v3075_v51  ;;  %3267 = vmatmul.bf16.vlgmr.msrb.gmra.mxu3 %v3075_v51 }
 0xeac   : > { %3280 = vmatmul.bf16.vlgmr.msrb.gmra.mxu0 %v3075_v51  ;;  %3293 = vmatmul.bf16.vlgmr.msra.gmra.mxu1 %v3075_v51 }
 0xead   : > { %3672 = vmatpush.bf16.msra.mxu0 %v4993_v3 }
 0xeb1   : > { %3673 = vmatpush.bf16.msra.mxu0 %v4992_v6 }
 0xeb5   : > { %3674 = vmatpush.bf16.msra.mxu0 %v4991_v10 }
 0xeb9   : > { %3675 = vmatpush.bf16.msra.mxu0 %v4990_v18 }
 0xf29   : > { %v3281_v16 = vpop.f32.mrf.mxu0  ;;  %v3294_v17 = vpop.f32.mrf.mxu1 }
 0xf2a   : > { %v6741_v21 = vadd.f32 %v3281_v16, %v3080_v12  ;;  %v6743_v23 = vadd.f32 %v3294_v17, %v3081_v13 }
 0xf2c   : > { %v4688_v28 = vmul.f32 -1.442695, %v6741_v21  ;;  %v4689_v29 = vmul.f32 -1.442695, %v6743_v23 }
 0xf2e   : > { %5344 = vpow2.f32 %v4688_v28  ;;  %v3255_v30 = vpop.f32.mrf.mxu2  ;;  %v3268_v31 = vpop.f32.mrf.mxu3 }
 0xf2f   : > { %5346 = vpow2.f32 %v4689_v29  ;;  %v6747_v34 = vadd.f32 %v3255_v30, %v3078_v24  ;;  %v6749_v35 = vadd.f32 %v3268_v31, %v3079_v25 }
 0xf31   : > { %v4686_v38 = vmul.f32 -1.442695, %v6747_v34  ;;  %v4687_v32 = vmul.f32 -1.442695, %v6749_v35  ;;  %v3283_v60 = vpop.f32.mrf.mxu0  ;;  %v3296_v39 = vpop.f32.mrf.mxu1 }
 0xf33   : > { %5348 = vpow2.f32 %v4686_v38 }
 0xf34   : > { %v5345_v40 = vpop.eup %5344  ;;  %5350 = vpow2.f32 %v4687_v32 }
 0xf35   : > { %v5347_v33 = vpop.eup %5346  ;;  %v3312_v41 = vadd.f32 1.0, %v5345_v40 }
 0xf36   : > { %v3313_v42 = vadd.f32 1.0, %v5347_v33  ;;  %v3257_v43 = vpop.f32.mrf.mxu2  ;;  %v3270_v46 = vpop.f32.mrf.mxu3 }
 0xf37   : > { %5352 = vrcp.f32 %v3312_v41  ;;  %v3353_v55 = vand.u32 2147483647, %v3312_v41  ;;  %v3355_v56 = vand.u32 2147483648, %v3312_v41  ;;  %vm3349_vm13 = vweird.f32 %v3312_v41 }
 0xf38   : > { %5354 = vrcp.f32 %v3313_v42  ;;  %v3368_v8 = vand.u32 2147483647, %v3313_v42  ;;  %v3370_v59 = vand.u32 2147483648, %v3313_v42  ;;  %vm3364_vm0 = vweird.f32 %v3313_v42 }
 0xf39   : > { %v5349_v47 = vpop.eup %5348  ;;  %vm6753_vm15 = vcmp.eq.f32.partialorder %v3353_v55, 8.507059e+37  ;;  %v3356_v2 = vor.u32 1.1754944e-38, %v3355_v56 }
 0xf3a   : > { %v5351_v48 = vpop.eup %5350  ;;  %v3310_v49 = vadd.f32 1.0, %v5349_v47  ;;  %vm6757_vm2 = vcmp.eq.f32.partialorder %v3368_v8, 8.507059e+37  ;;  %v3371_v6 = vor.u32 1.1754944e-38, %v3370_v59 }
 0xf3b   : > { %v3311_v50 = vadd.f32 1.0, %v5351_v48 }
 0xf3c   : > { %5356 = vrcp.f32 %v3310_v49  ;;  %v3323_v0 = vand.u32 2147483647, %v3310_v49  ;;  %v3325_v10 = vand.u32 2147483648, %v3310_v49  ;;  %vm3319_vm7 = vweird.f32 %v3310_v49 }
 0xf3d   : > { %v5353_v51 = vpop.eup %5352  ;;  %5358 = vrcp.f32 %v3311_v50  ;;  %v3338_v13 = vand.u32 2147483647, %v3311_v50  ;;  %v3340_v14 = vand.u32 2147483648, %v3311_v50  ;;  %vm3334_vm9 = vweird.f32 %v3311_v50 }
 0xf3e   : > { %v5355_v53 = vpop.eup %5354  ;;  %v3345_v54 = vmul.f32 %v5353_v51, %v3312_v41  ;;  %vm3350_vm14 = vweird.f32 %v5353_v51  ;;  %v3326_v28 = vor.u32 1.1754944e-38, %v3325_v10  ;;  %vm3324_vm10 = vcmp.eq.f32.partialorder %v3323_v0, 8.507059e+37 }
 0xf3f   : > { %v3360_v57 = vmul.f32 %v5355_v53, %v3313_v42  ;;  %vm3365_vm1 = vweird.f32 %v5355_v53  ;;  %vm3351_vm3 = vmor %vm3349_vm13, %vm3350_vm14  ;;  %v3341_v36 = vor.u32 1.1754944e-38, %v3340_v14  ;;  %vm3339_vm12 = vcmp.eq.f32.partialorder %v3338_v13, 8.507059e+37  ;;  %v5289_v42 = vld [vmem:[%s6926_s7] ss:$0 sm:$0xff]  ;;  %s5952_s7 = scalar_lea.hbm %s6928_s22, 16 }
 0xf40   : > { %v3346_v58 = vsub.f32 1.0, %v3345_v54  ;;  %vm3366_vm4 = vmor %vm3364_vm0, %vm3365_vm1  ;;  %p5954_p9 = scmp.lt.s32.totalorder %s5952_s7, %s5948_s9 }
 0xf41   : > { %v3361_v44 = vsub.f32 1.0, %v3360_v57 }
 0xf42   : > { %v5357_v61 = vpop.eup %5356  ;;  %v3347_v62 = vmul.f32 %v5353_v51, %v3346_v58  ;;  %p5955_p11 = por %p5954_p9, %p5953_p7 }
 0xf43   : > { %v5359_v1 = vpop.eup %5358  ;;  %v3362_v3 = vmul.f32 %v5355_v53, %v3361_v44  ;;  %v3315_v4 = vmul.f32 %v5357_v61, %v3310_v49  ;;  %vm3320_vm5 = vweird.f32 %v5357_v61 }
 0xf44   : > { %v3348_v5 = vadd.f32 %v5353_v51, %v3347_v62  ;;  %v3330_v45 = vmul.f32 %v5359_v1, %v3311_v50  ;;  %vm3335_vm6 = vweird.f32 %v5359_v1  ;;  %vm3321_vm8 = vmor %vm3319_vm7, %vm3320_vm5  ;;  %p5956_p12 = pnand %p5955_p11, %p5951_p8 }
 0xf45   : > { %v3363_v52 = vadd.f32 %v5355_v53, %v3362_v3  ;;  %v3316_v7 = vsub.f32 1.0, %v3315_v4  ;;  %vm3336_vm11 = vmor %vm3334_vm9, %vm3335_vm6  ;;  %v5290_v3 = vld [vmem:[%s6927_s16] ss:$0 sm:$0xff] }
 0xf46   : > { %v3352_v11 = vsel %vm3351_vm3, %v5353_v51, %v3348_v5  ;;  %v3331_v12 = vsub.f32 1.0, %v3330_v45  ;;  %v5291_v5 = vld [vmem:[%s6929_s5] ss:$0 sm:$0xff] }
 0xf47   : > { %v3357_v15 = vsel %vm6753_vm15, %v3356_v2, %v3352_v11  ;;  %v3367_v16 = vsel %vm3366_vm4, %v5355_v53, %v3363_v52  ;;  %v3317_v17 = vmul.f32 %v5357_v61, %v3316_v7 }
 0xf48   : > { %v3376_v18 = vmul.f32 %v3357_v15, %v6741_v21  ;;  %v3372_v20 = vsel %vm6757_vm2, %v3371_v6, %v3367_v16  ;;  %v3332_v24 = vmul.f32 %v5359_v1, %v3331_v12 }
 0xf49   : > { %v3377_v25 = vmul.f32 %v3372_v20, %v6743_v23  ;;  %v3318_v26 = vadd.f32 %v5357_v61, %v3317_v17 }
 0xf4a   : > { %v3444_v27 = vpack.c.bf16 %v3376_v18, %v3376_v18  ;;  %v3333_v29 = vadd.f32 %v5359_v1, %v3332_v24 }
 0xf4b   : > { %v3445_v30 = vpack.c.bf16 %v3377_v25, %v3377_v25  ;;  %v3322_v31 = vsel %vm3321_vm8, %v5357_v61, %v3318_v26 }
 0xf4c   : > { %v3327_v21 = vsel %vm3324_vm10, %v3326_v28, %v3322_v31  ;;  %v3337_v37 = vsel %vm3336_vm11, %v5359_v1, %v3333_v29  ;;  %3676 = vmatmul.bf16.vlgmr.msra.gmra.mxu0 %v3444_v27 }
 0xf4d   : > { %v3374_v38 = vmul.f32 %v3327_v21, %v6747_v34  ;;  %v3342_v23 = vsel %vm3339_vm12, %v3341_v36, %v3337_v37  ;;  %3689 = vmatmul.bf16.vlgmr.msrb.gmra.mxu1 %v3445_v30 }
 0xf4e   : > { %v3375_v32 = vmul.f32 %v3342_v23, %v6749_v35 }
 0xf4f   : > { %v3442_v60 = vpack.c.bf16 %v3374_v38, %v3374_v38 }
 0xf50   : > { %v3443_v39 = vpack.c.bf16 %v3375_v32, %v3375_v32 }
 0xf51   : > { %3650 = vmatmul.bf16.vlgmr.msra.gmra.mxu2 %v3442_v60 }
 0xf52   : > { %3663 = vmatmul.bf16.vlgmr.msra.gmra.mxu3 %v3443_v39 }
 0xfc9   : > { %v3677_v40 = vpop.f32.mrf.mxu0 }
 0xfca   : > { %v3690_v33 = vpop.f32.mrf.mxu1 }
 0xfd1   : > { %v3679_v41 = vpop.f32.mrf.mxu0 }
 0xfd2   : > { %v3692_v43 = vpop.f32.mrf.mxu1 }
 0xfd4   : > { %v3651_v46 = vpop.f32.mrf.mxu2 }
 0xfd5   : > { %v3652_v47 = vadd.f32 %v5289_v42, %v3651_v46  ;;  %v3664_v48 = vpop.f32.mrf.mxu3 }
 0xfd7   : > { %v3665_v49 = vadd.f32 %v3664_v48, %v3652_v47 }
 0xfd9   : > { %v3678_v50 = vadd.f32 %v3677_v40, %v3665_v49 }
 0xfdb   : > { %v3691_v51 = vadd.f32 %v3690_v33, %v3678_v50 }
 0xfdc   : > { %v3653_v34 = vpop.f32.mrf.mxu2 }
 0xfdd   : > { %v3666_v53 = vpop.f32.mrf.mxu3  ;;  %v3694_v54 = vadd.f32 %v3691_v51, %v6727_v9 }
 0xfdf   : > { %v3695_v35 = vadd.f32 %v3694_v54, %v6727_v9 }
 0xfe1   : > { %3698 = vadd.xlane.f32.xlu0 %v3695_v35 }
0x1054   : > { %v3699_v55 = vpop.xlane.xlu0 %3698 }
0x1055   : > { %v3700_v56 = vmul.f32 %v3699_v55, %v6617_v19 }
0x1057   : > { %v3701_v57 = vsub.f32 %v3695_v35, %v3700_v56 }
0x1059   : > { %v3702_v58 = vmul.f32 %v3701_v57, %v3701_v57 }
0x105b   : > { %3703 = vadd.xlane.f32.xlu2 %v3702_v58 }
0x10ce   : > { %v3704_v8 = vpop.xlane.xlu2 %3703 }
0x10cf   : > { %v3705_v59 = vmul.f32 %v3704_v8, %v6617_v19 }
0x10d1   : > { %v3706_v44 = vadd.f32 1e-05, %v3705_v59 }
0x10d3   : > { %5360 = vrsqrt.f32 %v3706_v44  ;;  %vm3713_vm14 = vweird.f32 %v3706_v44 }
0x10d9   : > { %v5361_v61 = vpop.eup %5360 }
0x10da   : > { %v3708_v62 = vmul.f32 %v5361_v61, %v3706_v44  ;;  %vm3714_vm13 = vweird.f32 %v5361_v61 }
0x10db   : > { %vm3715_vm15 = vmor %vm3713_vm14, %vm3714_vm13 }
0x10dc   : > { %v3709_v9 = vmul.f32 %v5361_v61, %v3708_v62 }
0x10de   : > { %v3710_v63 = vmul.f32 0.5, %v3709_v9 }
0x10e0   : > { %v3711_v1 = vsub.f32 1.5, %v3710_v63 }
0x10e2   : > { %v3712_v2 = vmul.f32 %v5361_v61, %v3711_v1 }
0x10e4   : > { %v3716_v4 = vsel %vm3715_vm15, %v5361_v61, %v3712_v2 }
0x10e5   : > { %v3717_v19 = vmul.f32 %v3716_v4, %v3701_v57 }
0x10e7   : > { %v3721_v22 = vmul.f32 %v5290_v3, %v3717_v19 }
0x10e9   : > { %v3725_v6 = vadd.f32 %v5291_v5, %v3721_v22 }
0x10eb   : > { %3726 = vst [vmem:[%s1284_s3] sm:$0xff] %v3725_v6 }
0x10ec   : > { %5959 = shalt.err (!%p5956_p12)
}
0x10ed   : > { %5080 = dma.vmem_to_hbm [thread:$0]  (%p6543_p2), %s3741_s17, 128, %s3743_s13, %s3728_s10  }
0x10ee PF: > { %s3754_s20 = sand.u32 1, %s6022_s28   ;;  %p6930_p13 = scmp.ne.s32.totalorder %s6892_s8, 0 }
0x10ef   : > { %p6931_p1 = scmp.ge.s32.totalorder %s6034_s0, 2  ;;  %s3755_s23 = scalar_lea.sflag [#allocation4], %s3754_s20 }
0x10f1   : > { %p5142_p3 = pnand %p6931_p1, %p6930_p13 }
0x10f3   : > { %p5143_p4 = pneg %p5142_p3 }
0x10f5   : > { %6017 = dma.done.wait (%p5143_p4), %s3755_s23, 128  }
0x10f6   : > { %6019 = vsyncadd (%p5143_p4), %s3755_s23, 4294967168  ;;  %p87_p10 = scmp.ge.s32.totalorder %s6517_s27, 4   ;;  %s6932_s28 = smov %s6026_s1 }
0x10f7   : > { %s6933_s1 = smov %s6030_s2  ;;  %s6934_s2 = smov %s6528_s11 }
0x10f8   : > { %s6935_s0 = smov %s6517_s27  ;;  %89 = sbr.rel (!%p87_p10) target bundleno = 84 (0x54), region = 297 }
0x10fd   :  { %3761 = vsyncpa [#allocation3], 1 }
0x10fe   :  { %3763 = vsyncpa [#allocation3 + $0x1], 1 }
0x10ff   :  { %3764 = vsyncpa [#allocation6], 1 }
0x1100   :  { %3765 = vsyncpa [#allocation9], 1 }
0x1101   :  { %3766 = vsyncpa [#allocation12], 1 }
0x1102   :  { %3767 = vsyncpa [#allocation15], 1 }
0x1103   :  { %3768 = vsyncpa [#allocation18], 1 }
0x1104   :  { %3769 = vsyncpa [#allocation21], 1 }
0x1105   :  { %3770 = vsyncpa [#allocation24], 1 }
0x1106   :  { %3771 = vsyncpa [#allocation27], 1 }
0x1107   :  { %3772 = vsyncpa [#allocation30], 1 }
0x1108   :  { %3773 = vsyncpa [#allocation4], 1 }
0x1109   :  { %3775 = vsyncpa [#allocation4 + $0x1], 1 }

</bundles_post_ra>
